<compile_context>
chip_gen: v7x
topology: tpu7x:2x2x1
jax: 0.10.0
libtpu: 0.0.40
codegen_flags: <defaults>
</compile_context>

<pallas_src>
import jax
import jax.numpy as jnp
from jax import lax
from jax.experimental import pallas as pl
from jax.experimental.pallas import tpu as pltpu

IN_CHANNELS = 3
NDF = 32
OUT_CHANNELS = 1
LEAK = 0.2

H0 = W0 = 16                 # test spatial size (fused kernel is specialized to it)
C0 = 2 * IN_CHANNELS         # channels after torch.cat((x, label), dim=1)


# --------------------------- weight preparation -----------------------------

def _pool_grouped_toeplitz(w_oihw, width):
    """Block-Toeplitz matmul weights for a 3x3 'same' conv, pool-grouped.

    w_oihw: (Cout, Cin, 3, 3) conv weight; width: input/output spatial width.
    Returns (3, width*Cin, width*Cout) f32.  Output block q of the matmul
    corresponds to conv column col(q) = 2*(q % (width//2)) + q // (width//2),
    i.e. the first half of the output lanes holds even columns and the second
    half odd columns, so a 2x2 max-pool over W is max(first_half, second_half).
    """
    cout, cin, _, _ = w_oihw.shape
    half = width // 2
    q = jnp.arange(width)
    col = 2 * (q % half) + q // half                      # conv column per block
    p = jnp.arange(width)
    mats = []
    for dy in range(3):
        t = jnp.zeros((width * cin, width * cout), jnp.float32)
        for dx in range(3):
            # input block p feeds output block q iff p == col(q) + dx - 1
            # (out-of-range taps hit the zero 'same' padding -> no entry).
            sel = (p[:, None] == (col[None, :] + dx - 1)).astype(jnp.float32)
            t = t + jnp.kron(sel, w_oihw[:, :, dy, dx].T.astype(jnp.float32))
        mats.append(t)
    return jnp.stack(mats, axis=0)


# ------------------------------ Pallas kernel --------------------------------

def _discriminator_kernel(x_ref, w1_ref, w2_ref, w3_ref, w4_ref, w5_ref, o_ref,
                          xp1, xp2, xp3, xp4):
    """Fused 5-layer discriminator forward for one batch element (grid step).

    x_ref : (16, 96)        flattened NHWC input rows (W*Cin on lanes).
    wN_ref: (3, K, 512)     resident pool-grouped Toeplitz conv weights.
    w5_ref: (1, 256)        resident center-tap weights of the final conv.
    o_ref : (1, 1)          sigmoid output.
    xpN   : VMEM scratch    row-padded activations of each layer.
    """
    # Zero the padded-activation scratches (row 0 / row H+1 act as the conv
    # 'same' zero padding; the interiors are fully overwritten below).
    xp1[...] = jnp.zeros_like(xp1)
    xp2[...] = jnp.zeros_like(xp2)
    xp3[...] = jnp.zeros_like(xp3)
    xp4[...] = jnp.zeros_like(xp4)

    # Layer-1 input -> interior rows of xp1 (full lane width, no masked lanes).
    xp1[1:1 + H0, :] = x_ref[...]

    def conv_lrelu_wpool(xp_ref, wt_ref, h, w, cout):
        # 3x3 'same' conv as 3 row-shifted MXU matmuls (in-kernel im2col).
        z = jnp.dot(xp_ref[0:h, :], wt_ref[0], preferred_element_type=jnp.float32)
        z = z + jnp.dot(xp_ref[1:1 + h, :], wt_ref[1],
                        preferred_element_type=jnp.float32)
        z = z + jnp.dot(xp_ref[2:2 + h, :], wt_ref[2],
                        preferred_element_type=jnp.float32)
        z = jnp.where(z >= 0.0, z, LEAK * z)               # LeakyReLU(0.2)
        half = (w // 2) * cout                             # == 256 every layer
        # MaxPool2d over W: even-column half vs odd-column half (vreg aligned).
        return jnp.maximum(z[:, :half], z[:, half:])        # (h, half)

    def hpool_into(m, xp_next_ref, h):
        # MaxPool2d over H: pair rows and write the next layer's padded interior.
        for i in range(h // 2):
            xp_next_ref[1 + i:2 + i, :] = jnp.maximum(
                m[2 * i:2 * i + 1, :], m[2 * i + 1:2 * i + 2, :])

    m1 = conv_lrelu_wpool(xp1, w1_ref, 16, 16, NDF)         # (16, 256)
    hpool_into(m1, xp2, 16)
    m2 = conv_lrelu_wpool(xp2, w2_ref, 8, 8, NDF * 2)       # (8, 256)
    hpool_into(m2, xp3, 8)
    m3 = conv_lrelu_wpool(xp3, w3_ref, 4, 4, NDF * 4)       # (4, 256)
    hpool_into(m3, xp4, 4)
    m4 = conv_lrelu_wpool(xp4, w4_ref, 2, 2, NDF * 8)       # (2, 256)
    v = jnp.maximum(m4[0:1, :], m4[1:2, :])                 # (1, 256) -> 1x1 map

    # Layer 5: 3x3 'same' conv on a 1x1 map == center-tap dot; do it on the VPU
    # (multiply + lane reduce) instead of a (1,K)@(K,1) MXU GEMV.  Then Sigmoid.
    logit = jnp.sum(v * w5_ref[...], axis=1, keepdims=True)  # (1, 1)
    o_ref[...] = 1.0 / (1.0 + jnp.exp(-logit))


def _discriminator_pallas(x2d, wts, w5_row):
    n = x2d.shape[0]
    k1 = W0 * C0                       # 96
    return pl.pallas_call(
        _discriminator_kernel,
        out_shape=jax.ShapeDtypeStruct((n, 1, 1), jnp.float32),
        grid=(n,),
        in_specs=[
            pl.BlockSpec((None, H0, k1), lambda i: (i, 0, 0)),      # per-image input
            pl.BlockSpec((3, k1, 512), lambda i: (0, 0, 0)),        # resident weights
            pl.BlockSpec((3, 256, 512), lambda i: (0, 0, 0)),
            pl.BlockSpec((3, 256, 512), lambda i: (0, 0, 0)),
            pl.BlockSpec((3, 256, 512), lambda i: (0, 0, 0)),
            pl.BlockSpec((1, 256), lambda i: (0, 0)),
        ],
        out_specs=pl.BlockSpec((None, 1, 1), lambda i: (i, 0, 0)),
        scratch_shapes=[
            pltpu.VMEM((H0 + 2, k1), jnp.float32),    # layer-1 padded input (18, 96)
            pltpu.VMEM((10, 256), jnp.float32),       # layer-2 padded input
            pltpu.VMEM((6, 256), jnp.float32),        # layer-3 padded input
            pltpu.VMEM((4, 256), jnp.float32),        # layer-4 padded input
        ],
        compiler_params=pltpu.CompilerParams(
            # Batch steps are independent; 'parallel' vs 'arbitrary' has ~zero
            # measured impact (only CORE_PARALLEL changes codegen - see TODO).
            dimension_semantics=("arbitrary",),
        ),
    )(x2d, *wts, w5_row)


# --------------------------------- glue --------------------------------------

def init_params(key):
    """Deterministic conv weights (OIHW, bias=False) for the 5 conv layers."""
    dims = [(NDF, IN_CHANNELS * 2), (NDF * 2, NDF), (NDF * 4, NDF * 2),
            (NDF * 8, NDF * 4), (OUT_CHANNELS, NDF * 8)]
    params = []
    for i, (cout, cin) in enumerate(dims):
        k = jax.random.fold_in(key, i)
        w = jax.random.normal(k, (cout, cin, 3, 3), jnp.float32) / jnp.sqrt(9.0 * cin)
        params.append(w)
    return params


@jax.jit
def discriminator_forward(x_nchw, label_nchw, params):
    n, _, h, w = x_nchw.shape
    assert h == H0 and w == W0, "fused kernel is specialized to 16x16 inputs"
    # torch.cat((x, label), dim=1), then NCHW -> flattened NHWC rows (H, W*C).
    xcat = jnp.concatenate([x_nchw, label_nchw], axis=1)          # (N, 6, H, W)
    x2d = xcat.transpose(0, 2, 3, 1).reshape(n, h, w * C0)        # (N, 16, 96)
    wts = [
        _pool_grouped_toeplitz(params[0], 16),                    # (3,  96, 512)
        _pool_grouped_toeplitz(params[1], 8),                     # (3, 256, 512)
        _pool_grouped_toeplitz(params[2], 4),                     # (3, 256, 512)
        _pool_grouped_toeplitz(params[3], 2),                     # (3, 256, 512)
    ]
    w5_row = params[4][:, :, 1, 1].astype(jnp.float32)            # (1, 256) center tap
    out = _discriminator_pallas(x2d.astype(jnp.float32), wts, w5_row)
    return out.reshape(n, OUT_CHANNELS, 1, 1)


# Pure-JAX f32 reference (for correctness check only).
def _reference_forward(x_nchw, label_nchw, params):
    out = jnp.concatenate([x_nchw, label_nchw], axis=1)
    for i, w in enumerate(params):
        out = lax.conv_general_dilated(
            out, w, window_strides=(1, 1), padding="SAME",
            dimension_numbers=("NCHW", "OIHW", "NCHW"),
            precision=lax.Precision.HIGHEST)
        if i < len(params) - 1:
            out = jnp.where(out >= 0, out, LEAK * out)
            out = lax.reduce_window(out, -jnp.inf, lax.max,
                                    (1, 1, 2, 2), (1, 1, 2, 2), "VALID")
        else:
            out = jax.nn.sigmoid(out)
    return out


if __name__ == "__main__":
    key = jax.random.PRNGKey(0)
    kx, kl, kp = jax.random.split(key, 3)
    N = 2
    x = jax.random.normal(kx, (N, IN_CHANNELS, H0, W0), jnp.float32)
    label = jax.random.normal(kl, (N, IN_CHANNELS, H0, W0), jnp.float32)
    params = init_params(kp)

    out = discriminator_forward(x, label, params)
    out = jax.block_until_ready(out)
    assert out.shape == (N, OUT_CHANNELS, 1, 1), out.shape

    ref = _reference_forward(x, label, params)
    assert jnp.allclose(out, ref, atol=2e-2, rtol=2e-2), (out, ref)
    print("KERNEL_OK")
</pallas_src>

<mosaic_0001>
module attributes {stable_mosaic.version = 11 : i64} {
  func.func @_discriminator_kernel(%arg0: i32, %arg1: memref<1x16x96xf32, #tpu.memory_space<vmem>>, %arg2: memref<3x96x512xf32, #tpu.memory_space<vmem>>, %arg3: memref<3x256x512xf32, #tpu.memory_space<vmem>>, %arg4: memref<3x256x512xf32, #tpu.memory_space<vmem>>, %arg5: memref<3x256x512xf32, #tpu.memory_space<vmem>>, %arg6: memref<1x256xf32, #tpu.memory_space<vmem>>, %arg7: memref<1x1x1xf32, #tpu.memory_space<vmem>>, %arg8: memref<18x96xf32, #tpu.memory_space<vmem>>, %arg9: memref<10x256xf32, #tpu.memory_space<vmem>>, %arg10: memref<6x256xf32, #tpu.memory_space<vmem>>, %arg11: memref<4x256xf32, #tpu.memory_space<vmem>>) attributes {dimension_semantics = [#tpu.dimension_semantics<arbitrary>], iteration_bounds = array<i64: 2>, scalar_prefetch = 0 : i64, scratch_operands = 4 : i64, tpu.core_type = #tpu.core_type<tc>, window_params = [{transform_indices = @transform_0, window_bounds = array<i64: 1, 16, 96>}, {pipeline_mode = #tpu.pipeline_mode<synchronous>, transform_indices = @transform_1, window_bounds = array<i64: 3, 96, 512>}, {pipeline_mode = #tpu.pipeline_mode<synchronous>, transform_indices = @transform_2, window_bounds = array<i64: 3, 256, 512>}, {pipeline_mode = #tpu.pipeline_mode<synchronous>, transform_indices = @transform_3, window_bounds = array<i64: 3, 256, 512>}, {pipeline_mode = #tpu.pipeline_mode<synchronous>, transform_indices = @transform_4, window_bounds = array<i64: 3, 256, 512>}, {pipeline_mode = #tpu.pipeline_mode<synchronous>, transform_indices = @transform_5, window_bounds = array<i64: 1, 256>}, {transform_indices = @transform_6, window_bounds = array<i64: 1, 1, 1>}]} {
    %cst = arith.constant 0.000000e+00 : f32
    %0 = vector.broadcast %cst : f32 to vector<18x96xf32>
    %c0 = arith.constant 0 : index
    %c0_0 = arith.constant 0 : index
    %1 = vector.load %arg8[%c0, %c0_0] : memref<18x96xf32, #tpu.memory_space<vmem>>, vector<18x96xf32>
    tpu.vector_store %arg8[%c0, %c0_0], %0 {strides = array<i32>} : memref<18x96xf32, #tpu.memory_space<vmem>>, vector<18x96xf32>,
    %cst_1 = arith.constant 0.000000e+00 : f32
    %2 = vector.broadcast %cst_1 : f32 to vector<10x256xf32>
    %c0_2 = arith.constant 0 : index
    %c0_3 = arith.constant 0 : index
    %3 = vector.load %arg9[%c0_2, %c0_3] : memref<10x256xf32, #tpu.memory_space<vmem>>, vector<10x256xf32>
    tpu.vector_store %arg9[%c0_2, %c0_3], %2 {strides = array<i32>} : memref<10x256xf32, #tpu.memory_space<vmem>>, vector<10x256xf32>,
    %cst_4 = arith.constant 0.000000e+00 : f32
    %4 = vector.broadcast %cst_4 : f32 to vector<6x256xf32>
    %c0_5 = arith.constant 0 : index
    %c0_6 = arith.constant 0 : index
    %5 = vector.load %arg10[%c0_5, %c0_6] : memref<6x256xf32, #tpu.memory_space<vmem>>, vector<6x256xf32>
    tpu.vector_store %arg10[%c0_5, %c0_6], %4 {strides = array<i32>} : memref<6x256xf32, #tpu.memory_space<vmem>>, vector<6x256xf32>,
    %cst_7 = arith.constant 0.000000e+00 : f32
    %6 = vector.broadcast %cst_7 : f32 to vector<4x256xf32>
    %c0_8 = arith.constant 0 : index
    %c0_9 = arith.constant 0 : index
    %7 = vector.load %arg11[%c0_8, %c0_9] : memref<4x256xf32, #tpu.memory_space<vmem>>, vector<4x256xf32>
    tpu.vector_store %arg11[%c0_8, %c0_9], %6 {strides = array<i32>} : memref<4x256xf32, #tpu.memory_space<vmem>>, vector<4x256xf32>,
    %c0_10 = arith.constant 0 : index
    %c0_11 = arith.constant 0 : index
    %c0_12 = arith.constant 0 : index
    %8 = vector.load %arg1[%c0_10, %c0_11, %c0_12] : memref<1x16x96xf32, #tpu.memory_space<vmem>>, vector<1x16x96xf32>
    %9 = vector.shape_cast %8 : vector<1x16x96xf32> to vector<16x96xf32>
    %c1 = arith.constant 1 : index
    %c0_13 = arith.constant 0 : index
    %10 = vector.load %arg8[%c1, %c0_13] : memref<18x96xf32, #tpu.memory_space<vmem>>, vector<16x96xf32>
    tpu.vector_store %arg8[%c1, %c0_13], %9 {strides = array<i32>} : memref<18x96xf32, #tpu.memory_space<vmem>>, vector<16x96xf32>,
    %c0_14 = arith.constant 0 : index
    %c0_15 = arith.constant 0 : index
    %11 = vector.load %arg8[%c0_14, %c0_15] : memref<18x96xf32, #tpu.memory_space<vmem>>, vector<16x96xf32>
    %c0_16 = arith.constant 0 : index
    %c0_17 = arith.constant 0 : index
    %c0_18 = arith.constant 0 : index
    %12 = vector.load %arg2[%c0_16, %c0_17, %c0_18] : memref<3x96x512xf32, #tpu.memory_space<vmem>>, vector<1x96x512xf32>
    %13 = vector.shape_cast %12 : vector<1x96x512xf32> to vector<96x512xf32>
    %cst_19 = arith.constant dense<0.000000e+00> : vector<16x512xf32>
    %14 = tpu.matmul %11, %13, %cst_19 {dimension_numbers = #tpu.dot_dimension_numbers<[1], [0], [0], [1], [0, 0, 1, 1], [], []>} : vector<16x96xf32>, vector<96x512xf32>, vector<16x512xf32> -> vector<16x512xf32>
    %c1_20 = arith.constant 1 : index
    %c0_21 = arith.constant 0 : index
    %15 = vector.load %arg8[%c1_20, %c0_21] : memref<18x96xf32, #tpu.memory_space<vmem>>, vector<16x96xf32>
    %c1_22 = arith.constant 1 : index
    %c0_23 = arith.constant 0 : index
    %c0_24 = arith.constant 0 : index
    %16 = vector.load %arg2[%c1_22, %c0_23, %c0_24] : memref<3x96x512xf32, #tpu.memory_space<vmem>>, vector<1x96x512xf32>
    %17 = vector.shape_cast %16 : vector<1x96x512xf32> to vector<96x512xf32>
    %cst_25 = arith.constant dense<0.000000e+00> : vector<16x512xf32>
    %18 = tpu.matmul %15, %17, %cst_25 {dimension_numbers = #tpu.dot_dimension_numbers<[1], [0], [0], [1], [0, 0, 1, 1], [], []>} : vector<16x96xf32>, vector<96x512xf32>, vector<16x512xf32> -> vector<16x512xf32>
    %19 = arith.addf %14, %18 : vector<16x512xf32>
    %c2 = arith.constant 2 : index
    %c0_26 = arith.constant 0 : index
    %20 = vector.load %arg8[%c2, %c0_26] : memref<18x96xf32, #tpu.memory_space<vmem>>, vector<16x96xf32>
    %c2_27 = arith.constant 2 : index
    %c0_28 = arith.constant 0 : index
    %c0_29 = arith.constant 0 : index
    %21 = vector.load %arg2[%c2_27, %c0_28, %c0_29] : memref<3x96x512xf32, #tpu.memory_space<vmem>>, vector<1x96x512xf32>
    %22 = vector.shape_cast %21 : vector<1x96x512xf32> to vector<96x512xf32>
    %cst_30 = arith.constant dense<0.000000e+00> : vector<16x512xf32>
    %23 = tpu.matmul %20, %22, %cst_30 {dimension_numbers = #tpu.dot_dimension_numbers<[1], [0], [0], [1], [0, 0, 1, 1], [], []>} : vector<16x96xf32>, vector<96x512xf32>, vector<16x512xf32> -> vector<16x512xf32>
    %24 = arith.addf %19, %23 : vector<16x512xf32>
    %cst_31 = arith.constant 0.000000e+00 : f32
    %25 = vector.broadcast %cst_31 : f32 to vector<16x512xf32>
    %26 = arith.cmpf oge, %24, %25 : vector<16x512xf32>
    %cst_32 = arith.constant 2.000000e-01 : f32
    %27 = vector.broadcast %cst_32 : f32 to vector<16x512xf32>
    %28 = arith.mulf %27, %24 : vector<16x512xf32>
    %29 = arith.select %26, %24, %28 : vector<16x512xi1>, vector<16x512xf32>
    %30 = vector.extract_strided_slice %29 {offsets = [0, 0], sizes = [16, 256], strides = [1, 1]} : vector<16x512xf32> to vector<16x256xf32>
    %31 = vector.extract_strided_slice %29 {offsets = [0, 256], sizes = [16, 256], strides = [1, 1]} : vector<16x512xf32> to vector<16x256xf32>
    %32 = arith.maximumf %30, %31 : vector<16x256xf32>
    %33 = vector.extract_strided_slice %32 {offsets = [0, 0], sizes = [1, 256], strides = [1, 1]} : vector<16x256xf32> to vector<1x256xf32>
    %34 = vector.extract_strided_slice %32 {offsets = [1, 0], sizes = [1, 256], strides = [1, 1]} : vector<16x256xf32> to vector<1x256xf32>
    %35 = arith.maximumf %33, %34 : vector<1x256xf32>
    %c1_33 = arith.constant 1 : index
    %c0_34 = arith.constant 0 : index
    %36 = vector.load %arg9[%c1_33, %c0_34] : memref<10x256xf32, #tpu.memory_space<vmem>>, vector<1x256xf32>
    tpu.vector_store %arg9[%c1_33, %c0_34], %35 {strides = array<i32>} : memref<10x256xf32, #tpu.memory_space<vmem>>, vector<1x256xf32>,
    %37 = vector.extract_strided_slice %32 {offsets = [2, 0], sizes = [1, 256], strides = [1, 1]} : vector<16x256xf32> to vector<1x256xf32>
    %38 = vector.extract_strided_slice %32 {offsets = [3, 0], sizes = [1, 256], strides = [1, 1]} : vector<16x256xf32> to vector<1x256xf32>
    %39 = arith.maximumf %37, %38 : vector<1x256xf32>
    %c2_35 = arith.constant 2 : index
    %c0_36 = arith.constant 0 : index
    %40 = vector.load %arg9[%c2_35, %c0_36] : memref<10x256xf32, #tpu.memory_space<vmem>>, vector<1x256xf32>
    tpu.vector_store %arg9[%c2_35, %c0_36], %39 {strides = array<i32>} : memref<10x256xf32, #tpu.memory_space<vmem>>, vector<1x256xf32>,
    %41 = vector.extract_strided_slice %32 {offsets = [4, 0], sizes = [1, 256], strides = [1, 1]} : vector<16x256xf32> to vector<1x256xf32>
    %42 = vector.extract_strided_slice %32 {offsets = [5, 0], sizes = [1, 256], strides = [1, 1]} : vector<16x256xf32> to vector<1x256xf32>
    %43 = arith.maximumf %41, %42 : vector<1x256xf32>
    %c3 = arith.constant 3 : index
    %c0_37 = arith.constant 0 : index
    %44 = vector.load %arg9[%c3, %c0_37] : memref<10x256xf32, #tpu.memory_space<vmem>>, vector<1x256xf32>
    tpu.vector_store %arg9[%c3, %c0_37], %43 {strides = array<i32>} : memref<10x256xf32, #tpu.memory_space<vmem>>, vector<1x256xf32>,
    %45 = vector.extract_strided_slice %32 {offsets = [6, 0], sizes = [1, 256], strides = [1, 1]} : vector<16x256xf32> to vector<1x256xf32>
    %46 = vector.extract_strided_slice %32 {offsets = [7, 0], sizes = [1, 256], strides = [1, 1]} : vector<16x256xf32> to vector<1x256xf32>
    %47 = arith.maximumf %45, %46 : vector<1x256xf32>
    %c4 = arith.constant 4 : index
    %c0_38 = arith.constant 0 : index
    %48 = vector.load %arg9[%c4, %c0_38] : memref<10x256xf32, #tpu.memory_space<vmem>>, vector<1x256xf32>
    tpu.vector_store %arg9[%c4, %c0_38], %47 {strides = array<i32>} : memref<10x256xf32, #tpu.memory_space<vmem>>, vector<1x256xf32>,
    %49 = vector.extract_strided_slice %32 {offsets = [8, 0], sizes = [1, 256], strides = [1, 1]} : vector<16x256xf32> to vector<1x256xf32>
    %50 = vector.extract_strided_slice %32 {offsets = [9, 0], sizes = [1, 256], strides = [1, 1]} : vector<16x256xf32> to vector<1x256xf32>
    %51 = arith.maximumf %49, %50 : vector<1x256xf32>
    %c5 = arith.constant 5 : index
    %c0_39 = arith.constant 0 : index
    %52 = vector.load %arg9[%c5, %c0_39] : memref<10x256xf32, #tpu.memory_space<vmem>>, vector<1x256xf32>
    tpu.vector_store %arg9[%c5, %c0_39], %51 {strides = array<i32>} : memref<10x256xf32, #tpu.memory_space<vmem>>, vector<1x256xf32>,
    %53 = vector.extract_strided_slice %32 {offsets = [10, 0], sizes = [1, 256], strides = [1, 1]} : vector<16x256xf32> to vector<1x256xf32>
    %54 = vector.extract_strided_slice %32 {offsets = [11, 0], sizes = [1, 256], strides = [1, 1]} : vector<16x256xf32> to vector<1x256xf32>
    %55 = arith.maximumf %53, %54 : vector<1x256xf32>
    %c6 = arith.constant 6 : index
    %c0_40 = arith.constant 0 : index
    %56 = vector.load %arg9[%c6, %c0_40] : memref<10x256xf32, #tpu.memory_space<vmem>>, vector<1x256xf32>
    tpu.vector_store %arg9[%c6, %c0_40], %55 {strides = array<i32>} : memref<10x256xf32, #tpu.memory_space<vmem>>, vector<1x256xf32>,
    %57 = vector.extract_strided_slice %32 {offsets = [12, 0], sizes = [1, 256], strides = [1, 1]} : vector<16x256xf32> to vector<1x256xf32>
    %58 = vector.extract_strided_slice %32 {offsets = [13, 0], sizes = [1, 256], strides = [1, 1]} : vector<16x256xf32> to vector<1x256xf32>
    %59 = arith.maximumf %57, %58 : vector<1x256xf32>
    %c7 = arith.constant 7 : index
    %c0_41 = arith.constant 0 : index
    %60 = vector.load %arg9[%c7, %c0_41] : memref<10x256xf32, #tpu.memory_space<vmem>>, vector<1x256xf32>
    tpu.vector_store %arg9[%c7, %c0_41], %59 {strides = array<i32>} : memref<10x256xf32, #tpu.memory_space<vmem>>, vector<1x256xf32>,
    %61 = vector.extract_strided_slice %32 {offsets = [14, 0], sizes = [1, 256], strides = [1, 1]} : vector<16x256xf32> to vector<1x256xf32>
    %62 = vector.extract_strided_slice %32 {offsets = [15, 0], sizes = [1, 256], strides = [1, 1]} : vector<16x256xf32> to vector<1x256xf32>
    %63 = arith.maximumf %61, %62 : vector<1x256xf32>
    %c8 = arith.constant 8 : index
    %c0_42 = arith.constant 0 : index
    %64 = vector.load %arg9[%c8, %c0_42] : memref<10x256xf32, #tpu.memory_space<vmem>>, vector<1x256xf32>
    tpu.vector_store %arg9[%c8, %c0_42], %63 {strides = array<i32>} : memref<10x256xf32, #tpu.memory_space<vmem>>, vector<1x256xf32>,
    %c0_43 = arith.constant 0 : index
    %c0_44 = arith.constant 0 : index
    %65 = vector.load %arg9[%c0_43, %c0_44] : memref<10x256xf32, #tpu.memory_space<vmem>>, vector<8x256xf32>
    %c0_45 = arith.constant 0 : index
    %c0_46 = arith.constant 0 : index
    %c0_47 = arith.constant 0 : index
    %66 = vector.load %arg3[%c0_45, %c0_46, %c0_47] : memref<3x256x512xf32, #tpu.memory_space<vmem>>, vector<1x256x512xf32>
    %67 = vector.shape_cast %66 : vector<1x256x512xf32> to vector<256x512xf32>
    %cst_48 = arith.constant dense<0.000000e+00> : vector<8x512xf32>
    %68 = tpu.matmul %65, %67, %cst_48 {dimension_numbers = #tpu.dot_dimension_numbers<[1], [0], [0], [1], [0, 0, 1, 1], [], []>} : vector<8x256xf32>, vector<256x512xf32>, vector<8x512xf32> -> vector<8x512xf32>
    %c1_49 = arith.constant 1 : index
    %c0_50 = arith.constant 0 : index
    %69 = vector.load %arg9[%c1_49, %c0_50] : memref<10x256xf32, #tpu.memory_space<vmem>>, vector<8x256xf32>
    %c1_51 = arith.constant 1 : index
    %c0_52 = arith.constant 0 : index
    %c0_53 = arith.constant 0 : index
    %70 = vector.load %arg3[%c1_51, %c0_52, %c0_53] : memref<3x256x512xf32, #tpu.memory_space<vmem>>, vector<1x256x512xf32>
    %71 = vector.shape_cast %70 : vector<1x256x512xf32> to vector<256x512xf32>
    %cst_54 = arith.constant dense<0.000000e+00> : vector<8x512xf32>
    %72 = tpu.matmul %69, %71, %cst_54 {dimension_numbers = #tpu.dot_dimension_numbers<[1], [0], [0], [1], [0, 0, 1, 1], [], []>} : vector<8x256xf32>, vector<256x512xf32>, vector<8x512xf32> -> vector<8x512xf32>
    %73 = arith.addf %68, %72 : vector<8x512xf32>
    %c2_55 = arith.constant 2 : index
    %c0_56 = arith.constant 0 : index
    %74 = vector.load %arg9[%c2_55, %c0_56] : memref<10x256xf32, #tpu.memory_space<vmem>>, vector<8x256xf32>
    %c2_57 = arith.constant 2 : index
    %c0_58 = arith.constant 0 : index
    %c0_59 = arith.constant 0 : index
    %75 = vector.load %arg3[%c2_57, %c0_58, %c0_59] : memref<3x256x512xf32, #tpu.memory_space<vmem>>, vector<1x256x512xf32>
    %76 = vector.shape_cast %75 : vector<1x256x512xf32> to vector<256x512xf32>
    %cst_60 = arith.constant dense<0.000000e+00> : vector<8x512xf32>
    %77 = tpu.matmul %74, %76, %cst_60 {dimension_numbers = #tpu.dot_dimension_numbers<[1], [0], [0], [1], [0, 0, 1, 1], [], []>} : vector<8x256xf32>, vector<256x512xf32>, vector<8x512xf32> -> vector<8x512xf32>
    %78 = arith.addf %73, %77 : vector<8x512xf32>
    %cst_61 = arith.constant 0.000000e+00 : f32
    %79 = vector.broadcast %cst_61 : f32 to vector<8x512xf32>
    %80 = arith.cmpf oge, %78, %79 : vector<8x512xf32>
    %cst_62 = arith.constant 2.000000e-01 : f32
    %81 = vector.broadcast %cst_62 : f32 to vector<8x512xf32>
    %82 = arith.mulf %81, %78 : vector<8x512xf32>
    %83 = arith.select %80, %78, %82 : vector<8x512xi1>, vector<8x512xf32>
    %84 = vector.extract_strided_slice %83 {offsets = [0, 0], sizes = [8, 256], strides = [1, 1]} : vector<8x512xf32> to vector<8x256xf32>
    %85 = vector.extract_strided_slice %83 {offsets = [0, 256], sizes = [8, 256], strides = [1, 1]} : vector<8x512xf32> to vector<8x256xf32>
    %86 = arith.maximumf %84, %85 : vector<8x256xf32>
    %87 = vector.extract_strided_slice %86 {offsets = [0, 0], sizes = [1, 256], strides = [1, 1]} : vector<8x256xf32> to vector<1x256xf32>
    %88 = vector.extract_strided_slice %86 {offsets = [1, 0], sizes = [1, 256], strides = [1, 1]} : vector<8x256xf32> to vector<1x256xf32>
    %89 = arith.maximumf %87, %88 : vector<1x256xf32>
    %c1_63 = arith.constant 1 : index
    %c0_64 = arith.constant 0 : index
    %90 = vector.load %arg10[%c1_63, %c0_64] : memref<6x256xf32, #tpu.memory_space<vmem>>, vector<1x256xf32>
    tpu.vector_store %arg10[%c1_63, %c0_64], %89 {strides = array<i32>} : memref<6x256xf32, #tpu.memory_space<vmem>>, vector<1x256xf32>,
    %91 = vector.extract_strided_slice %86 {offsets = [2, 0], sizes = [1, 256], strides = [1, 1]} : vector<8x256xf32> to vector<1x256xf32>
    %92 = vector.extract_strided_slice %86 {offsets = [3, 0], sizes = [1, 256], strides = [1, 1]} : vector<8x256xf32> to vector<1x256xf32>
    %93 = arith.maximumf %91, %92 : vector<1x256xf32>
    %c2_65 = arith.constant 2 : index
    %c0_66 = arith.constant 0 : index
    %94 = vector.load %arg10[%c2_65, %c0_66] : memref<6x256xf32, #tpu.memory_space<vmem>>, vector<1x256xf32>
    tpu.vector_store %arg10[%c2_65, %c0_66], %93 {strides = array<i32>} : memref<6x256xf32, #tpu.memory_space<vmem>>, vector<1x256xf32>,
    %95 = vector.extract_strided_slice %86 {offsets = [4, 0], sizes = [1, 256], strides = [1, 1]} : vector<8x256xf32> to vector<1x256xf32>
    %96 = vector.extract_strided_slice %86 {offsets = [5, 0], sizes = [1, 256], strides = [1, 1]} : vector<8x256xf32> to vector<1x256xf32>
    %97 = arith.maximumf %95, %96 : vector<1x256xf32>
    %c3_67 = arith.constant 3 : index
    %c0_68 = arith.constant 0 : index
    %98 = vector.load %arg10[%c3_67, %c0_68] : memref<6x256xf32, #tpu.memory_space<vmem>>, vector<1x256xf32>
    tpu.vector_store %arg10[%c3_67, %c0_68], %97 {strides = array<i32>} : memref<6x256xf32, #tpu.memory_space<vmem>>, vector<1x256xf32>,
    %99 = vector.extract_strided_slice %86 {offsets = [6, 0], sizes = [1, 256], strides = [1, 1]} : vector<8x256xf32> to vector<1x256xf32>
    %100 = vector.extract_strided_slice %86 {offsets = [7, 0], sizes = [1, 256], strides = [1, 1]} : vector<8x256xf32> to vector<1x256xf32>
    %101 = arith.maximumf %99, %100 : vector<1x256xf32>
    %c4_69 = arith.constant 4 : index
    %c0_70 = arith.constant 0 : index
    %102 = vector.load %arg10[%c4_69, %c0_70] : memref<6x256xf32, #tpu.memory_space<vmem>>, vector<1x256xf32>
    tpu.vector_store %arg10[%c4_69, %c0_70], %101 {strides = array<i32>} : memref<6x256xf32, #tpu.memory_space<vmem>>, vector<1x256xf32>,
    %c0_71 = arith.constant 0 : index
    %c0_72 = arith.constant 0 : index
    %103 = vector.load %arg10[%c0_71, %c0_72] : memref<6x256xf32, #tpu.memory_space<vmem>>, vector<4x256xf32>
    %c0_73 = arith.constant 0 : index
    %c0_74 = arith.constant 0 : index
    %c0_75 = arith.constant 0 : index
    %104 = vector.load %arg4[%c0_73, %c0_74, %c0_75] : memref<3x256x512xf32, #tpu.memory_space<vmem>>, vector<1x256x512xf32>
    %105 = vector.shape_cast %104 : vector<1x256x512xf32> to vector<256x512xf32>
    %cst_76 = arith.constant dense<0.000000e+00> : vector<4x512xf32>
    %106 = tpu.matmul %103, %105, %cst_76 {dimension_numbers = #tpu.dot_dimension_numbers<[1], [0], [0], [1], [0, 0, 1, 1], [], []>} : vector<4x256xf32>, vector<256x512xf32>, vector<4x512xf32> -> vector<4x512xf32>
    %c1_77 = arith.constant 1 : index
    %c0_78 = arith.constant 0 : index
    %107 = vector.load %arg10[%c1_77, %c0_78] : memref<6x256xf32, #tpu.memory_space<vmem>>, vector<4x256xf32>
    %c1_79 = arith.constant 1 : index
    %c0_80 = arith.constant 0 : index
    %c0_81 = arith.constant 0 : index
    %108 = vector.load %arg4[%c1_79, %c0_80, %c0_81] : memref<3x256x512xf32, #tpu.memory_space<vmem>>, vector<1x256x512xf32>
    %109 = vector.shape_cast %108 : vector<1x256x512xf32> to vector<256x512xf32>
    %cst_82 = arith.constant dense<0.000000e+00> : vector<4x512xf32>
    %110 = tpu.matmul %107, %109, %cst_82 {dimension_numbers = #tpu.dot_dimension_numbers<[1], [0], [0], [1], [0, 0, 1, 1], [], []>} : vector<4x256xf32>, vector<256x512xf32>, vector<4x512xf32> -> vector<4x512xf32>
    %111 = arith.addf %106, %110 : vector<4x512xf32>
    %c2_83 = arith.constant 2 : index
    %c0_84 = arith.constant 0 : index
    %112 = vector.load %arg10[%c2_83, %c0_84] : memref<6x256xf32, #tpu.memory_space<vmem>>, vector<4x256xf32>
    %c2_85 = arith.constant 2 : index
    %c0_86 = arith.constant 0 : index
    %c0_87 = arith.constant 0 : index
    %113 = vector.load %arg4[%c2_85, %c0_86, %c0_87] : memref<3x256x512xf32, #tpu.memory_space<vmem>>, vector<1x256x512xf32>
    %114 = vector.shape_cast %113 : vector<1x256x512xf32> to vector<256x512xf32>
    %cst_88 = arith.constant dense<0.000000e+00> : vector<4x512xf32>
    %115 = tpu.matmul %112, %114, %cst_88 {dimension_numbers = #tpu.dot_dimension_numbers<[1], [0], [0], [1], [0, 0, 1, 1], [], []>} : vector<4x256xf32>, vector<256x512xf32>, vector<4x512xf32> -> vector<4x512xf32>
    %116 = arith.addf %111, %115 : vector<4x512xf32>
    %cst_89 = arith.constant 0.000000e+00 : f32
    %117 = vector.broadcast %cst_89 : f32 to vector<4x512xf32>
    %118 = arith.cmpf oge, %116, %117 : vector<4x512xf32>
    %cst_90 = arith.constant 2.000000e-01 : f32
    %119 = vector.broadcast %cst_90 : f32 to vector<4x512xf32>
    %120 = arith.mulf %119, %116 : vector<4x512xf32>
    %121 = arith.select %118, %116, %120 : vector<4x512xi1>, vector<4x512xf32>
    %122 = vector.extract_strided_slice %121 {offsets = [0, 0], sizes = [4, 256], strides = [1, 1]} : vector<4x512xf32> to vector<4x256xf32>
    %123 = vector.extract_strided_slice %121 {offsets = [0, 256], sizes = [4, 256], strides = [1, 1]} : vector<4x512xf32> to vector<4x256xf32>
    %124 = arith.maximumf %122, %123 : vector<4x256xf32>
    %125 = vector.extract_strided_slice %124 {offsets = [0, 0], sizes = [1, 256], strides = [1, 1]} : vector<4x256xf32> to vector<1x256xf32>
    %126 = vector.extract_strided_slice %124 {offsets = [1, 0], sizes = [1, 256], strides = [1, 1]} : vector<4x256xf32> to vector<1x256xf32>
    %127 = arith.maximumf %125, %126 : vector<1x256xf32>
    %c1_91 = arith.constant 1 : index
    %c0_92 = arith.constant 0 : index
    %128 = vector.load %arg11[%c1_91, %c0_92] : memref<4x256xf32, #tpu.memory_space<vmem>>, vector<1x256xf32>
    tpu.vector_store %arg11[%c1_91, %c0_92], %127 {strides = array<i32>} : memref<4x256xf32, #tpu.memory_space<vmem>>, vector<1x256xf32>,
    %129 = vector.extract_strided_slice %124 {offsets = [2, 0], sizes = [1, 256], strides = [1, 1]} : vector<4x256xf32> to vector<1x256xf32>
    %130 = vector.extract_strided_slice %124 {offsets = [3, 0], sizes = [1, 256], strides = [1, 1]} : vector<4x256xf32> to vector<1x256xf32>
    %131 = arith.maximumf %129, %130 : vector<1x256xf32>
    %c2_93 = arith.constant 2 : index
    %c0_94 = arith.constant 0 : index
    %132 = vector.load %arg11[%c2_93, %c0_94] : memref<4x256xf32, #tpu.memory_space<vmem>>, vector<1x256xf32>
    tpu.vector_store %arg11[%c2_93, %c0_94], %131 {strides = array<i32>} : memref<4x256xf32, #tpu.memory_space<vmem>>, vector<1x256xf32>,
    %c0_95 = arith.constant 0 : index
    %c0_96 = arith.constant 0 : index
    %133 = vector.load %arg11[%c0_95, %c0_96] : memref<4x256xf32, #tpu.memory_space<vmem>>, vector<2x256xf32>
    %c0_97 = arith.constant 0 : index
    %c0_98 = arith.constant 0 : index
    %c0_99 = arith.constant 0 : index
    %134 = vector.load %arg5[%c0_97, %c0_98, %c0_99] : memref<3x256x512xf32, #tpu.memory_space<vmem>>, vector<1x256x512xf32>
    %135 = vector.shape_cast %134 : vector<1x256x512xf32> to vector<256x512xf32>
    %cst_100 = arith.constant dense<0.000000e+00> : vector<2x512xf32>
    %136 = tpu.matmul %133, %135, %cst_100 {dimension_numbers = #tpu.dot_dimension_numbers<[1], [0], [0], [1], [0, 0, 1, 1], [], []>} : vector<2x256xf32>, vector<256x512xf32>, vector<2x512xf32> -> vector<2x512xf32>
    %c1_101 = arith.constant 1 : index
    %c0_102 = arith.constant 0 : index
    %137 = vector.load %arg11[%c1_101, %c0_102] : memref<4x256xf32, #tpu.memory_space<vmem>>, vector<2x256xf32>
    %c1_103 = arith.constant 1 : index
    %c0_104 = arith.constant 0 : index
    %c0_105 = arith.constant 0 : index
    %138 = vector.load %arg5[%c1_103, %c0_104, %c0_105] : memref<3x256x512xf32, #tpu.memory_space<vmem>>, vector<1x256x512xf32>
    %139 = vector.shape_cast %138 : vector<1x256x512xf32> to vector<256x512xf32>
    %cst_106 = arith.constant dense<0.000000e+00> : vector<2x512xf32>
    %140 = tpu.matmul %137, %139, %cst_106 {dimension_numbers = #tpu.dot_dimension_numbers<[1], [0], [0], [1], [0, 0, 1, 1], [], []>} : vector<2x256xf32>, vector<256x512xf32>, vector<2x512xf32> -> vector<2x512xf32>
    %141 = arith.addf %136, %140 : vector<2x512xf32>
    %c2_107 = arith.constant 2 : index
    %c0_108 = arith.constant 0 : index
    %142 = vector.load %arg11[%c2_107, %c0_108] : memref<4x256xf32, #tpu.memory_space<vmem>>, vector<2x256xf32>
    %c2_109 = arith.constant 2 : index
    %c0_110 = arith.constant 0 : index
    %c0_111 = arith.constant 0 : index
    %143 = vector.load %arg5[%c2_109, %c0_110, %c0_111] : memref<3x256x512xf32, #tpu.memory_space<vmem>>, vector<1x256x512xf32>
    %144 = vector.shape_cast %143 : vector<1x256x512xf32> to vector<256x512xf32>
    %cst_112 = arith.constant dense<0.000000e+00> : vector<2x512xf32>
    %145 = tpu.matmul %142, %144, %cst_112 {dimension_numbers = #tpu.dot_dimension_numbers<[1], [0], [0], [1], [0, 0, 1, 1], [], []>} : vector<2x256xf32>, vector<256x512xf32>, vector<2x512xf32> -> vector<2x512xf32>
    %146 = arith.addf %141, %145 : vector<2x512xf32>
    %cst_113 = arith.constant 0.000000e+00 : f32
    %147 = vector.broadcast %cst_113 : f32 to vector<2x512xf32>
    %148 = arith.cmpf oge, %146, %147 : vector<2x512xf32>
    %cst_114 = arith.constant 2.000000e-01 : f32
    %149 = vector.broadcast %cst_114 : f32 to vector<2x512xf32>
    %150 = arith.mulf %149, %146 : vector<2x512xf32>
    %151 = arith.select %148, %146, %150 : vector<2x512xi1>, vector<2x512xf32>
    %152 = vector.extract_strided_slice %151 {offsets = [0, 0], sizes = [2, 256], strides = [1, 1]} : vector<2x512xf32> to vector<2x256xf32>
    %153 = vector.extract_strided_slice %151 {offsets = [0, 256], sizes = [2, 256], strides = [1, 1]} : vector<2x512xf32> to vector<2x256xf32>
    %154 = arith.maximumf %152, %153 : vector<2x256xf32>
    %155 = vector.extract_strided_slice %154 {offsets = [0, 0], sizes = [1, 256], strides = [1, 1]} : vector<2x256xf32> to vector<1x256xf32>
    %156 = vector.extract_strided_slice %154 {offsets = [1, 0], sizes = [1, 256], strides = [1, 1]} : vector<2x256xf32> to vector<1x256xf32>
    %157 = arith.maximumf %155, %156 : vector<1x256xf32>
    %c0_115 = arith.constant 0 : index
    %c0_116 = arith.constant 0 : index
    %158 = vector.load %arg6[%c0_115, %c0_116] : memref<1x256xf32, #tpu.memory_space<vmem>>, vector<1x256xf32>
    %159 = arith.mulf %157, %158 : vector<1x256xf32>
    %cst_117 = arith.constant dense<0.000000e+00> : vector<1xf32>
    %160 = vector.multi_reduction <add>, %159, %cst_117 [1] : vector<1x256xf32> to vector<1xf32>
    %161 = vector.shape_cast %160 : vector<1xf32> to vector<1x1xf32>
    %cst_118 = arith.constant 0.000000e+00 : f32
    %162 = vector.broadcast %cst_118 : f32 to vector<1x1xf32>
    %163 = arith.subf %162, %161 : vector<1x1xf32>
    %164 = math.exp %163 : vector<1x1xf32>
    %cst_119 = arith.constant 1.000000e+00 : f32
    %165 = vector.broadcast %cst_119 : f32 to vector<1x1xf32>
    %166 = arith.addf %165, %164 : vector<1x1xf32>
    %cst_120 = arith.constant 1.000000e+00 : f32
    %167 = vector.broadcast %cst_120 : f32 to vector<1x1xf32>
    %168 = arith.divf %167, %166 : vector<1x1xf32>
    %c0_121 = arith.constant 0 : index
    %c0_122 = arith.constant 0 : index
    %c0_123 = arith.constant 0 : index
    %169 = vector.load %arg7[%c0_121, %c0_122, %c0_123] : memref<1x1x1xf32, #tpu.memory_space<vmem>>, vector<1x1x1xf32>
    %170 = vector.shape_cast %169 : vector<1x1x1xf32> to vector<1x1xf32>
    %171 = vector.shape_cast %168 : vector<1x1xf32> to vector<1x1x1xf32>
    tpu.vector_store %arg7[%c0_121, %c0_122, %c0_123], %171 {strides = array<i32>} : memref<1x1x1xf32, #tpu.memory_space<vmem>>, vector<1x1x1xf32>,
    return
  }
  func.func @transform_0(%arg0: i32) -> (i32, i32, i32) {
    %c0_i32 = arith.constant 0 : i32
    %c0_i32_0 = arith.constant 0 : i32
    %c0_i32_1 = arith.constant 0 : i32
    return %arg0, %c0_i32, %c0_i32_0 : i32, i32, i32
  }
  func.func @transform_1(%arg0: i32) -> (i32, i32, i32) {
    %c0_i32 = arith.constant 0 : i32
    %c0_i32_0 = arith.constant 0 : i32
    %c0_i32_1 = arith.constant 0 : i32
    %c0_i32_2 = arith.constant 0 : i32
    return %c0_i32, %c0_i32_0, %c0_i32_1 : i32, i32, i32
  }
  func.func @transform_2(%arg0: i32) -> (i32, i32, i32) {
    %c0_i32 = arith.constant 0 : i32
    %c0_i32_0 = arith.constant 0 : i32
    %c0_i32_1 = arith.constant 0 : i32
    %c0_i32_2 = arith.constant 0 : i32
    return %c0_i32, %c0_i32_0, %c0_i32_1 : i32, i32, i32
  }
  func.func @transform_3(%arg0: i32) -> (i32, i32, i32) {
    %c0_i32 = arith.constant 0 : i32
    %c0_i32_0 = arith.constant 0 : i32
    %c0_i32_1 = arith.constant 0 : i32
    %c0_i32_2 = arith.constant 0 : i32
    return %c0_i32, %c0_i32_0, %c0_i32_1 : i32, i32, i32
  }
  func.func @transform_4(%arg0: i32) -> (i32, i32, i32) {
    %c0_i32 = arith.constant 0 : i32
    %c0_i32_0 = arith.constant 0 : i32
    %c0_i32_1 = arith.constant 0 : i32
    %c0_i32_2 = arith.constant 0 : i32
    return %c0_i32, %c0_i32_0, %c0_i32_1 : i32, i32, i32
  }
  func.func @transform_5(%arg0: i32) -> (i32, i32) {
    %c0_i32 = arith.constant 0 : i32
    %c0_i32_0 = arith.constant 0 : i32
    %c0_i32_1 = arith.constant 0 : i32
    return %c0_i32, %c0_i32_0 : i32, i32
  }
  func.func @transform_6(%arg0: i32) -> (i32, i32, i32) {
    %c0_i32 = arith.constant 0 : i32
    %c0_i32_0 = arith.constant 0 : i32
    %c0_i32_1 = arith.constant 0 : i32
    return %arg0, %c0_i32, %c0_i32_0 : i32, i32, i32
  }
}

</mosaic_0001>

<bundles_post_ra>
// kernel: discriminator_forward.1
= control target key start
LH: loop header
LB: loop body
LE: loop exit
PB: predicated region body
PF: predicated region fallthrough
CT: control target
= control target key end

     0   :  { %s6071_s21 = smov 0   ;;  %s10103_s0 = inlined_call_operand.vmem [shape: f32[2,16,96], index: 0, kind: input, shape index: {}]   ;;  %s10104_s1 = inlined_call_operand.vmem [shape: f32[3,96,512], index: 1, kind: input, shape index: {}]   ;;  %s10105_s2 = inlined_call_operand.vmem [shape: f32[3,256,512], index: 2, kind: input, shape index: {}]   ;;  %s10106_s3 = inlined_call_operand.vmem [shape: f32[3,256,512], index: 3, kind: input, shape index: {}]   ;;  %s10107_s4 = inlined_call_operand.vmem [shape: f32[3,256,512], index: 4, kind: input, shape index: {}]   ;;  %s10108_s5 = inlined_call_operand.vmem [shape: f32[1,256], index: 5, kind: input, shape index: {}]   ;;  %s10109_s6 = inlined_call_operand.vmem [shape: f32[2,1,1], index: 6, kind: output, shape index: {}]  }
   0x1 LB: > { %s3787_s22 = sadd.s32 4294967295, %s6032_s21   ;;  %p3791_p0 = scmp.ge.s32.totalorder %s6032_s21, 1  ;;  %s6032_s21 = sphi %s6071_s21, %s16_s21  }
   0x2   : > { %p212_p1 = scmp.lt.s32.totalorder %s6032_s21, 3 }
   0x4   : > { %p213_p2 = pnand %p3791_p0, %p212_p1 }
   0x5   : > { %v3795_v0 = vld [vmem:[%s10104_s1 + $0x188] sm:$0xff] (!%p213_p2)  ;;  %v3797_v2 = vld [vmem:[%s10104_s1 + $0x198] sm:$0xff] (!%p213_p2)  ;;  %vm248_vm0 = vcmask (!%p213_p2), 785408   ;;  %v3794_v5 = vld [vmem:[%s10104_s1 + $0x180] sm:$0xff] (!%p213_p2)  ;;  %v6034_v7 = vmov (!%p213_p2), 0.0   ;;  %vm251_vm1 = vcmask (!%p213_p2), 779264  }
   0x6   : > { %216 = sbr.rel (%p213_p2) target bundleno = 1602 (0x642), region = 44  ;;  %v3799_v1 = vld [vmem:[%s10104_s1 + $0x1a8] sm:$0xff] (!%p213_p2)  ;;  %v3801_v4 = vld [vmem:[%s10104_s1 + $0x1b8] sm:$0xff] (!%p213_p2)  ;;  %v3798_v6 = vld [vmem:[%s10104_s1 + $0x1a0] sm:$0xff] (!%p213_p2)  ;;  %435 = vmatprep.mubr.f32.mxu0 (!%p213_p2), %v6034_v7  ;;  %253 = vst [vmem:[#allocation3] sm:$0xff] (!%p213_p2), %v6034_v7  ;;  %512 = vmatprep.mubr.f32.mxu1 (!%p213_p2), %v6034_v7  ;;  %p6131_p3 = scmp.lt.s32.totalorder (!%p213_p2), %s3787_s22, 1 }
   0x7   : > { %v4673_v3 = vpack.c.bf16 (!%p213_p2), %v3799_v1, %v3795_v0  ;;  %254 = vst [vmem:[#allocation3 + $0x8] sm:$0xff] (!%p213_p2), %v6034_v7  ;;  %255 = vst [vmem:[#allocation3 + $0x10] sm:$0x3] (!%p213_p2), %v6034_v7  ;;  %v4697_v8 = vpack.c.bf16 (!%p213_p2), %v3801_v4, %v3797_v2  ;;  %v4675_v9 = vpack.c.bf16 (!%p213_p2), %v3798_v6, %v3794_v5  ;;  %v3796_v10 = vld [vmem:[%s10104_s1 + $0x190] sm:$0xff] (!%p213_p2)  ;;  %v3803_v12 = vld [vmem:[%s10104_s1 + $0x1c8] sm:$0xff] (!%p213_p2)  ;;  %vm1319_vm11 = vcmask (!%p213_p2), 1046528  }
   0x8   : > { %256 = vst [vmem:[#allocation3 + $0x18] sm:$0x3] (!%p213_p2), %v6034_v7  ;;  %257 = vst [vmem:[#allocation4] sm:$0x3f] (!%p213_p2), %v6034_v7  ;;  %v3800_v11 = vld [vmem:[%s10104_s1 + $0x1b0] sm:$0xff] (!%p213_p2)  ;;  %v3807_v14 = vld [vmem:[%s10104_s1 + $0x1e8] sm:$0xff] (!%p213_p2) }
   0x9   : > { %258 = vst [vmem:[#allocation4 + $0x8] sm:$0x3f] (!%p213_p2), %v6034_v7  ;;  %259 = vst [vmem:[#allocation5] sm:$0xff] (!%p213_p2), %v6034_v7  ;;  %4674 = vmatprep.subr.bf16.mxu0 (!%p213_p2), %v4673_v3  ;;  %v4699_v13 = vpack.c.bf16 (!%p213_p2), %v3800_v11, %v3796_v10  ;;  %v3805_v15 = vld [vmem:[%s10104_s1 + $0x1d8] sm:$0xff] (!%p213_p2)  ;;  %4698 = vmatprep.subr.bf16.mxu1 (!%p213_p2), %v4697_v8  ;;  %v4677_v17 = vpack.c.bf16 (!%p213_p2), %v3807_v14, %v3803_v12  ;;  %v3802_v19 = vld [vmem:[%s10104_s1 + $0x1c0] sm:$0xff] (!%p213_p2)  ;;  %vm1749_vm12 = vcmask (!%p213_p2), 1045504  }
   0xa   : > { %249 = vst.msk [vmem:[#allocation2] sm:$0xff] (!%p213_p2), %vm248_vm0, %v6034_v7  ;;  %250 = vst.msk [vmem:[#allocation2 + $0x8] sm:$0xff] (!%p213_p2), %vm248_vm0, %v6034_v7  ;;  %v3809_v16 = vld [vmem:[%s10104_s1 + $0x1f8] sm:$0xff] (!%p213_p2)  ;;  %4676 = vmatpush1.bf16.msra.mxu0 (!%p213_p2), %v4675_v9  ;;  %v3806_v20 = vld [vmem:[%s10104_s1 + $0x1e0] sm:$0xff] (!%p213_p2) }
   0xb   : > { %252 = vst.msk [vmem:[#allocation2 + $0x10] sm:$0x3] (!%p213_p2), %vm251_vm1, %v6034_v7  ;;  %v4701_v18 = vpack.c.bf16 (!%p213_p2), %v3809_v16, %v3805_v15  ;;  %v3804_v21 = vld [vmem:[%s10104_s1 + $0x1d0] sm:$0xff] (!%p213_p2)  ;;  %4700 = vmatpush1.bf16.msra.mxu1 (!%p213_p2), %v4699_v13  ;;  %v4679_v22 = vpack.c.bf16 (!%p213_p2), %v3806_v20, %v3802_v19  ;;  %v3811_v24 = vld [vmem:[%s10104_s1 + $0x208] sm:$0xff] (!%p213_p2)  ;;  %4678 = vmatprep.subr.bf16.mxu0 (!%p213_p2), %v4677_v17  ;;  %v3813_v28 = vld [vmem:[%s10104_s1 + $0x218] sm:$0xff] (!%p213_p2) }
   0xc   : > { %v3808_v23 = vld [vmem:[%s10104_s1 + $0x1f0] sm:$0xff] (!%p213_p2)  ;;  %v3815_v25 = vld [vmem:[%s10104_s1 + $0x228] sm:$0xff] (!%p213_p2)  ;;  %v3817_v29 = vld [vmem:[%s10104_s1 + $0x238] sm:$0xff] (!%p213_p2) }
   0xd   : > { %4702 = vmatprep.subr.bf16.mxu1 %v4701_v18  ;;  %v4703_v26 = vpack.c.bf16 %v3808_v23, %v3804_v21  ;;  %v4681_v27 = vpack.c.bf16 %v3815_v25, %v3811_v24  ;;  %v3810_v30 = vld [vmem:[%s10104_s1 + $0x200] sm:$0xff]  ;;  %v4705_v31 = vpack.c.bf16 %v3817_v29, %v3813_v28  ;;  %v3812_v33 = vld [vmem:[%s10104_s1 + $0x210] sm:$0xff]  ;;  %s10114_s22 = smov (!%p6131_p3, %s3787_s22), 1  ;;  %v3819_v36 = vld [vmem:[%s10104_s1 + $0x248] sm:$0xff] }
   0xe   : > { %v3814_v32 = vld [vmem:[%s10104_s1 + $0x220] sm:$0xff]  ;;  %v3816_v34 = vld [vmem:[%s10104_s1 + $0x230] sm:$0xff]  ;;  %4680 = vmatpush1.bf16.msra.mxu0 %v4679_v22  ;;  %v3823_v37 = vld [vmem:[%s10104_s1 + $0x268] sm:$0xff]  ;;  %s4672_s7 = sshll.u32 %s10114_s22, 4  ;;  %s247_s8 = scalar_lea.vmem %s10109_s6, %s10114_s22 }
   0xf   : > { %v4683_v35 = vpack.c.bf16 %v3814_v32, %v3810_v30  ;;  %v3821_v38 = vld [vmem:[%s10104_s1 + $0x258] sm:$0xff]  ;;  %4704 = vmatpush1.bf16.msra.mxu1 %v4703_v26  ;;  %4682 = vmatprep.subr.bf16.mxu0 %v4681_v27  ;;  %v4707_v39 = vpack.c.bf16 %v3816_v34, %v3812_v33  ;;  %v4685_v40 = vpack.c.bf16 %v3823_v37, %v3819_v36  ;;  %v3818_v42 = vld [vmem:[%s10104_s1 + $0x240] sm:$0xff]  ;;  %v3820_v45 = vld [vmem:[%s10104_s1 + $0x250] sm:$0xff]  ;;  %s6235_s23 = scalar_lea.vmem %s10103_s0, %s4672_s7 }
  0x10   : > { %v3825_v41 = vld [vmem:[%s10104_s1 + $0x278] sm:$0xff]  ;;  %v3822_v43 = vld [vmem:[%s10104_s1 + $0x260] sm:$0xff]  ;;  %4706 = vmatprep.subr.bf16.mxu1 %v4705_v31  ;;  %v3824_v46 = vld [vmem:[%s10104_s1 + $0x270] sm:$0xff] }
  0x11   : > { %v4709_v44 = vpack.c.bf16 %v3825_v41, %v3821_v38  ;;  %v3827_v47 = vld [vmem:[%s10104_s1 + $0x288] sm:$0xff]  ;;  %v3829_v49 = vld [vmem:[%s10104_s1 + $0x298] sm:$0xff]  ;;  %v4687_v51 = vpack.c.bf16 %v3822_v43, %v3818_v42  ;;  %v4711_v52 = vpack.c.bf16 %v3824_v46, %v3820_v45  ;;  %v3826_v54 = vld [vmem:[%s10104_s1 + $0x280] sm:$0xff] }
  0x12   : > { %v3831_v48 = vld [vmem:[%s10104_s1 + $0x2a8] sm:$0xff]  ;;  %v3833_v50 = vld [vmem:[%s10104_s1 + $0x2b8] sm:$0xff]  ;;  %4684 = vmatpush1.bf16.msra.mxu0 %v4683_v35  ;;  %v3830_v55 = vld [vmem:[%s10104_s1 + $0x2a0] sm:$0xff] }
  0x13   : > { %4708 = vmatpush1.bf16.msra.mxu1 %v4707_v39  ;;  %4686 = vmatprep.subr.bf16.mxu0 %v4685_v40  ;;  %v4689_v53 = vpack.c.bf16 %v3831_v48, %v3827_v47  ;;  %v3828_v56 = vld [vmem:[%s10104_s1 + $0x290] sm:$0xff]  ;;  %v4713_v57 = vpack.c.bf16 %v3833_v50, %v3829_v49  ;;  %v3835_v59 = vld [vmem:[%s10104_s1 + $0x2c8] sm:$0xff]  ;;  %v3837_v61 = vld [vmem:[%s10104_s1 + $0x2d8] sm:$0xff]  ;;  %v4691_v63 = vpack.c.bf16 %v3830_v55, %v3826_v54 }
  0x14   : > { %4710 = vmatprep.subr.bf16.mxu1 %v4709_v44  ;;  %v3832_v58 = vld [vmem:[%s10104_s1 + $0x2b0] sm:$0xff]  ;;  %v3839_v60 = vld [vmem:[%s10104_s1 + $0x2e8] sm:$0xff]  ;;  %v3841_v62 = vld [vmem:[%s10104_s1 + $0x2f8] sm:$0xff] }
  0x15   : > { %v3834_v0 = vld [vmem:[%s10104_s1 + $0x2c0] sm:$0xff]  ;;  %v4715_v1 = vpack.c.bf16 %v3832_v58, %v3828_v56  ;;  %v4693_v2 = vpack.c.bf16 %v3839_v60, %v3835_v59  ;;  %v3836_v4 = vld [vmem:[%s10104_s1 + $0x2d0] sm:$0xff]  ;;  %v4717_v6 = vpack.c.bf16 %v3841_v62, %v3837_v61  ;;  %v267_v9 = vld [vmem:[%s10104_s1 + $0x8] sm:$0xff] }
  0x16   : > { %4688 = vmatpush1.bf16.msra.mxu0 %v4687_v51  ;;  %v3838_v3 = vld [vmem:[%s10104_s1 + $0x2e0] sm:$0xff]  ;;  %v3840_v8 = vld [vmem:[%s10104_s1 + $0x2f0] sm:$0xff]  ;;  %v271_v10 = vld [vmem:[%s10104_s1 + $0x28] sm:$0xff] }
  0x17   : > { %4712 = vmatpush1.bf16.msra.mxu1 %v4711_v52  ;;  %4690 = vmatprep.subr.bf16.mxu0 %v4689_v53  ;;  %v260_v5 = vld [vmem:[%s6235_s23] sm:$0xff]  ;;  %v269_v11 = vld [vmem:[%s10104_s1 + $0x18] sm:$0xff]  ;;  %v4695_v13 = vpack.c.bf16 %v3838_v3, %v3834_v0  ;;  %v4719_v14 = vpack.c.bf16 %v3840_v8, %v3836_v4  ;;  %v4721_v15 = vpack.c.bf16 %v271_v10, %v267_v9  ;;  %v268_v18 = vld [vmem:[%s10104_s1 + $0x10] sm:$0xff] }
  0x18   : > { %4714 = vmatprep.subr.bf16.mxu1 %v4713_v57  ;;  %262 = vst.msk [vmem:[#allocation2 + $0x1] sm:$0xff] %vm248_vm0, %v260_v5  ;;  %v273_v12 = vld [vmem:[%s10104_s1 + $0x38] sm:$0xff]  ;;  %v266_v16 = vld [vmem:[%s10104_s1] sm:$0xff]  ;;  %v272_v20 = vld [vmem:[%s10104_s1 + $0x30] sm:$0xff] }
  0x19   : > { %v270_v17 = vld [vmem:[%s10104_s1 + $0x20] sm:$0xff]  ;;  %v4745_v19 = vpack.c.bf16 %v273_v12, %v269_v11  ;;  %v275_v21 = vld [vmem:[%s10104_s1 + $0x48] sm:$0xff]  ;;  %v277_v23 = vld [vmem:[%s10104_s1 + $0x58] sm:$0xff]  ;;  %v4747_v28 = vpack.c.bf16 %v272_v20, %v268_v18 }
  0x1a   : > { %4692 = vmatpush1.bf16.msra.mxu0 %v4691_v63  ;;  %v279_v22 = vld [vmem:[%s10104_s1 + $0x68] sm:$0xff]  ;;  %v281_v24 = vld [vmem:[%s10104_s1 + $0x78] sm:$0xff]  ;;  %v4723_v25 = vpack.c.bf16 %v270_v17, %v266_v16  ;;  %v274_v26 = vld [vmem:[%s10104_s1 + $0x40] sm:$0xff] }
  0x1b   : > { %4716 = vmatpush1.bf16.msra.mxu1 %v4715_v1  ;;  %4694 = vmatprep.subr.bf16.mxu0 %v4693_v2  ;;  %v4725_v29 = vpack.c.bf16 %v279_v22, %v275_v21  ;;  %v278_v30 = vld [vmem:[%s10104_s1 + $0x60] sm:$0xff]  ;;  %v276_v31 = vld [vmem:[%s10104_s1 + $0x50] sm:$0xff]  ;;  %v4749_v32 = vpack.c.bf16 %v281_v24, %v277_v23  ;;  %v283_v34 = vld [vmem:[%s10104_s1 + $0x88] sm:$0xff] }
  0x1c   : > { %4718 = vmatprep.subr.bf16.mxu1 %v4717_v6  ;;  %v280_v33 = vld [vmem:[%s10104_s1 + $0x70] sm:$0xff]  ;;  %v287_v35 = vld [vmem:[%s10104_s1 + $0xa8] sm:$0xff]  ;;  %v285_v36 = vld [vmem:[%s10104_s1 + $0x98] sm:$0xff]  ;;  %v4727_v38 = vpack.c.bf16 %v278_v30, %v274_v26 }
  0x1d   : > { %v289_v37 = vld [vmem:[%s10104_s1 + $0xb8] sm:$0xff]  ;;  %v4751_v39 = vpack.c.bf16 %v280_v33, %v276_v31  ;;  %v4729_v40 = vpack.c.bf16 %v287_v35, %v283_v34  ;;  %v282_v41 = vld [vmem:[%s10104_s1 + $0x80] sm:$0xff]  ;;  %v284_v43 = vld [vmem:[%s10104_s1 + $0x90] sm:$0xff] }
  0x1e   : > { %4696 = vmatpush1.bf16.msra.mxu0 %v4695_v13  ;;  %v286_v42 = vld [vmem:[%s10104_s1 + $0xa0] sm:$0xff]  ;;  %v4753_v44 = vpack.c.bf16 %v289_v37, %v285_v36  ;;  %v288_v45 = vld [vmem:[%s10104_s1 + $0xb0] sm:$0xff]  ;;  %v291_v46 = vld [vmem:[%s10104_s1 + $0xc8] sm:$0xff] }
  0x1f   : > { %4720 = vmatpush1.bf16.msra.mxu1 %v4719_v14  ;;  %4722 = vmatprep.subr.bf16.mxu0 %v4721_v15  ;;  %v314_v27 = vld [vmem:[#allocation2 + $0x1] sm:$0xff]  ;;  %v293_v48 = vld [vmem:[%s10104_s1 + $0xd8] sm:$0xff]  ;;  %v4731_v51 = vpack.c.bf16 %v286_v42, %v282_v41  ;;  %v4755_v52 = vpack.c.bf16 %v288_v45, %v284_v43  ;;  %v292_v56 = vld [vmem:[%s10104_s1 + $0xd0] sm:$0xff] }
  0x20   : > { %4746 = vmatprep.subr.bf16.mxu1 %v4745_v19  ;;  %v295_v47 = vld [vmem:[%s10104_s1 + $0xe8] sm:$0xff]  ;;  %v297_v49 = vld [vmem:[%s10104_s1 + $0xf8] sm:$0xff]  ;;  %v290_v54 = vld [vmem:[%s10104_s1 + $0xc0] sm:$0xff] }
  0x21   : > { %3842 = vmatmul.mubr.msk.f32.vlgmr.msra.gmra.mrb[0].mxu0 %vm248_vm0, %v314_v27  ;;  %v261_v50 = vld [vmem:[%s6235_s23 + $0x8] sm:$0xff]  ;;  %v4733_v53 = vpack.c.bf16 %v295_v47, %v291_v46  ;;  %v294_v55 = vld [vmem:[%s10104_s1 + $0xe0] sm:$0xff]  ;;  %v4757_v57 = vpack.c.bf16 %v297_v49, %v293_v48  ;;  %v296_v58 = vld [vmem:[%s10104_s1 + $0xf0] sm:$0xff] }
  0x22   : > { %3844 = vmatmul.mubr.msk.f32.vlgmr.msra.gmra.mrb[0].mxu1 %vm248_vm0, %v314_v27  ;;  %4724 = vmatpush1.bf16.msra.mxu0 %v4723_v25  ;;  %263 = vst.msk [vmem:[#allocation2 + $0x9] sm:$0xff] %vm248_vm0, %v261_v50  ;;  %v299_v59 = vld [vmem:[%s10104_s1 + $0x108] sm:$0xff]  ;;  %v301_v61 = vld [vmem:[%s10104_s1 + $0x118] sm:$0xff]  ;;  %v4735_v63 = vpack.c.bf16 %v294_v55, %v290_v54  ;;  %v4759_v0 = vpack.c.bf16 %v296_v58, %v292_v56  ;;  %v298_v2 = vld [vmem:[%s10104_s1 + $0x100] sm:$0xff] }
  0x23   : > { %4748 = vmatpush1.bf16.msra.mxu1 %v4747_v28  ;;  %4726 = vmatprep.subr.bf16.mxu0 %v4725_v29  ;;  %v303_v60 = vld [vmem:[%s10104_s1 + $0x128] sm:$0xff]  ;;  %v305_v62 = vld [vmem:[%s10104_s1 + $0x138] sm:$0xff]  ;;  %v302_v3 = vld [vmem:[%s10104_s1 + $0x120] sm:$0xff] }
  0x24   : > { %4750 = vmatprep.subr.bf16.mxu1 %v4749_v32  ;;  %441 = vmatprep.mubr.f32.mxu0 %v6034_v7  ;;  %v4737_v1 = vpack.c.bf16 %v303_v60, %v299_v59  ;;  %v300_v4 = vld [vmem:[%s10104_s1 + $0x110] sm:$0xff]  ;;  %v4761_v5 = vpack.c.bf16 %v305_v62, %v301_v61  ;;  %v307_v8 = vld [vmem:[%s10104_s1 + $0x148] sm:$0xff]  ;;  %v309_v10 = vld [vmem:[%s10104_s1 + $0x158] sm:$0xff]  ;;  %v4739_v13 = vpack.c.bf16 %v302_v3, %v298_v2 }
  0x25   : > { %518 = vmatprep.mubr.f32.mxu1 %v6034_v7  ;;  %v304_v6 = vld [vmem:[%s10104_s1 + $0x130] sm:$0xff]  ;;  %v311_v9 = vld [vmem:[%s10104_s1 + $0x168] sm:$0xff]  ;;  %v313_v11 = vld [vmem:[%s10104_s1 + $0x178] sm:$0xff] }
  0x26   : > { %4728 = vmatpush1.bf16.msra.mxu0 %v4727_v38  ;;  %v4763_v14 = vpack.c.bf16 %v304_v6, %v300_v4  ;;  %v4741_v15 = vpack.c.bf16 %v311_v9, %v307_v8  ;;  %v306_v16 = vld [vmem:[%s10104_s1 + $0x140] sm:$0xff]  ;;  %v308_v18 = vld [vmem:[%s10104_s1 + $0x150] sm:$0xff]  ;;  %v4765_v19 = vpack.c.bf16 %v313_v11, %v309_v10  ;;  %v3851_v21 = vld [vmem:[%s10104_s1 + $0x308] sm:$0xff] }
  0x27   : > { %4752 = vmatpush1.bf16.msra.mxu1 %v4751_v39  ;;  %4730 = vmatprep.subr.bf16.mxu0 %v4729_v40  ;;  %v310_v17 = vld [vmem:[%s10104_s1 + $0x160] sm:$0xff]  ;;  %v312_v20 = vld [vmem:[%s10104_s1 + $0x170] sm:$0xff]  ;;  %v3855_v22 = vld [vmem:[%s10104_s1 + $0x328] sm:$0xff] }
  0x28   : > { %4754 = vmatprep.subr.bf16.mxu1 %v4753_v44  ;;  %v3853_v23 = vld [vmem:[%s10104_s1 + $0x318] sm:$0xff]  ;;  %v4743_v25 = vpack.c.bf16 %v310_v17, %v306_v16  ;;  %v4767_v26 = vpack.c.bf16 %v312_v20, %v308_v18  ;;  %v4769_v27 = vpack.c.bf16 %v3855_v22, %v3851_v21  ;;  %v3850_v28 = vld [vmem:[%s10104_s1 + $0x300] sm:$0xff]  ;;  %v3852_v30 = vld [vmem:[%s10104_s1 + $0x310] sm:$0xff] }
  0x29   : > { %v315_v12 = vld [vmem:[#allocation2 + $0x9] sm:$0xff]  ;;  %v3857_v24 = vld [vmem:[%s10104_s1 + $0x338] sm:$0xff]  ;;  %v3854_v29 = vld [vmem:[%s10104_s1 + $0x320] sm:$0xff] }
  0x2a   : > { %4732 = vmatpush1.bf16.msra.mxu0 %v4731_v51  ;;  %3845 = vmatmul.mubr.msk.f32.gmra.mrb[2].mxu1 %vm248_vm0, %v315_v12  ;;  %v4793_v31 = vpack.c.bf16 %v3857_v24, %v3853_v23  ;;  %v3856_v32 = vld [vmem:[%s10104_s1 + $0x330] sm:$0xff]  ;;  %v3859_v33 = vld [vmem:[%s10104_s1 + $0x348] sm:$0xff]  ;;  %v3861_v35 = vld [vmem:[%s10104_s1 + $0x358] sm:$0xff]  ;;  %v4771_v38 = vpack.c.bf16 %v3854_v29, %v3850_v28 }
  0x2b   : > { %4756 = vmatpush1.bf16.msra.mxu1 %v4755_v52  ;;  %4734 = vmatprep.subr.bf16.mxu0 %v4733_v53  ;;  %v3863_v34 = vld [vmem:[%s10104_s1 + $0x368] sm:$0xff]  ;;  %v3865_v36 = vld [vmem:[%s10104_s1 + $0x378] sm:$0xff]  ;;  %v264_v37 = vld [vmem:[#allocation2] sm:$0xff]  ;;  %v4795_v39 = vpack.c.bf16 %v3856_v32, %v3852_v30 }
  0x2c   : > { %4758 = vmatprep.subr.bf16.mxu1 %v4757_v57  ;;  %3843 = vmatmul.mubr.msk.f32.gmra.mrb[2].mxu0 %vm248_vm0, %v315_v12  ;;  %v4773_v40 = vpack.c.bf16 %v3863_v34, %v3859_v33  ;;  %v3858_v41 = vld [vmem:[%s10104_s1 + $0x340] sm:$0xff]  ;;  %v3860_v43 = vld [vmem:[%s10104_s1 + $0x350] sm:$0xff]  ;;  %v4797_v44 = vpack.c.bf16 %v3865_v36, %v3861_v35  ;;  %v3867_v46 = vld [vmem:[%s10104_s1 + $0x388] sm:$0xff] }
  0x2d   : > { %595 = vmatprep.mubr.f32.mxu0 %v6034_v7  ;;  %672 = vmatprep.mubr.f32.mxu1 %v6034_v7  ;;  %v3862_v42 = vld [vmem:[%s10104_s1 + $0x360] sm:$0xff]  ;;  %v3864_v45 = vld [vmem:[%s10104_s1 + $0x370] sm:$0xff]  ;;  %v3871_v47 = vld [vmem:[%s10104_s1 + $0x3a8] sm:$0xff] }
  0x2e   : > { %4736 = vmatpush1.bf16.msra.mxu0 %v4735_v63  ;;  %v3869_v48 = vld [vmem:[%s10104_s1 + $0x398] sm:$0xff]  ;;  %v4775_v50 = vpack.c.bf16 %v3862_v42, %v3858_v41  ;;  %v265_v51 = vld [vmem:[#allocation2 + $0x8] sm:$0xff]  ;;  %v4799_v52 = vpack.c.bf16 %v3864_v45, %v3860_v43  ;;  %v4777_v53 = vpack.c.bf16 %v3871_v47, %v3867_v46  ;;  %v3866_v54 = vld [vmem:[%s10104_s1 + $0x380] sm:$0xff] }
  0x2f   : > { %4760 = vmatpush1.bf16.msra.mxu1 %v4759_v0  ;;  %4738 = vmatprep.subr.bf16.mxu0 %v4737_v1  ;;  %v3873_v49 = vld [vmem:[%s10104_s1 + $0x3b8] sm:$0xff]  ;;  %v3870_v55 = vld [vmem:[%s10104_s1 + $0x3a0] sm:$0xff]  ;;  %v3868_v56 = vld [vmem:[%s10104_s1 + $0x390] sm:$0xff] }
  0x30   : > { %4762 = vmatprep.subr.bf16.mxu1 %v4761_v5  ;;  %v4801_v57 = vpack.c.bf16 %v3873_v49, %v3869_v48  ;;  %v3872_v58 = vld [vmem:[%s10104_s1 + $0x3b0] sm:$0xff]  ;;  %v3875_v59 = vld [vmem:[%s10104_s1 + $0x3c8] sm:$0xff]  ;;  %v3877_v61 = vld [vmem:[%s10104_s1 + $0x3d8] sm:$0xff]  ;;  %v4779_v63 = vpack.c.bf16 %v3870_v55, %v3866_v54 }
  0x31   : > { %v3879_v60 = vld [vmem:[%s10104_s1 + $0x3e8] sm:$0xff]  ;;  %v3881_v62 = vld [vmem:[%s10104_s1 + $0x3f8] sm:$0xff]  ;;  %v4803_v0 = vpack.c.bf16 %v3872_v58, %v3868_v56  ;;  %v3874_v2 = vld [vmem:[%s10104_s1 + $0x3c0] sm:$0xff] }
  0x32   : > { %4740 = vmatpush1.bf16.msra.mxu0 %v4739_v13  ;;  %v4781_v1 = vpack.c.bf16 %v3879_v60, %v3875_v59  ;;  %v3878_v3 = vld [vmem:[%s10104_s1 + $0x3e0] sm:$0xff]  ;;  %v3876_v4 = vld [vmem:[%s10104_s1 + $0x3d0] sm:$0xff]  ;;  %v4805_v5 = vpack.c.bf16 %v3881_v62, %v3877_v61  ;;  %v3883_v8 = vld [vmem:[%s10104_s1 + $0x408] sm:$0xff] }
  0x33   : > { %4764 = vmatpush1.bf16.msra.mxu1 %v4763_v14  ;;  %4742 = vmatprep.subr.bf16.mxu0 %v4741_v15  ;;  %v3880_v6 = vld [vmem:[%s10104_s1 + $0x3f0] sm:$0xff]  ;;  %v3887_v9 = vld [vmem:[%s10104_s1 + $0x428] sm:$0xff]  ;;  %v3885_v10 = vld [vmem:[%s10104_s1 + $0x418] sm:$0xff]  ;;  %v4783_v12 = vpack.c.bf16 %v3878_v3, %v3874_v2 }
  0x34   : > { %4766 = vmatprep.subr.bf16.mxu1 %v4765_v19  ;;  %v3889_v11 = vld [vmem:[%s10104_s1 + $0x438] sm:$0xff]  ;;  %v4807_v13 = vpack.c.bf16 %v3880_v6, %v3876_v4  ;;  %v4785_v14 = vpack.c.bf16 %v3887_v9, %v3883_v8  ;;  %v3882_v15 = vld [vmem:[%s10104_s1 + $0x400] sm:$0xff]  ;;  %v3884_v17 = vld [vmem:[%s10104_s1 + $0x410] sm:$0xff] }
  0x35   : > { %v3886_v16 = vld [vmem:[%s10104_s1 + $0x420] sm:$0xff]  ;;  %v4809_v18 = vpack.c.bf16 %v3889_v11, %v3885_v10  ;;  %v3888_v19 = vld [vmem:[%s10104_s1 + $0x430] sm:$0xff]  ;;  %v3891_v20 = vld [vmem:[%s10104_s1 + $0x448] sm:$0xff] }
  0x36   : > { %4744 = vmatpush1.bf16.msra.mxu0 %v4743_v25  ;;  %v3895_v21 = vld [vmem:[%s10104_s1 + $0x468] sm:$0xff]  ;;  %v3893_v22 = vld [vmem:[%s10104_s1 + $0x458] sm:$0xff]  ;;  %v4787_v24 = vpack.c.bf16 %v3886_v16, %v3882_v15  ;;  %v4811_v25 = vpack.c.bf16 %v3888_v19, %v3884_v17  ;;  %v3894_v28 = vld [vmem:[%s10104_s1 + $0x460] sm:$0xff] }
  0x37   : > { %4768 = vmatpush1.bf16.msra.mxu1 %v4767_v26  ;;  %4770 = vmatprep.subr.bf16.mxu0 %v4769_v27  ;;  %v3897_v23 = vld [vmem:[%s10104_s1 + $0x478] sm:$0xff]  ;;  %v4789_v26 = vpack.c.bf16 %v3895_v21, %v3891_v20  ;;  %v3890_v27 = vld [vmem:[%s10104_s1 + $0x440] sm:$0xff]  ;;  %v3892_v29 = vld [vmem:[%s10104_s1 + $0x450] sm:$0xff] }
  0x38   : > { %4794 = vmatprep.subr.bf16.mxu1 %v4793_v31  ;;  %v4813_v30 = vpack.c.bf16 %v3897_v23, %v3893_v22  ;;  %v3896_v31 = vld [vmem:[%s10104_s1 + $0x470] sm:$0xff]  ;;  %v3903_v32 = vld [vmem:[%s10105_s2 + $0x408] sm:$0xff]  ;;  %v3905_v34 = vld [vmem:[%s10105_s2 + $0x418] sm:$0xff]  ;;  %v4791_v36 = vpack.c.bf16 %v3894_v28, %v3890_v27 }
  0x39   : > { %3846 = vmatmul.mubr.msk.f32.vlgmr.msra.gmra.mrb[0].mxu0 %vm248_vm0, %v264_v37  ;;  %v3907_v33 = vld [vmem:[%s10105_s2 + $0x428] sm:$0xff]  ;;  %v3909_v35 = vld [vmem:[%s10105_s2 + $0x438] sm:$0xff]  ;;  %v3906_v41 = vld [vmem:[%s10105_s2 + $0x420] sm:$0xff] }
  0x3a   : > { %3848 = vmatmul.mubr.msk.f32.vlgmr.msra.gmra.mrb[0].mxu1 %vm248_vm0, %v264_v37  ;;  %4772 = vmatpush1.bf16.msra.mxu0 %v4771_v38  ;;  %v4815_v37 = vpack.c.bf16 %v3896_v31, %v3892_v29  ;;  %v4817_v38 = vpack.c.bf16 %v3907_v33, %v3903_v32  ;;  %v3904_v42 = vld [vmem:[%s10105_s2 + $0x410] sm:$0xff]  ;;  %v3915_v45 = vld [vmem:[%s10105_s2 + $0x468] sm:$0xff]  ;;  %v3913_v47 = vld [vmem:[%s10105_s2 + $0x458] sm:$0xff] }
  0x3b   : > { %4796 = vmatpush1.bf16.msra.mxu1 %v4795_v39  ;;  %4774 = vmatprep.subr.bf16.mxu0 %v4773_v40  ;;  %v4881_v39 = vpack.c.bf16 %v3909_v35, %v3905_v34  ;;  %v3902_v40 = vld [vmem:[%s10105_s2 + $0x400] sm:$0xff]  ;;  %v3908_v43 = vld [vmem:[%s10105_s2 + $0x430] sm:$0xff]  ;;  %v3917_v48 = vld [vmem:[%s10105_s2 + $0x478] sm:$0xff] }
  0x3c   : > { %4798 = vmatprep.subr.bf16.mxu1 %v4797_v44  ;;  %601 = vmatprep.mubr.f32.mxu0 %v6034_v7  ;;  %v3911_v44 = vld [vmem:[%s10105_s2 + $0x448] sm:$0xff]  ;;  %v4819_v49 = vpack.c.bf16 %v3906_v41, %v3902_v40  ;;  %v3912_v54 = vld [vmem:[%s10105_s2 + $0x450] sm:$0xff]  ;;  %v4885_v55 = vpack.c.bf16 %v3917_v48, %v3913_v47  ;;  %v3921_v60 = vld [vmem:[%s10105_s2 + $0x498] sm:$0xff] }
  0x3d   : > { %678 = vmatprep.mubr.f32.mxu1 %v6034_v7  ;;  %3847 = vmatmul.mubr.msk.f32.gmra.mrb[2].mxu0 %vm248_vm0, %v265_v51  ;;  %v685_v46 = vld [vmem:[#allocation2 + $0x2] sm:$0xff]  ;;  %v3916_v56 = vld [vmem:[%s10105_s2 + $0x470] sm:$0xff]  ;;  %v3925_v61 = vld [vmem:[%s10105_s2 + $0x4b8] sm:$0xff] }
  0x3e   : > { %4776 = vmatpush1.bf16.msra.mxu0 %v4775_v50  ;;  %3849 = vmatmul.mubr.msk.f32.gmra.mrb[2].mxu1 %vm248_vm0, %v265_v51  ;;  %v4883_v50 = vpack.c.bf16 %v3908_v43, %v3904_v42  ;;  %v4821_v51 = vpack.c.bf16 %v3915_v45, %v3911_v44  ;;  %v3923_v58 = vld [vmem:[%s10105_s2 + $0x4a8] sm:$0xff]  ;;  %v3922_v2 = vld [vmem:[%s10105_s2 + $0x4a0] sm:$0xff]  ;;  %v3920_v3 = vld [vmem:[%s10105_s2 + $0x490] sm:$0xff] }
  0x3f   : > { %4800 = vmatpush1.bf16.msra.mxu1 %v4799_v52  ;;  %4778 = vmatprep.subr.bf16.mxu0 %v4777_v53  ;;  %v3910_v52 = vld [vmem:[%s10105_s2 + $0x440] sm:$0xff]  ;;  %v686_v59 = vld [vmem:[#allocation2 + $0xa] sm:$0xff]  ;;  %v3929_v8 = vld [vmem:[%s10105_s2 + $0x4d8] sm:$0xff] }
  0x40   : > { %4802 = vmatprep.subr.bf16.mxu1 %v4801_v57  ;;  %806 = vmatprep.mubr.f32.mxu0 %v6034_v7  ;;  %v3914_v53 = vld [vmem:[%s10105_s2 + $0x460] sm:$0xff]  ;;  %v3919_v57 = vld [vmem:[%s10105_s2 + $0x488] sm:$0xff]  ;;  %v3924_v4 = vld [vmem:[%s10105_s2 + $0x4b0] sm:$0xff] }
  0x41   : > { %883 = vmatprep.mubr.f32.mxu1 %v6034_v7  ;;  %v4823_v62 = vpack.c.bf16 %v3914_v53, %v3910_v52  ;;  %v3931_v6 = vld [vmem:[%s10105_s2 + $0x4e8] sm:$0xff]  ;;  %v3933_v9 = vld [vmem:[%s10105_s2 + $0x4f8] sm:$0xff]  ;;  %v4891_v11 = vpack.c.bf16 %v3924_v4, %v3920_v3  ;;  %v3928_v15 = vld [vmem:[%s10105_s2 + $0x4d0] sm:$0xff] }
  0x42   : > { %4780 = vmatpush1.bf16.msra.mxu0 %v4779_v63  ;;  %v4887_v63 = vpack.c.bf16 %v3916_v56, %v3912_v54  ;;  %v4893_v16 = vpack.c.bf16 %v3933_v9, %v3929_v8  ;;  %v3932_v17 = vld [vmem:[%s10105_s2 + $0x4f0] sm:$0xff]  ;;  %v3939_v19 = vld [vmem:[%s10105_s2 + $0x528] sm:$0xff]  ;;  %v3937_v20 = vld [vmem:[%s10105_s2 + $0x518] sm:$0xff] }
  0x43   : > { %4804 = vmatpush1.bf16.msra.mxu1 %v4803_v0  ;;  %4782 = vmatprep.subr.bf16.mxu0 %v4781_v1  ;;  %v4825_v0 = vpack.c.bf16 %v3923_v58, %v3919_v57  ;;  %v3918_v1 = vld [vmem:[%s10105_s2 + $0x480] sm:$0xff]  ;;  %v3941_v21 = vld [vmem:[%s10105_s2 + $0x538] sm:$0xff]  ;;  %v4895_v23 = vpack.c.bf16 %v3932_v17, %v3928_v15  ;;  %v3936_v27 = vld [vmem:[%s10105_s2 + $0x510] sm:$0xff] }
  0x44   : > { %4806 = vmatprep.subr.bf16.mxu1 %v4805_v5  ;;  %v3927_v5 = vld [vmem:[%s10105_s2 + $0x4c8] sm:$0xff]  ;;  %v4827_v10 = vpack.c.bf16 %v3922_v2, %v3918_v1  ;;  %v4897_v28 = vpack.c.bf16 %v3941_v21, %v3937_v20  ;;  %v3940_v29 = vld [vmem:[%s10105_s2 + $0x530] sm:$0xff]  ;;  %v3945_v32 = vld [vmem:[%s10105_s2 + $0x558] sm:$0xff] }
  0x45   : > { %v3947_v31 = vld [vmem:[%s10105_s2 + $0x568] sm:$0xff]  ;;  %v3949_v33 = vld [vmem:[%s10105_s2 + $0x578] sm:$0xff]  ;;  %v4899_v35 = vpack.c.bf16 %v3940_v29, %v3936_v27  ;;  %v3948_v41 = vld [vmem:[%s10105_s2 + $0x570] sm:$0xff] }
  0x46   : > { %4784 = vmatpush1.bf16.msra.mxu0 %v4783_v12  ;;  %v4829_v12 = vpack.c.bf16 %v3931_v6, %v3927_v5  ;;  %v4901_v40 = vpack.c.bf16 %v3949_v33, %v3945_v32  ;;  %v3951_v42 = vld [vmem:[%s10105_s2 + $0x588] sm:$0xff]  ;;  %v3953_v44 = vld [vmem:[%s10105_s2 + $0x598] sm:$0xff]  ;;  %v3956_v53 = vld [vmem:[%s10105_s2 + $0x5b0] sm:$0xff] }
  0x47   : > { %4808 = vmatpush1.bf16.msra.mxu1 %v4807_v13  ;;  %4786 = vmatprep.subr.bf16.mxu0 %v4785_v14  ;;  %v3926_v13 = vld [vmem:[%s10105_s2 + $0x4c0] sm:$0xff]  ;;  %v3955_v43 = vld [vmem:[%s10105_s2 + $0x5a8] sm:$0xff]  ;;  %v3957_v45 = vld [vmem:[%s10105_s2 + $0x5b8] sm:$0xff] }
  0x48   : > { %4810 = vmatprep.subr.bf16.mxu1 %v4809_v18  ;;  %v3930_v14 = vld [vmem:[%s10105_s2 + $0x4e0] sm:$0xff]  ;;  %v3935_v18 = vld [vmem:[%s10105_s2 + $0x508] sm:$0xff]  ;;  %v4841_v48 = vpack.c.bf16 %v3955_v43, %v3951_v42  ;;  %v4905_v52 = vpack.c.bf16 %v3957_v45, %v3953_v44  ;;  %v3961_v56 = vld [vmem:[%s10105_s2 + $0x5d8] sm:$0xff] }
  0x49   : > { %v4831_v22 = vpack.c.bf16 %v3930_v14, %v3926_v13  ;;  %v3959_v54 = vld [vmem:[%s10105_s2 + $0x5c8] sm:$0xff]  ;;  %v3965_v57 = vld [vmem:[%s10105_s2 + $0x5f8] sm:$0xff]  ;;  %v3964_v1 = vld [vmem:[%s10105_s2 + $0x5f0] sm:$0xff] }
  0x4a   : > { %4788 = vmatpush1.bf16.msra.mxu0 %v4787_v24  ;;  %v4833_v24 = vpack.c.bf16 %v3939_v19, %v3935_v18  ;;  %v3971_v4 = vld [vmem:[%s10105_s2 + $0x628] sm:$0xff]  ;;  %v3969_v5 = vld [vmem:[%s10105_s2 + $0x618] sm:$0xff]  ;;  %v3966_v9 = vld [vmem:[%s10105_s2 + $0x600] sm:$0xff] }
  0x4b   : > { %4812 = vmatpush1.bf16.msra.mxu1 %v4811_v25  ;;  %4790 = vmatprep.subr.bf16.mxu0 %v4789_v26  ;;  %v3934_v25 = vld [vmem:[%s10105_s2 + $0x500] sm:$0xff]  ;;  %v3973_v8 = vld [vmem:[%s10105_s2 + $0x638] sm:$0xff]  ;;  %v3968_v13 = vld [vmem:[%s10105_s2 + $0x610] sm:$0xff] }
  0x4c   : > { %4814 = vmatprep.subr.bf16.mxu1 %v4813_v30  ;;  %v3938_v26 = vld [vmem:[%s10105_s2 + $0x520] sm:$0xff]  ;;  %v3943_v30 = vld [vmem:[%s10105_s2 + $0x548] sm:$0xff]  ;;  %v3972_v14 = vld [vmem:[%s10105_s2 + $0x630] sm:$0xff] }
  0x4d   : > { %v4835_v34 = vpack.c.bf16 %v3938_v26, %v3934_v25  ;;  %v4915_v15 = vpack.c.bf16 %v3972_v14, %v3968_v13  ;;  %v3979_v17 = vld [vmem:[%s10105_s2 + $0x668] sm:$0xff]  ;;  %v3977_v18 = vld [vmem:[%s10105_s2 + $0x658] sm:$0xff]  ;;  %v3974_v21 = vld [vmem:[%s10105_s2 + $0x640] sm:$0xff] }
  0x4e   : > { %4792 = vmatpush1.bf16.msra.mxu0 %v4791_v36  ;;  %v4837_v36 = vpack.c.bf16 %v3947_v31, %v3943_v30  ;;  %v3981_v20 = vld [vmem:[%s10105_s2 + $0x678] sm:$0xff]  ;;  %v3976_v25 = vld [vmem:[%s10105_s2 + $0x650] sm:$0xff]  ;;  %v3987_v29 = vld [vmem:[%s10105_s2 + $0x6a8] sm:$0xff] }
  0x4f   : > { %4816 = vmatpush1.bf16.msra.mxu1 %v4815_v37  ;;  %4818 = vmatprep.subr.bf16.mxu0 %v4817_v38  ;;  %v3942_v37 = vld [vmem:[%s10105_s2 + $0x540] sm:$0xff]  ;;  %v3980_v26 = vld [vmem:[%s10105_s2 + $0x670] sm:$0xff]  ;;  %v3985_v30 = vld [vmem:[%s10105_s2 + $0x698] sm:$0xff] }
  0x50   : > { %4882 = vmatprep.subr.bf16.mxu1 %v4881_v39  ;;  %v3946_v38 = vld [vmem:[%s10105_s2 + $0x560] sm:$0xff]  ;;  %v3944_v39 = vld [vmem:[%s10105_s2 + $0x550] sm:$0xff]  ;;  %v4919_v27 = vpack.c.bf16 %v3980_v26, %v3976_v25  ;;  %v3989_v32 = vld [vmem:[%s10105_s2 + $0x6b8] sm:$0xff] }
  0x51   : > { %3898 = vmatmul.mubr.msk.f32.vlgmr.msra.gmra.mrb[0].mxu0 %vm248_vm0, %v685_v46  ;;  %v4903_v47 = vpack.c.bf16 %v3948_v41, %v3944_v39  ;;  %v3982_v33 = vld [vmem:[%s10105_s2 + $0x680] sm:$0xff]  ;;  %v3995_v41 = vld [vmem:[%s10105_s2 + $0x6e8] sm:$0xff]  ;;  %v3993_v42 = vld [vmem:[%s10105_s2 + $0x6d8] sm:$0xff] }
  0x52   : > { %3900 = vmatmul.mubr.msk.f32.vlgmr.msra.gmra.mrb[0].mxu1 %vm248_vm0, %v685_v46  ;;  %812 = vmatprep.mubr.f32.mxu0 %v6034_v7  ;;  %v4839_v46 = vpack.c.bf16 %v3946_v38, %v3942_v37  ;;  %v3984_v37 = vld [vmem:[%s10105_s2 + $0x690] sm:$0xff]  ;;  %v3997_v44 = vld [vmem:[%s10105_s2 + $0x6f8] sm:$0xff]  ;;  %v3990_v45 = vld [vmem:[%s10105_s2 + $0x6c0] sm:$0xff] }
  0x53   : > { %889 = vmatprep.mubr.f32.mxu1 %v6034_v7  ;;  %4820 = vmatpush1.bf16.msra.mxu0 %v4819_v49  ;;  %v4889_v7 = vpack.c.bf16 %v3925_v61, %v3921_v60  ;;  %v3950_v49 = vld [vmem:[%s10105_s2 + $0x580] sm:$0xff]  ;;  %v3988_v38 = vld [vmem:[%s10105_s2 + $0x6b0] sm:$0xff]  ;;  %v4019_v13 = vld [vmem:[%s10105_s2 + $0x7a8] sm:$0xff] }
  0x54   : > { %4884 = vmatpush1.bf16.msra.mxu1 %v4883_v50  ;;  %4822 = vmatprep.subr.bf16.mxu0 %v4821_v51  ;;  %v3954_v50 = vld [vmem:[%s10105_s2 + $0x5a0] sm:$0xff]  ;;  %v3952_v51 = vld [vmem:[%s10105_s2 + $0x590] sm:$0xff]  ;;  %v4923_v39 = vpack.c.bf16 %v3988_v38, %v3984_v37  ;;  %v4017_v14 = vld [vmem:[%s10105_s2 + $0x798] sm:$0xff] }
  0x55   : > { %3899 = vmatmul.mubr.msk.f32.gmra.mrb[2].mxu0 %vm248_vm0, %v686_v59  ;;  %4886 = vmatprep.subr.bf16.mxu1 %v4885_v55  ;;  %v3963_v55 = vld [vmem:[%s10105_s2 + $0x5e8] sm:$0xff]  ;;  %v4843_v58 = vpack.c.bf16 %v3954_v50, %v3950_v49  ;;  %v3958_v61 = vld [vmem:[%s10105_s2 + $0x5c0] sm:$0xff]  ;;  %v3992_v49 = vld [vmem:[%s10105_s2 + $0x6d0] sm:$0xff] }
  0x56   : > { %3901 = vmatmul.mubr.msk.f32.gmra.mrb[2].mxu1 %vm248_vm0, %v686_v59  ;;  %v4907_v59 = vpack.c.bf16 %v3956_v53, %v3952_v51  ;;  %v4845_v60 = vpack.c.bf16 %v3963_v55, %v3959_v54  ;;  %v3996_v50 = vld [vmem:[%s10105_s2 + $0x6f0] sm:$0xff]  ;;  %v4003_v53 = vld [vmem:[%s10105_s2 + $0x728] sm:$0xff]  ;;  %v4001_v54 = vld [vmem:[%s10105_s2 + $0x718] sm:$0xff] }
  0x57   : > { %4824 = vmatpush1.bf16.msra.mxu0 %v4823_v62  ;;  %v3962_v62 = vld [vmem:[%s10105_s2 + $0x5e0] sm:$0xff]  ;;  %v4927_v51 = vpack.c.bf16 %v3996_v50, %v3992_v49  ;;  %v4027_v25 = vld [vmem:[%s10105_s2 + $0x7e8] sm:$0xff]  ;;  %v4025_v26 = vld [vmem:[%s10105_s2 + $0x7d8] sm:$0xff] }
  0x58   : > { %4888 = vmatpush1.bf16.msra.mxu1 %v4887_v63  ;;  %4826 = vmatprep.subr.bf16.mxu0 %v4825_v0  ;;  %v4909_v63 = vpack.c.bf16 %v3965_v57, %v3961_v56  ;;  %v3960_v0 = vld [vmem:[%s10105_s2 + $0x5d0] sm:$0xff]  ;;  %v4847_v2 = vpack.c.bf16 %v3962_v62, %v3958_v61  ;;  %v4005_v56 = vld [vmem:[%s10105_s2 + $0x738] sm:$0xff]  ;;  %v3998_v57 = vld [vmem:[%s10105_s2 + $0x700] sm:$0xff] }
  0x59   : > { %4890 = vmatprep.subr.bf16.mxu1 %v4889_v7  ;;  %v4911_v3 = vpack.c.bf16 %v3964_v1, %v3960_v0  ;;  %v3967_v7 = vld [vmem:[%s10105_s2 + $0x608] sm:$0xff]  ;;  %v4000_v61 = vld [vmem:[%s10105_s2 + $0x710] sm:$0xff]  ;;  %v1057_v38 = vld [vmem:[%s10105_s2 + $0x18] sm:$0xff] }
  0x5a   : > { %v4849_v6 = vpack.c.bf16 %v3971_v4, %v3967_v7  ;;  %v4004_v62 = vld [vmem:[%s10105_s2 + $0x730] sm:$0xff]  ;;  %v4007_v0 = vld [vmem:[%s10105_s2 + $0x748] sm:$0xff]  ;;  %v4013_v7 = vld [vmem:[%s10105_s2 + $0x778] sm:$0xff] }
  0x5b   : > { %4828 = vmatpush1.bf16.msra.mxu0 %v4827_v10  ;;  %v3970_v10 = vld [vmem:[%s10105_s2 + $0x620] sm:$0xff]  ;;  %v4011_v1 = vld [vmem:[%s10105_s2 + $0x768] sm:$0xff] }
  0x5c   : > { %4892 = vmatpush1.bf16.msra.mxu1 %v4891_v11  ;;  %4830 = vmatprep.subr.bf16.mxu0 %v4829_v12  ;;  %v4913_v11 = vpack.c.bf16 %v3973_v8, %v3969_v5  ;;  %v4851_v12 = vpack.c.bf16 %v3970_v10, %v3966_v9  ;;  %v4006_v4 = vld [vmem:[%s10105_s2 + $0x740] sm:$0xff]  ;;  %v4008_v9 = vld [vmem:[%s10105_s2 + $0x750] sm:$0xff]  ;;  %v1059_v37 = vld [vmem:[%s10105_s2 + $0x28] sm:$0xff] }
  0x5d   : > { %4894 = vmatprep.subr.bf16.mxu1 %v4893_v16  ;;  %v3975_v16 = vld [vmem:[%s10105_s2 + $0x648] sm:$0xff]  ;;  %v4010_v5 = vld [vmem:[%s10105_s2 + $0x760] sm:$0xff]  ;;  %v4012_v10 = vld [vmem:[%s10105_s2 + $0x770] sm:$0xff] }
  0x5e   : > { %v4853_v19 = vpack.c.bf16 %v3979_v17, %v3975_v16  ;;  %v4871_v8 = vpack.c.bf16 %v4010_v5, %v4006_v4  ;;  %v4021_v16 = vld [vmem:[%s10105_s2 + $0x7b8] sm:$0xff]  ;;  %v4014_v17 = vld [vmem:[%s10105_s2 + $0x780] sm:$0xff] }
  0x5f   : > { %4832 = vmatpush1.bf16.msra.mxu0 %v4831_v22  ;;  %v3978_v22 = vld [vmem:[%s10105_s2 + $0x660] sm:$0xff] }
  0x60   : > { %4896 = vmatpush1.bf16.msra.mxu1 %v4895_v23  ;;  %4834 = vmatprep.subr.bf16.mxu0 %v4833_v24  ;;  %v4917_v23 = vpack.c.bf16 %v3981_v20, %v3977_v18  ;;  %v4855_v24 = vpack.c.bf16 %v3978_v22, %v3974_v21  ;;  %v4018_v18 = vld [vmem:[%s10105_s2 + $0x7a0] sm:$0xff]  ;;  %v4016_v21 = vld [vmem:[%s10105_s2 + $0x790] sm:$0xff] }
  0x61   : > { %4898 = vmatprep.subr.bf16.mxu1 %v4897_v28  ;;  %v3983_v28 = vld [vmem:[%s10105_s2 + $0x688] sm:$0xff]  ;;  %v4875_v20 = vpack.c.bf16 %v4018_v18, %v4014_v17  ;;  %v4020_v22 = vld [vmem:[%s10105_s2 + $0x7b0] sm:$0xff] }
  0x62   : > { %v4857_v31 = vpack.c.bf16 %v3987_v29, %v3983_v28 }
  0x63   : > { %4836 = vmatpush1.bf16.msra.mxu0 %v4835_v34  ;;  %v3986_v34 = vld [vmem:[%s10105_s2 + $0x6a0] sm:$0xff] }
  0x64   : > { %4900 = vmatpush1.bf16.msra.mxu1 %v4899_v35  ;;  %4838 = vmatprep.subr.bf16.mxu0 %v4837_v36  ;;  %v4921_v35 = vpack.c.bf16 %v3989_v32, %v3985_v30  ;;  %v4859_v36 = vpack.c.bf16 %v3986_v34, %v3982_v33  ;;  %v4022_v30 = vld [vmem:[%s10105_s2 + $0x7c0] sm:$0xff]  ;;  %v4024_v32 = vld [vmem:[%s10105_s2 + $0x7d0] sm:$0xff] }
  0x65   : > { %4902 = vmatprep.subr.bf16.mxu1 %v4901_v40  ;;  %v3991_v40 = vld [vmem:[%s10105_s2 + $0x6c8] sm:$0xff]  ;;  %v4028_v34 = vld [vmem:[%s10105_s2 + $0x7f0] sm:$0xff] }
  0x66   : > { %v4861_v43 = vpack.c.bf16 %v3995_v41, %v3991_v40  ;;  %v1061_v40 = vld [vmem:[%s10105_s2 + $0x38] sm:$0xff] }
  0x67   : > { %4840 = vmatpush1.bf16.msra.mxu0 %v4839_v46  ;;  %v3994_v46 = vld [vmem:[%s10105_s2 + $0x6e0] sm:$0xff]  ;;  %v5009_v41 = vpack.c.bf16 %v1061_v40, %v1057_v38  ;;  %v1060_v40 = vld [vmem:[%s10105_s2 + $0x30] sm:$0xff] }
  0x68   : > { %4904 = vmatpush1.bf16.msra.mxu1 %v4903_v47  ;;  %4842 = vmatprep.subr.bf16.mxu0 %v4841_v48  ;;  %v4925_v47 = vpack.c.bf16 %v3997_v44, %v3993_v42  ;;  %v4863_v48 = vpack.c.bf16 %v3994_v46, %v3990_v45  ;;  %v6035_v42 = vmov 1966171168   ;;  %v1058_v38 = vld [vmem:[%s10105_s2 + $0x20] sm:$0xff] }
  0x69   : > { %4906 = vmatprep.subr.bf16.mxu1 %v4905_v52  ;;  %v3999_v52 = vld [vmem:[%s10105_s2 + $0x708] sm:$0xff] }
  0x6a   : > { %v4865_v55 = vpack.c.bf16 %v4003_v53, %v3999_v52 }
  0x6b   : > { %4844 = vmatpush1.bf16.msra.mxu0 %v4843_v58  ;;  %v4002_v58 = vld [vmem:[%s10105_s2 + $0x720] sm:$0xff] }
  0x6c   : > { %4908 = vmatpush1.bf16.msra.mxu1 %v4907_v59  ;;  %4846 = vmatprep.subr.bf16.mxu0 %v4845_v60  ;;  %v4929_v59 = vpack.c.bf16 %v4005_v56, %v4001_v54  ;;  %v4867_v60 = vpack.c.bf16 %v4002_v58, %v3998_v57 }
  0x6d   : > { %4910 = vmatprep.subr.bf16.mxu1 %v4909_v63  ;;  %v4931_v63 = vpack.c.bf16 %v4004_v62, %v4000_v61 }
  0x6f   : > { %4848 = vmatpush1.bf16.msra.mxu0 %v4847_v2  ;;  %v4009_v2 = vld [vmem:[%s10105_s2 + $0x758] sm:$0xff] }
  0x70   : > { %4912 = vmatpush1.bf16.msra.mxu1 %v4911_v3  ;;  %4850 = vmatprep.subr.bf16.mxu0 %v4849_v6  ;;  %v4869_v3 = vpack.c.bf16 %v4011_v1, %v4007_v0  ;;  %v4933_v6 = vpack.c.bf16 %v4013_v7, %v4009_v2 }
  0x71   : > { %4914 = vmatprep.subr.bf16.mxu1 %v4913_v11  ;;  %v4935_v11 = vpack.c.bf16 %v4012_v10, %v4008_v9 }
  0x73   : > { %4852 = vmatpush1.bf16.msra.mxu0 %v4851_v12  ;;  %v4015_v12 = vld [vmem:[%s10105_s2 + $0x788] sm:$0xff] }
  0x74   : > { %4916 = vmatpush1.bf16.msra.mxu1 %v4915_v15  ;;  %4854 = vmatprep.subr.bf16.mxu0 %v4853_v19  ;;  %v4873_v15 = vpack.c.bf16 %v4019_v13, %v4015_v12  ;;  %v4937_v19 = vpack.c.bf16 %v4021_v16, %v4017_v14 }
  0x75   : > { %4918 = vmatprep.subr.bf16.mxu1 %v4917_v23  ;;  %v4023_v23 = vld [vmem:[%s10105_s2 + $0x7c8] sm:$0xff] }
  0x76   : > { %v4877_v28 = vpack.c.bf16 %v4027_v25, %v4023_v23 }
  0x77   : > { %4856 = vmatpush1.bf16.msra.mxu0 %v4855_v24  ;;  %v4939_v24 = vpack.c.bf16 %v4020_v22, %v4016_v21 }
  0x78   : > { %4920 = vmatpush1.bf16.msra.mxu1 %v4919_v27  ;;  %4858 = vmatprep.subr.bf16.mxu0 %v4857_v31  ;;  %v4029_v27 = vld [vmem:[%s10105_s2 + $0x7f8] sm:$0xff]  ;;  %v4026_v31 = vld [vmem:[%s10105_s2 + $0x7e0] sm:$0xff] }
  0x79   : > { %4922 = vmatprep.subr.bf16.mxu1 %v4921_v35  ;;  %v4941_v29 = vpack.c.bf16 %v4029_v27, %v4025_v26  ;;  %v4879_v33 = vpack.c.bf16 %v4026_v31, %v4022_v30  ;;  %v4943_v35 = vpack.c.bf16 %v4028_v34, %v4024_v32 }
  0x7b   : > { %4860 = vmatpush1.bf16.msra.mxu0 %v4859_v36  ;;  %v1055_v36 = vld [vmem:[%s10105_s2 + $0x8] sm:$0xff] }
  0x7c   : > { %4924 = vmatpush1.bf16.msra.mxu1 %v4923_v39  ;;  %4862 = vmatprep.subr.bf16.mxu0 %v4861_v43  ;;  %v4945_v39 = vpack.c.bf16 %v1059_v37, %v1055_v36  ;;  %v944_v43 = vunpack.c.l.s4 %v6035_v42  ;;  %v1054_v37 = vld [vmem:[%s10105_s2] sm:$0xff]  ;;  %v1067_v42 = vld [vmem:[%s10105_s2 + $0x68] sm:$0xff] }
  0x7d   : > { %4926 = vmatprep.subr.bf16.mxu1 %v4925_v47 }
  0x7e   : > { %v945_v53 = vunpack.c.0.s8 %v944_v43  ;;  %v1065_v43 = vld [vmem:[%s10105_s2 + $0x58] sm:$0xff] }
  0x7f   : > { %4864 = vmatpush1.bf16.msra.mxu0 %v4863_v48  ;;  %v946_v48 = vlaneseq }
  0x80   : > { %4928 = vmatpush1.bf16.msra.mxu1 %v4927_v51  ;;  %4866 = vmatprep.subr.bf16.mxu0 %v4865_v55 }
  0x81   : > { %4930 = vmatprep.subr.bf16.mxu1 %v4929_v59  ;;  %v6965_v59 = vshrl.u32 %v946_v48, 7  ;;  %vm6972_vm10 = vcmp.lt.s32.totalorder %v946_v48, 256 }
  0x83   : > { %4868 = vmatpush1.bf16.msra.mxu0 %v4867_v60  ;;  %v6968_v14 = vsub.s32 %v945_v53, %v6965_v59  ;;  %v4947_v53 = vpack.c.bf16 %v1058_v38, %v1054_v37  ;;  %v1088_v37 = vld [vmem:[%s10105_s2 + $0x110] sm:$0xff] }
  0x84   : > { %4932 = vmatpush1.bf16.msra.mxu1 %v4931_v63  ;;  %4870 = vmatprep.subr.bf16.mxu0 %v4869_v3  ;;  %v1092_v38 = vld [vmem:[%s10105_s2 + $0x130] sm:$0xff] }
  0x85   : > { %4934 = vmatprep.subr.bf16.mxu1 %v4933_v6 }
  0x87   : > { %4872 = vmatpush1.bf16.msra.mxu0 %v4871_v8 }
  0x88   : > { %4936 = vmatpush1.bf16.msra.mxu1 %v4935_v11  ;;  %4874 = vmatprep.subr.bf16.mxu0 %v4873_v15 }
  0x89   : > { %4938 = vmatprep.subr.bf16.mxu1 %v4937_v19 }
  0x8b   : > { %4876 = vmatpush1.bf16.msra.mxu0 %v4875_v20 }
  0x8c   : > { %4940 = vmatpush1.bf16.msra.mxu1 %v4939_v24  ;;  %4878 = vmatprep.subr.bf16.mxu0 %v4877_v28  ;;  %v2866_v24 = vld [vmem:[%s10107_s4 + $0x48] sm:$0xff] }
  0x8d   : > { %4942 = vmatprep.subr.bf16.mxu1 %v4941_v29 }
  0x8f   : > { %4880 = vmatpush1.bf16.msra.mxu0 %v4879_v33 }
  0x90   : > { %4944 = vmatpush1.bf16.msra.mxu1 %v4943_v35  ;;  %4946 = vmatprep.subr.bf16.mxu0 %v4945_v39  ;;  %v1056_v39 = vld [vmem:[%s10105_s2 + $0x10] sm:$0xff] }
  0x91   : > { %5010 = vmatprep.subr.bf16.mxu1 %v5009_v41  ;;  %v1063_v41 = vld [vmem:[%s10105_s2 + $0x48] sm:$0xff] }
 0x124   : > { %v808_v44 = vpop.f32.mrb[0].mxu0 }
 0x125   : > { %vm904_vm2 = vcmp.ge.f32.partialorder %v808_v44, 0.0  ;;  %v912_v45 = vmul.f32 0.2, %v808_v44  ;;  %v885_v46 = vpop.f32.mrb[0].mxu1  ;;  %v810_v47 = vpop.f32.mrb[1].mxu0 }
 0x126   : > { %vm906_vm3 = vcmp.ge.f32.partialorder %v885_v46, 0.0  ;;  %v914_v49 = vmul.f32 0.2, %v885_v46  ;;  %vm905_vm4 = vcmp.ge.f32.partialorder %v810_v47, 0.0  ;;  %v913_v50 = vmul.f32 0.2, %v810_v47 }
 0x127   : > { %v920_v51 = vsel %vm904_vm2, %v808_v44, %v912_v45  ;;  %v887_v52 = vpop.f32.mrb[1].mxu1 }
 0x128   : > { %v922_v54 = vsel %vm906_vm3, %v885_v46, %v914_v49  ;;  %v921_v55 = vsel %vm905_vm4, %v810_v47, %v913_v50  ;;  %vm907_vm5 = vcmp.ge.f32.partialorder %v887_v52, 0.0  ;;  %v915_v56 = vmul.f32 0.2, %v887_v52  ;;  %v814_v57 = vpop.f32.mrb[2].mxu0 }
 0x129   : > { %v928_v58 = vmax.f32 %v920_v51, %v922_v54  ;;  %vm908_vm6 = vcmp.ge.f32.partialorder %v814_v57, 0.0  ;;  %v916_v60 = vmul.f32 0.2, %v814_v57  ;;  %v891_v61 = vpop.f32.mrb[2].mxu1  ;;  %v816_v62 = vpop.f32.mrb[3].mxu0  ;;  %v1069_v51 = vld [vmem:[%s10105_s2 + $0x78] sm:$0xff]  ;;  %v5011_v54 = vpack.c.bf16 %v1060_v40, %v1056_v39 }
 0x12a   : > { %v923_v63 = vsel %vm907_vm5, %v887_v52, %v915_v56  ;;  %vm910_vm7 = vcmp.ge.f32.partialorder %v891_v61, 0.0  ;;  %v918_v0 = vmul.f32 0.2, %v891_v61  ;;  %vm909_vm8 = vcmp.ge.f32.partialorder %v816_v62, 0.0  ;;  %v893_v1 = vpop.f32.mrb[3].mxu1  ;;  %v1066_v56 = vld [vmem:[%s10105_s2 + $0x60] sm:$0xff] }
 0x12b   : > { %v934_v2 = vrot.slane %v928_v58, 1  ;;  %v929_v3 = vmax.f32 %v921_v55, %v923_v63  ;;  %v924_v7 = vsel %vm908_vm6, %v814_v57, %v916_v60  ;;  %v917_v4 = vmul.f32 0.2, %v816_v62  ;;  %v1062_v55 = vld [vmem:[%s10105_s2 + $0x40] sm:$0xff]  ;;  %v1068_v60 = vld [vmem:[%s10105_s2 + $0x70] sm:$0xff]  ;;  %v1095_v39 = vld [vmem:[%s10105_s2 + $0x148] sm:$0xff] }
 0x12c   : > { %v926_v5 = vsel %vm910_vm7, %v891_v61, %v918_v0  ;;  %vm911_vm9 = vcmp.ge.f32.partialorder %v893_v1, 0.0  ;;  %v919_v6 = vmul.f32 0.2, %v893_v1  ;;  %v1071_v61 = vld [vmem:[%s10105_s2 + $0x88] sm:$0xff]  ;;  %v4949_v63 = vpack.c.bf16 %v1067_v42, %v1063_v41  ;;  %v1097_v41 = vld [vmem:[%s10105_s2 + $0x158] sm:$0xff] }
 0x12d   : > { %v938_v8 = vmax.f32 %v928_v58, %v934_v2  ;;  %v935_v9 = vrot.slane %v929_v3, 1  ;;  %v930_v10 = vmax.f32 %v924_v7, %v926_v5  ;;  %v925_v11 = vsel %vm909_vm8, %v816_v62, %v917_v4  ;;  %v1064_v58 = vld [vmem:[%s10105_s2 + $0x50] sm:$0xff]  ;;  %v1073_v2 = vld [vmem:[%s10105_s2 + $0x98] sm:$0xff]  ;;  %v1099_v40 = vld [vmem:[%s10105_s2 + $0x168] sm:$0xff] }
 0x12e   : > { %v927_v12 = vsel %vm911_vm9, %v893_v1, %v919_v6  ;;  %v5013_v0 = vpack.c.bf16 %v1069_v51, %v1065_v43  ;;  %v1075_v1 = vld [vmem:[%s10105_s2 + $0xa8] sm:$0xff]  ;;  %v4951_v4 = vpack.c.bf16 %v1066_v56, %v1062_v55  ;;  %v5015_v5 = vpack.c.bf16 %v1068_v60, %v1064_v58  ;;  %v1070_v6 = vld [vmem:[%s10105_s2 + $0x80] sm:$0xff]  ;;  %v1101_v42 = vld [vmem:[%s10105_s2 + $0x178] sm:$0xff] }
 0x12f   : > { %v939_v13 = vmax.f32 %v929_v3, %v935_v9  ;;  %v996_v15 = vrot.slane %v930_v10, 1  ;;  %v931_v16 = vmax.f32 %v925_v11, %v927_v12  ;;  %v1077_v3 = vld [vmem:[%s10105_s2 + $0xb8] sm:$0xff]  ;;  %v4953_v9 = vpack.c.bf16 %v1075_v1, %v1071_v61  ;;  %v1072_v11 = vld [vmem:[%s10105_s2 + $0x90] sm:$0xff]  ;;  %v1103_v51 = vld [vmem:[%s10105_s2 + $0x188] sm:$0xff] }
 0x130   : > { %v1076_v12 = vld [vmem:[%s10105_s2 + $0xb0] sm:$0xff]  ;;  %v1106_v58 = vld [vmem:[%s10105_s2 + $0x1a0] sm:$0xff]  ;;  %v1115_v1 = vld [vmem:[%s10105_s2 + $0x1e8] sm:$0xff]  ;;  %vm3726_vm9 = vcmask 1040384  }
 0x131   : > { %v942_v17 = vcombine.low %v938_v8, %v939_v13  ;;  %v970_v18 = vcombine.high %v938_v8, %v939_v13  ;;  %v1000_v19 = vmax.f32 %v930_v10, %v996_v15  ;;  %v997_v20 = vrot.slane %v931_v16, 1  ;;  %v1074_v8 = vld [vmem:[%s10105_s2 + $0xa0] sm:$0xff]  ;;  %v1079_v13 = vld [vmem:[%s10105_s2 + $0xc8] sm:$0xff] }
 0x132   : > { %v5017_v10 = vpack.c.bf16 %v1077_v3, %v1073_v2  ;;  %v1083_v15 = vld [vmem:[%s10105_s2 + $0xe8] sm:$0xff]  ;;  %v1113_v2 = vld [vmem:[%s10105_s2 + $0x1d8] sm:$0xff] }
 0x133   : > { %v949_v21 = vrot.slane %v942_v17, %v6968_v14  ;;  %v977_v22 = vrot.slane %v970_v18, %v6968_v14  ;;  %v1001_v23 = vmax.f32 %v931_v16, %v997_v20  ;;  %v1081_v16 = vld [vmem:[%s10105_s2 + $0xd8] sm:$0xff]  ;;  %v4955_v18 = vpack.c.bf16 %v1074_v8, %v1070_v6  ;;  %v1078_v20 = vld [vmem:[%s10105_s2 + $0xc0] sm:$0xff] }
 0x134   : > { %v1085_v17 = vld [vmem:[%s10105_s2 + $0xf8] sm:$0xff]  ;;  %v1114_v6 = vld [vmem:[%s10105_s2 + $0x1e0] sm:$0xff] }
 0x135   : > { %v956_v25 = vrot.slane %v949_v21, %v6968_v14  ;;  %v984_v26 = vrot.slane %v977_v22, %v6968_v14  ;;  %v1004_v27 = vcombine.low %v1000_v19, %v1001_v23  ;;  %v1028_v28 = vcombine.high %v1000_v19, %v1001_v23  ;;  %v1082_v21 = vld [vmem:[%s10105_s2 + $0xe0] sm:$0xff]  ;;  %v1117_v3 = vld [vmem:[%s10105_s2 + $0x1f8] sm:$0xff] }
 0x136   : > { %v5019_v19 = vpack.c.bf16 %v1076_v12, %v1072_v11  ;;  %v4957_v22 = vpack.c.bf16 %v1083_v15, %v1079_v13  ;;  %v5021_v23 = vpack.c.bf16 %v1085_v17, %v1081_v16  ;;  %v1116_v11 = vld [vmem:[%s10105_s2 + $0x1f0] sm:$0xff]  ;;  %v1119_v12 = vld [vmem:[%s10105_s2 + $0x208] sm:$0xff]  ;;  %v1121_v15 = vld [vmem:[%s10105_s2 + $0x218] sm:$0xff] }
 0x137   : > { %963 = vst.msk [vmem:[#allocation3 + $0x1] ss:$8 sm:$0x3] %vm6972_vm10, %v956_v25  ;;  %v965_v29 = vcombine.high %v956_v25, %v956_v25  ;;  %987 = vst.msk [vmem:[#allocation3 + $0x3] ss:$8 sm:$0x3] %vm6972_vm10, %v984_v26  ;;  %v989_v30 = vcombine.high %v984_v26, %v984_v26  ;;  %v1011_v31 = vrot.slane %v1004_v27, %v6968_v14 }
 0x138   : > { %v1035_v32 = vrot.slane %v1028_v28, %v6968_v14  ;;  %v1080_v25 = vld [vmem:[%s10105_s2 + $0xd0] sm:$0xff]  ;;  %v1087_v27 = vld [vmem:[%s10105_s2 + $0x108] sm:$0xff]  ;;  %v1125_v16 = vld [vmem:[%s10105_s2 + $0x238] sm:$0xff] }
 0x139   : > { %968 = vst.msk [vmem:[#allocation3 + $0x2] ss:$8 sm:$0x3] %vm6972_vm10, %v965_v29  ;;  %992 = vst.msk [vmem:[#allocation3 + $0x4] ss:$8 sm:$0x3] %vm6972_vm10, %v989_v30  ;;  %v1018_v33 = vrot.slane %v1011_v31, %v6968_v14  ;;  %v4959_v31 = vpack.c.bf16 %v1082_v21, %v1078_v20 }
 0x13a   : > { %v1042_v34 = vrot.slane %v1035_v32, %v6968_v14  ;;  %v1084_v26 = vld [vmem:[%s10105_s2 + $0xf0] sm:$0xff]  ;;  %v1091_v28 = vld [vmem:[%s10105_s2 + $0x128] sm:$0xff]  ;;  %v1089_v29 = vld [vmem:[%s10105_s2 + $0x118] sm:$0xff] }
 0x13b   : > { %1021 = vst.msk [vmem:[#allocation3 + $0x5] ss:$8 sm:$0x3] %vm6972_vm10, %v1018_v33  ;;  %v1023_v35 = vcombine.high %v1018_v33, %v1018_v33  ;;  %v1093_v30 = vld [vmem:[%s10105_s2 + $0x138] sm:$0xff]  ;;  %v5023_v32 = vpack.c.bf16 %v1084_v26, %v1080_v25  ;;  %v1086_v33 = vld [vmem:[%s10105_s2 + $0x100] sm:$0xff]  ;;  %v1123_v13 = vld [vmem:[%s10105_s2 + $0x228] sm:$0xff] }
 0x13c   : > { %1045 = vst.msk [vmem:[#allocation3 + $0x7] ss:$8 sm:$0x3] %vm6972_vm10, %v1042_v34  ;;  %v1047_v36 = vcombine.high %v1042_v34, %v1042_v34  ;;  %v1090_v34 = vld [vmem:[%s10105_s2 + $0x120] sm:$0xff]  ;;  %v4977_v21 = vpack.c.bf16 %v1123_v13, %v1119_v12  ;;  %v1124_v25 = vld [vmem:[%s10105_s2 + $0x230] sm:$0xff]  ;;  %v1127_v26 = vld [vmem:[%s10105_s2 + $0x248] sm:$0xff] }
 0x13d   : > { %1026 = vst.msk [vmem:[#allocation3 + $0x6] ss:$8 sm:$0x3] %vm6972_vm10, %v1023_v35  ;;  %v4961_v35 = vpack.c.bf16 %v1091_v28, %v1087_v27  ;;  %v4963_v43 = vpack.c.bf16 %v1090_v34, %v1086_v33  ;;  %v1122_v20 = vld [vmem:[%s10105_s2 + $0x220] sm:$0xff]  ;;  %v1131_v27 = vld [vmem:[%s10105_s2 + $0x268] sm:$0xff]  ;;  %v1129_v28 = vld [vmem:[%s10105_s2 + $0x258] sm:$0xff] }
 0x13e   : > { %1050 = vst.msk [vmem:[#allocation3 + $0x10] ss:$8 sm:$0x3] %vm6972_vm10, %v1047_v36  ;;  %v5025_v36 = vpack.c.bf16 %v1093_v30, %v1089_v29  ;;  %v1133_v29 = vld [vmem:[%s10105_s2 + $0x278] sm:$0xff]  ;;  %v1130_v33 = vld [vmem:[%s10105_s2 + $0x260] sm:$0xff]  ;;  %v4981_v34 = vpack.c.bf16 %v1131_v27, %v1127_v26  ;;  %v1163_v12 = vld [vmem:[%s10105_s2 + $0x368] sm:$0xff] }
 0x13f   : > { %v1161_v13 = vld [vmem:[%s10105_s2 + $0x358] sm:$0xff]  ;;  %v1171_v26 = vld [vmem:[%s10105_s2 + $0x3a8] sm:$0xff] }
 0x140   : > { %v1169_v27 = vld [vmem:[%s10105_s2 + $0x398] sm:$0xff] }
 0x144   : > { %v1183_v44 = vld [vmem:[#allocation3 + $0x8] sm:$0xfe]  ;;  %v1182_v46 = vld [vmem:[#allocation3] sm:$0xfe] }
 0x145   : > { %v1185_v45 = vld [vmem:[#allocation3 + $0x18] sm:$0x1]  ;;  %v1323_v47 = vrot.slane %v1183_v44, 1  ;;  %v1184_v49 = vld [vmem:[#allocation3 + $0x10] sm:$0x1]  ;;  %v1320_v50 = vrot.slane %v1182_v46, 1  ;;  %v5027_v44 = vpack.c.bf16 %v1092_v38, %v1088_v37 }
 0x146   : > { %v1324_v48 = vrot.slane %v1185_v45, 1  ;;  %v1321_v52 = vrot.slane %v1184_v49, 1  ;;  %v1053_v7 = vld [vmem:[#allocation3 + $0x8] sm:$0xff]  ;;  %v1096_v49 = vld [vmem:[%s10105_s2 + $0x150] sm:$0xff]  ;;  %v1135_v38 = vld [vmem:[%s10105_s2 + $0x288] sm:$0xff] }
 0x147   : > { %v1094_v45 = vld [vmem:[%s10105_s2 + $0x140] sm:$0xff]  ;;  %v1132_v37 = vld [vmem:[%s10105_s2 + $0x270] sm:$0xff] }
 0x148   : > { %v1325_v57 = vsel %vm1319_vm11, %v1323_v47, %v1324_v48  ;;  %v1322_v62 = vsel %vm1319_vm11, %v1320_v50, %v1321_v52  ;;  %v1098_v46 = vld [vmem:[%s10105_s2 + $0x160] sm:$0xff]  ;;  %v4965_v47 = vpack.c.bf16 %v1099_v40, %v1095_v39  ;;  %v5029_v48 = vpack.c.bf16 %v1101_v42, %v1097_v41  ;;  %v1100_v50 = vld [vmem:[%s10105_s2 + $0x170] sm:$0xff]  ;;  %v1107_v52 = vld [vmem:[%s10105_s2 + $0x1a8] sm:$0xff] }
 0x149   : > { %1392 = vmatprep.mubr.f32.mxu0 %v1325_v57  ;;  %1463 = vmatprep.mubr.f32.mxu1 %v1325_v57  ;;  %v4967_v55 = vpack.c.bf16 %v1098_v46, %v1094_v45  ;;  %v5031_v56 = vpack.c.bf16 %v1100_v50, %v1096_v49  ;;  %v1102_v57 = vld [vmem:[%s10105_s2 + $0x180] sm:$0xff]  ;;  %v4969_v60 = vpack.c.bf16 %v1107_v52, %v1103_v51  ;;  %v1139_v39 = vld [vmem:[%s10105_s2 + $0x2a8] sm:$0xff]  ;;  %v1137_v40 = vld [vmem:[%s10105_s2 + $0x298] sm:$0xff] }
 0x14a   : > { %1393 = vmatmul.mubr.f32.vlgmr.msra.gmra.mrb[4].mxu0 %v1322_v62  ;;  %1464 = vmatmul.mubr.f32.vlgmr.msra.gmra.mrb[4].mxu1 %v1322_v62  ;;  %v1104_v62 = vld [vmem:[%s10105_s2 + $0x190] sm:$0xff]  ;;  %v1141_v41 = vld [vmem:[%s10105_s2 + $0x2b8] sm:$0xff]  ;;  %v1138_v45 = vld [vmem:[%s10105_s2 + $0x2a0] sm:$0xff]  ;;  %v4985_v46 = vpack.c.bf16 %v1139_v39, %v1135_v38 }
 0x14b   : > { %4948 = vmatpush1.bf16.msra.mxu0 %v4947_v53  ;;  %5012 = vmatpush1.bf16.msra.mxu1 %v5011_v54  ;;  %v1105_v53 = vld [vmem:[%s10105_s2 + $0x198] sm:$0xff]  ;;  %v1140_v49 = vld [vmem:[%s10105_s2 + $0x2b0] sm:$0xff]  ;;  %v1143_v50 = vld [vmem:[%s10105_s2 + $0x2c8] sm:$0xff] }
 0x14c   : > { %1534 = vmatprep.mubr.f32.mxu0 %v1053_v7  ;;  %1605 = vmatprep.mubr.f32.mxu1 %v1053_v7  ;;  %v1109_v54 = vld [vmem:[%s10105_s2 + $0x1b8] sm:$0xff]  ;;  %v4971_v7 = vpack.c.bf16 %v1106_v58, %v1102_v57  ;;  %v1147_v51 = vld [vmem:[%s10105_s2 + $0x2e8] sm:$0xff]  ;;  %v1146_v57 = vld [vmem:[%s10105_s2 + $0x2e0] sm:$0xff] }
 0x14d   : > { %4950 = vmatprep.subr.bf16.mxu0 %v4949_v63  ;;  %5014 = vmatprep.subr.bf16.mxu1 %v5013_v0  ;;  %v5033_v61 = vpack.c.bf16 %v1109_v54, %v1105_v53  ;;  %v1108_v63 = vld [vmem:[%s10105_s2 + $0x1b0] sm:$0xff]  ;;  %v1111_v0 = vld [vmem:[%s10105_s2 + $0x1c8] sm:$0xff]  ;;  %v1145_v52 = vld [vmem:[%s10105_s2 + $0x2d8] sm:$0xff]  ;;  %v4989_v58 = vpack.c.bf16 %v1147_v51, %v1143_v50 }
 0x14e   : > { %v4973_v8 = vpack.c.bf16 %v1115_v1, %v1111_v0  ;;  %v1149_v53 = vld [vmem:[%s10105_s2 + $0x2f8] sm:$0xff]  ;;  %v1155_v0 = vld [vmem:[%s10105_s2 + $0x328] sm:$0xff] }
 0x14f   : > { %4952 = vmatpush1.bf16.msra.mxu0 %v4951_v4  ;;  %5016 = vmatpush1.bf16.msra.mxu1 %v5015_v5  ;;  %v5035_v4 = vpack.c.bf16 %v1108_v63, %v1104_v62  ;;  %v1110_v5 = vld [vmem:[%s10105_s2 + $0x1c0] sm:$0xff]  ;;  %v1148_v62 = vld [vmem:[%s10105_s2 + $0x2f0] sm:$0xff]  ;;  %v1151_v63 = vld [vmem:[%s10105_s2 + $0x308] sm:$0xff] }
 0x150   : > { %4954 = vmatprep.subr.bf16.mxu0 %v4953_v9  ;;  %5018 = vmatprep.subr.bf16.mxu1 %v5017_v10  ;;  %v5037_v9 = vpack.c.bf16 %v1117_v3, %v1113_v2  ;;  %v1112_v10 = vld [vmem:[%s10105_s2 + $0x1d0] sm:$0xff]  ;;  %v4975_v17 = vpack.c.bf16 %v1114_v6, %v1110_v5  ;;  %v1153_v1 = vld [vmem:[%s10105_s2 + $0x318] sm:$0xff]  ;;  %v1154_v5 = vld [vmem:[%s10105_s2 + $0x320] sm:$0xff]  ;;  %v4993_v6 = vpack.c.bf16 %v1155_v0, %v1151_v63 }
 0x151   : > { %v1157_v2 = vld [vmem:[%s10105_s2 + $0x338] sm:$0xff]  ;;  %v1179_v38 = vld [vmem:[%s10105_s2 + $0x3e8] sm:$0xff]  ;;  %v4036_v63 = vld [vmem:[%s10105_s2 + $0x830] sm:$0xff] }
 0x152   : > { %v1177_v39 = vld [vmem:[%s10105_s2 + $0x3d8] sm:$0xff]  ;;  %v4035_v50 = vld [vmem:[%s10105_s2 + $0x828] sm:$0xff] }
 0x153   : > { %4956 = vmatpush1.bf16.msra.mxu0 %v4955_v18  ;;  %5020 = vmatpush1.bf16.msra.mxu1 %v5019_v19  ;;  %v5039_v18 = vpack.c.bf16 %v1116_v11, %v1112_v10  ;;  %v1118_v19 = vld [vmem:[%s10105_s2 + $0x200] sm:$0xff]  ;;  %v1156_v10 = vld [vmem:[%s10105_s2 + $0x330] sm:$0xff]  ;;  %v1159_v11 = vld [vmem:[%s10105_s2 + $0x348] sm:$0xff] }
 0x154   : > { %4958 = vmatprep.subr.bf16.mxu0 %v4957_v22  ;;  %5022 = vmatprep.subr.bf16.mxu1 %v5021_v23  ;;  %v5041_v22 = vpack.c.bf16 %v1125_v16, %v1121_v15  ;;  %v1120_v23 = vld [vmem:[%s10105_s2 + $0x210] sm:$0xff]  ;;  %v4979_v30 = vpack.c.bf16 %v1122_v20, %v1118_v19  ;;  %v1165_v15 = vld [vmem:[%s10105_s2 + $0x378] sm:$0xff]  ;;  %v1162_v19 = vld [vmem:[%s10105_s2 + $0x360] sm:$0xff]  ;;  %v4997_v20 = vpack.c.bf16 %v1163_v12, %v1159_v11 }
 0x155   : > { %v4033_v51 = vld [vmem:[%s10105_s2 + $0x818] sm:$0xff]  ;;  %v4039_v0 = vld [vmem:[%s10105_s2 + $0x848] sm:$0xff]  ;;  %v4044_v11 = vld [vmem:[%s10105_s2 + $0x870] sm:$0xff] }
 0x156   : > { %v1052_v12 = vld [vmem:[#allocation3] sm:$0xff] }
 0x157   : > { %4960 = vmatpush1.bf16.msra.mxu0 %v4959_v31  ;;  %5024 = vmatpush1.bf16.msra.mxu1 %v5023_v32  ;;  %v5043_v31 = vpack.c.bf16 %v1124_v25, %v1120_v23  ;;  %v1126_v32 = vld [vmem:[%s10105_s2 + $0x240] sm:$0xff]  ;;  %v1164_v23 = vld [vmem:[%s10105_s2 + $0x370] sm:$0xff]  ;;  %v1167_v25 = vld [vmem:[%s10105_s2 + $0x388] sm:$0xff] }
 0x158   : > { %4962 = vmatprep.subr.bf16.mxu0 %v4961_v35  ;;  %5026 = vmatprep.subr.bf16.mxu1 %v5025_v36  ;;  %v5045_v35 = vpack.c.bf16 %v1133_v29, %v1129_v28  ;;  %v1128_v36 = vld [vmem:[%s10105_s2 + $0x250] sm:$0xff]  ;;  %v4983_v42 = vpack.c.bf16 %v1130_v33, %v1126_v32  ;;  %v1173_v28 = vld [vmem:[%s10105_s2 + $0x3b8] sm:$0xff]  ;;  %v1170_v32 = vld [vmem:[%s10105_s2 + $0x3a0] sm:$0xff]  ;;  %v5001_v33 = vpack.c.bf16 %v1171_v26, %v1167_v25 }
 0x159   : > { %v4046_v25 = vld [vmem:[%s10105_s2 + $0x880] sm:$0xff] }
 0x15a   : > { %v4050_v26 = vld [vmem:[%s10105_s2 + $0x8a0] sm:$0xff] }
 0x15b   : > { %4964 = vmatpush1.bf16.msra.mxu0 %v4963_v43  ;;  %5028 = vmatpush1.bf16.msra.mxu1 %v5027_v44  ;;  %v5047_v43 = vpack.c.bf16 %v1132_v37, %v1128_v36  ;;  %v1134_v44 = vld [vmem:[%s10105_s2 + $0x280] sm:$0xff]  ;;  %v1172_v36 = vld [vmem:[%s10105_s2 + $0x3b0] sm:$0xff]  ;;  %v1175_v37 = vld [vmem:[%s10105_s2 + $0x3c8] sm:$0xff] }
 0x15c   : > { %4966 = vmatprep.subr.bf16.mxu0 %v4965_v47  ;;  %5030 = vmatprep.subr.bf16.mxu1 %v5029_v48  ;;  %v5049_v47 = vpack.c.bf16 %v1141_v41, %v1137_v40  ;;  %v1136_v48 = vld [vmem:[%s10105_s2 + $0x290] sm:$0xff]  ;;  %v4987_v54 = vpack.c.bf16 %v1138_v45, %v1134_v44  ;;  %v1181_v40 = vld [vmem:[%s10105_s2 + $0x3f8] sm:$0xff]  ;;  %v1178_v44 = vld [vmem:[%s10105_s2 + $0x3e0] sm:$0xff]  ;;  %v5005_v45 = vpack.c.bf16 %v1179_v38, %v1175_v37 }
 0x15d   : > { %v4054_v37 = vld [vmem:[%s10105_s2 + $0x8c0] sm:$0xff] }
 0x15e   : > { %v4058_v38 = vld [vmem:[%s10105_s2 + $0x8e0] sm:$0xff] }
 0x15f   : > { %4968 = vmatpush1.bf16.msra.mxu0 %v4967_v55  ;;  %5032 = vmatpush1.bf16.msra.mxu1 %v5031_v56  ;;  %v5051_v55 = vpack.c.bf16 %v1140_v49, %v1136_v48  ;;  %v1142_v56 = vld [vmem:[%s10105_s2 + $0x2c0] sm:$0xff]  ;;  %v1180_v48 = vld [vmem:[%s10105_s2 + $0x3f0] sm:$0xff]  ;;  %v4031_v49 = vld [vmem:[%s10105_s2 + $0x808] sm:$0xff] }
 0x160   : > { %4970 = vmatprep.subr.bf16.mxu0 %v4969_v60  ;;  %5034 = vmatprep.subr.bf16.mxu1 %v5033_v61  ;;  %v5053_v60 = vpack.c.bf16 %v1149_v53, %v1145_v52  ;;  %v1144_v61 = vld [vmem:[%s10105_s2 + $0x2d0] sm:$0xff]  ;;  %v4991_v3 = vpack.c.bf16 %v1146_v57, %v1142_v56  ;;  %v4037_v52 = vld [vmem:[%s10105_s2 + $0x838] sm:$0xff]  ;;  %v5073_v57 = vpack.c.bf16 %v4035_v50, %v4031_v49  ;;  %v4062_v49 = vld [vmem:[%s10105_s2 + $0x900] sm:$0xff] }
 0x161   : > { %v1615_v56 = vld [vmem:[#allocation3 + $0x18] sm:$0x3]  ;;  %v4066_v50 = vld [vmem:[%s10105_s2 + $0x920] sm:$0xff] }
 0x163   : > { %4972 = vmatpush1.bf16.msra.mxu0 %v4971_v7  ;;  %5036 = vmatpush1.bf16.msra.mxu1 %v5035_v4  ;;  %v5055_v7 = vpack.c.bf16 %v1148_v62, %v1144_v61  ;;  %v1150_v4 = vld [vmem:[%s10105_s2 + $0x300] sm:$0xff]  ;;  %v4032_v62 = vld [vmem:[%s10105_s2 + $0x810] sm:$0xff] }
 0x164   : > { %4974 = vmatprep.subr.bf16.mxu0 %v4973_v8  ;;  %5038 = vmatprep.subr.bf16.mxu1 %v5037_v9  ;;  %v5057_v8 = vpack.c.bf16 %v1157_v2, %v1153_v1  ;;  %v1152_v9 = vld [vmem:[%s10105_s2 + $0x310] sm:$0xff]  ;;  %v4995_v16 = vpack.c.bf16 %v1154_v5, %v1150_v4  ;;  %v4034_v61 = vld [vmem:[%s10105_s2 + $0x820] sm:$0xff]  ;;  %v1754_v2 = vrot.slane %v1615_v56, 2  ;;  %v4045_v4 = vld [vmem:[%s10105_s2 + $0x878] sm:$0xff] }
 0x165   : > { %v4073_v56 = vld [vmem:[%s10105_s2 + $0x958] sm:$0xff] }
 0x167   : > { %4976 = vmatpush1.bf16.msra.mxu0 %v4975_v17  ;;  %5040 = vmatpush1.bf16.msra.mxu1 %v5039_v18  ;;  %v5059_v17 = vpack.c.bf16 %v1156_v10, %v1152_v9  ;;  %v1158_v18 = vld [vmem:[%s10105_s2 + $0x340] sm:$0xff]  ;;  %v4040_v10 = vld [vmem:[%s10105_s2 + $0x850] sm:$0xff] }
 0x168   : > { %4978 = vmatprep.subr.bf16.mxu0 %v4977_v21  ;;  %5042 = vmatprep.subr.bf16.mxu1 %v5041_v22  ;;  %v5061_v21 = vpack.c.bf16 %v1165_v15, %v1161_v13  ;;  %v1160_v22 = vld [vmem:[%s10105_s2 + $0x350] sm:$0xff]  ;;  %v4999_v29 = vpack.c.bf16 %v1162_v19, %v1158_v18  ;;  %v4042_v9 = vld [vmem:[%s10105_s2 + $0x860] sm:$0xff]  ;;  %v4049_v19 = vld [vmem:[%s10105_s2 + $0x898] sm:$0xff] }
 0x16b   : > { %4980 = vmatpush1.bf16.msra.mxu0 %v4979_v30  ;;  %5044 = vmatpush1.bf16.msra.mxu1 %v5043_v31  ;;  %v5063_v30 = vpack.c.bf16 %v1164_v23, %v1160_v22  ;;  %v1166_v31 = vld [vmem:[%s10105_s2 + $0x380] sm:$0xff]  ;;  %v5143_v22 = vpack.c.bf16 %v4044_v11, %v4040_v10 }
 0x16c   : > { %4982 = vmatprep.subr.bf16.mxu0 %v4981_v34  ;;  %5046 = vmatprep.subr.bf16.mxu1 %v5045_v35  ;;  %v5065_v34 = vpack.c.bf16 %v1173_v28, %v1169_v27  ;;  %v1168_v35 = vld [vmem:[%s10105_s2 + $0x390] sm:$0xff]  ;;  %v5003_v41 = vpack.c.bf16 %v1170_v32, %v1166_v31  ;;  %v4059_v31 = vld [vmem:[%s10105_s2 + $0x8e8] sm:$0xff]  ;;  %v4057_v32 = vld [vmem:[%s10105_s2 + $0x8d8] sm:$0xff] }
 0x16d   : > { %v4048_v27 = vld [vmem:[%s10105_s2 + $0x890] sm:$0xff]  ;;  %v4078_v10 = vld [vmem:[%s10105_s2 + $0x980] sm:$0xff] }
 0x16e   : > { %v4082_v11 = vld [vmem:[%s10105_s2 + $0x9a0] sm:$0xff] }
 0x16f   : > { %4984 = vmatpush1.bf16.msra.mxu0 %v4983_v42  ;;  %5048 = vmatpush1.bf16.msra.mxu1 %v5047_v43  ;;  %v5067_v42 = vpack.c.bf16 %v1172_v36, %v1168_v35  ;;  %v1174_v43 = vld [vmem:[%s10105_s2 + $0x3c0] sm:$0xff] }
 0x170   : > { %4986 = vmatprep.subr.bf16.mxu0 %v4985_v46  ;;  %5050 = vmatprep.subr.bf16.mxu1 %v5049_v47  ;;  %v5069_v46 = vpack.c.bf16 %v1181_v40, %v1177_v39  ;;  %v1176_v47 = vld [vmem:[%s10105_s2 + $0x3d0] sm:$0xff]  ;;  %v5007_v53 = vpack.c.bf16 %v1178_v44, %v1174_v43  ;;  %v4067_v43 = vld [vmem:[%s10105_s2 + $0x928] sm:$0xff]  ;;  %v4065_v44 = vld [vmem:[%s10105_s2 + $0x918] sm:$0xff] }
 0x171   : > { %v4056_v39 = vld [vmem:[%s10105_s2 + $0x8d0] sm:$0xff] }
 0x173   : > { %4988 = vmatpush1.bf16.msra.mxu0 %v4987_v54  ;;  %5052 = vmatpush1.bf16.msra.mxu1 %v5051_v55  ;;  %v5071_v54 = vpack.c.bf16 %v1180_v48, %v1176_v47  ;;  %v1613_v55 = vld [vmem:[#allocation3 + $0x8] sm:$0xfc] }
 0x174   : > { %4990 = vmatprep.subr.bf16.mxu0 %v4989_v58  ;;  %5054 = vmatprep.subr.bf16.mxu1 %v5053_v60  ;;  %v5137_v58 = vpack.c.bf16 %v4037_v52, %v4033_v51  ;;  %v4030_v60 = vld [vmem:[%s10105_s2 + $0x800] sm:$0xff]  ;;  %v1753_v1 = vrot.slane %v1613_v55, 2  ;;  %v4064_v51 = vld [vmem:[%s10105_s2 + $0x910] sm:$0xff]  ;;  %v4075_v55 = vld [vmem:[%s10105_s2 + $0x968] sm:$0xff] }
 0x175   : > { %v5075_v5 = vpack.c.bf16 %v4034_v61, %v4030_v60 }
 0x176   : > { %v1755_v18 = vsel %vm1749_vm12, %v1753_v1, %v1754_v2  ;;  %v4076_v2 = vld [vmem:[%s10105_s2 + $0x970] sm:$0xff] }
 0x177   : > { %4992 = vmatpush1.bf16.msra.mxu0 %v4991_v3  ;;  %5056 = vmatpush1.bf16.msra.mxu1 %v5055_v7  ;;  %v4043_v3 = vld [vmem:[%s10105_s2 + $0x868] sm:$0xff]  ;;  %v4041_v7 = vld [vmem:[%s10105_s2 + $0x858] sm:$0xff] }
 0x178   : > { %4994 = vmatprep.subr.bf16.mxu0 %v4993_v6  ;;  %5058 = vmatprep.subr.bf16.mxu1 %v5057_v8  ;;  %v4038_v6 = vld [vmem:[%s10105_s2 + $0x840] sm:$0xff]  ;;  %v5139_v8 = vpack.c.bf16 %v4036_v63, %v4032_v62  ;;  %v5077_v13 = vpack.c.bf16 %v4043_v3, %v4039_v0  ;;  %v5141_v15 = vpack.c.bf16 %v4045_v4, %v4041_v7  ;;  %v4072_v0 = vld [vmem:[%s10105_s2 + $0x950] sm:$0xff]  ;;  %v4079_v3 = vld [vmem:[%s10105_s2 + $0x988] sm:$0xff] }
 0x179   : > { %v4070_v62 = vld [vmem:[%s10105_s2 + $0x940] sm:$0xff]  ;;  %v4083_v7 = vld [vmem:[%s10105_s2 + $0x9a8] sm:$0xff]  ;;  %v4081_v4 = vld [vmem:[%s10105_s2 + $0x998] sm:$0xff] }
 0x17a   : > { %v4074_v63 = vld [vmem:[%s10105_s2 + $0x960] sm:$0xff] }
 0x17b   : > { %4996 = vmatpush1.bf16.msra.mxu0 %v4995_v16  ;;  %5060 = vmatpush1.bf16.msra.mxu1 %v5059_v17  ;;  %v4047_v16 = vld [vmem:[%s10105_s2 + $0x888] sm:$0xff] }
 0x17c   : > { %4998 = vmatprep.subr.bf16.mxu0 %v4997_v20  ;;  %5062 = vmatprep.subr.bf16.mxu1 %v5061_v21  ;;  %v4051_v17 = vld [vmem:[%s10105_s2 + $0x8a8] sm:$0xff]  ;;  %v4053_v20 = vld [vmem:[%s10105_s2 + $0x8b8] sm:$0xff]  ;;  %v5079_v21 = vpack.c.bf16 %v4042_v9, %v4038_v6  ;;  %v5095_v6 = vpack.c.bf16 %v4074_v63, %v4070_v62  ;;  %v5097_v9 = vpack.c.bf16 %v4083_v7, %v4079_v3  ;;  %v4114_v62 = vld [vmem:[%s10105_s2 + $0xaa0] sm:$0xff] }
 0x17d   : > { %v5081_v23 = vpack.c.bf16 %v4051_v17, %v4047_v16  ;;  %v5145_v28 = vpack.c.bf16 %v4053_v20, %v4049_v19  ;;  %v4087_v16 = vld [vmem:[%s10105_s2 + $0x9c8] sm:$0xff]  ;;  %v4093_v19 = vld [vmem:[%s10105_s2 + $0x9f8] sm:$0xff]  ;;  %v5099_v20 = vpack.c.bf16 %v4082_v11, %v4078_v10  ;;  %v4112_v63 = vld [vmem:[%s10105_s2 + $0xa90] sm:$0xff] }
 0x17e   : > { %v4091_v17 = vld [vmem:[%s10105_s2 + $0x9e8] sm:$0xff]  ;;  %v4121_v7 = vld [vmem:[%s10105_s2 + $0xad8] sm:$0xff]  ;;  %v4122_v10 = vld [vmem:[%s10105_s2 + $0xae0] sm:$0xff] }
 0x17f   : > { %5000 = vmatpush1.bf16.msra.mxu0 %v4999_v29  ;;  %5064 = vmatpush1.bf16.msra.mxu1 %v5063_v30  ;;  %v4052_v29 = vld [vmem:[%s10105_s2 + $0x8b0] sm:$0xff]  ;;  %v4055_v30 = vld [vmem:[%s10105_s2 + $0x8c8] sm:$0xff] }
 0x180   : > { %5002 = vmatprep.subr.bf16.mxu0 %v5001_v33  ;;  %5066 = vmatprep.subr.bf16.mxu1 %v5065_v34  ;;  %v4061_v33 = vld [vmem:[%s10105_s2 + $0x8f8] sm:$0xff]  ;;  %v5083_v34 = vpack.c.bf16 %v4050_v26, %v4046_v25  ;;  %v5147_v35 = vpack.c.bf16 %v4052_v29, %v4048_v27  ;;  %v5085_v36 = vpack.c.bf16 %v4059_v31, %v4055_v30  ;;  %v4090_v25 = vld [vmem:[%s10105_s2 + $0x9e0] sm:$0xff]  ;;  %v4088_v26 = vld [vmem:[%s10105_s2 + $0x9d0] sm:$0xff] }
 0x181   : > { %v5149_v40 = vpack.c.bf16 %v4061_v33, %v4057_v32  ;;  %v4095_v29 = vld [vmem:[%s10105_s2 + $0xa08] sm:$0xff]  ;;  %v4097_v31 = vld [vmem:[%s10105_s2 + $0xa18] sm:$0xff]  ;;  %v4120_v11 = vld [vmem:[%s10105_s2 + $0xad0] sm:$0xff] }
 0x182   : > { %v4099_v30 = vld [vmem:[%s10105_s2 + $0xa28] sm:$0xff]  ;;  %v4101_v32 = vld [vmem:[%s10105_s2 + $0xa38] sm:$0xff] }
 0x183   : > { %5004 = vmatpush1.bf16.msra.mxu0 %v5003_v41  ;;  %5068 = vmatpush1.bf16.msra.mxu1 %v5067_v42  ;;  %v4060_v41 = vld [vmem:[%s10105_s2 + $0x8f0] sm:$0xff]  ;;  %v4063_v42 = vld [vmem:[%s10105_s2 + $0x908] sm:$0xff] }
 0x184   : > { %5006 = vmatprep.subr.bf16.mxu0 %v5005_v45  ;;  %5070 = vmatprep.subr.bf16.mxu1 %v5069_v46  ;;  %v4069_v45 = vld [vmem:[%s10105_s2 + $0x938] sm:$0xff]  ;;  %v5087_v46 = vpack.c.bf16 %v4058_v38, %v4054_v37  ;;  %v5151_v47 = vpack.c.bf16 %v4060_v41, %v4056_v39  ;;  %v5089_v48 = vpack.c.bf16 %v4067_v43, %v4063_v42  ;;  %v4098_v37 = vld [vmem:[%s10105_s2 + $0xa20] sm:$0xff]  ;;  %v4096_v38 = vld [vmem:[%s10105_s2 + $0xa10] sm:$0xff] }
 0x185   : > { %v5153_v52 = vpack.c.bf16 %v4069_v45, %v4065_v44  ;;  %v5169_v39 = vpack.c.bf16 %v4101_v32, %v4097_v31  ;;  %v4103_v41 = vld [vmem:[%s10105_s2 + $0xa48] sm:$0xff]  ;;  %v4105_v43 = vld [vmem:[%s10105_s2 + $0xa58] sm:$0xff] }
 0x186   : > { %v4107_v42 = vld [vmem:[%s10105_s2 + $0xa68] sm:$0xff]  ;;  %v4109_v44 = vld [vmem:[%s10105_s2 + $0xa78] sm:$0xff] }
 0x187   : > { %5008 = vmatpush1.bf16.msra.mxu0 %v5007_v53  ;;  %5072 = vmatpush1.bf16.msra.mxu1 %v5071_v54  ;;  %v4068_v53 = vld [vmem:[%s10105_s2 + $0x930] sm:$0xff]  ;;  %v4071_v54 = vld [vmem:[%s10105_s2 + $0x948] sm:$0xff]  ;;  %v4141_v31 = vld [vmem:[%s10105_s2 + $0xb78] sm:$0xff] }
 0x188   : > { %5074 = vmatprep.subr.bf16.mxu0 %v5073_v57  ;;  %5138 = vmatprep.subr.bf16.mxu1 %v5137_v58  ;;  %v4077_v57 = vld [vmem:[%s10105_s2 + $0x978] sm:$0xff]  ;;  %v5091_v58 = vpack.c.bf16 %v4066_v50, %v4062_v49  ;;  %v5155_v60 = vpack.c.bf16 %v4068_v53, %v4064_v51  ;;  %v5093_v61 = vpack.c.bf16 %v4075_v55, %v4071_v54  ;;  %v4106_v49 = vld [vmem:[%s10105_s2 + $0xa60] sm:$0xff]  ;;  %v4104_v50 = vld [vmem:[%s10105_s2 + $0xa50] sm:$0xff] }
 0x189   : > { %v5157_v1 = vpack.c.bf16 %v4077_v57, %v4073_v56  ;;  %v5173_v51 = vpack.c.bf16 %v4109_v44, %v4105_v43  ;;  %v4111_v53 = vld [vmem:[%s10105_s2 + $0xa88] sm:$0xff]  ;;  %v4113_v55 = vld [vmem:[%s10105_s2 + $0xa98] sm:$0xff] }
 0x18a   : > { %1535 = vmatmul.mubr.f32.vlgmr.msra.gmra.mrb[4].mxu0 %v1052_v12  ;;  %1606 = vmatmul.mubr.f32.vlgmr.msra.gmra.mrb[4].mxu1 %v1052_v12  ;;  %v4080_v12 = vld [vmem:[%s10105_s2 + $0x990] sm:$0xff]  ;;  %v4115_v54 = vld [vmem:[%s10105_s2 + $0xaa8] sm:$0xff]  ;;  %v4117_v56 = vld [vmem:[%s10105_s2 + $0xab8] sm:$0xff] }
 0x18b   : > { %5076 = vmatpush1.bf16.msra.mxu0 %v5075_v5  ;;  %1822 = vmatprep.mubr.f32.mxu0 %v1755_v18  ;;  %v4085_v5 = vld [vmem:[%s10105_s2 + $0x9b8] sm:$0xff]  ;;  %v4123_v3 = vld [vmem:[%s10105_s2 + $0xae8] sm:$0xff] }
 0x18c   : > { %5140 = vmatpush1.bf16.msra.mxu1 %v5139_v8  ;;  %1893 = vmatprep.mubr.f32.mxu1 %v1755_v18  ;;  %v5159_v8 = vpack.c.bf16 %v4076_v2, %v4072_v0  ;;  %v4089_v18 = vld [vmem:[%s10105_s2 + $0x9d8] sm:$0xff]  ;;  %v5177_v0 = vpack.c.bf16 %v4117_v56, %v4113_v55  ;;  %v4119_v2 = vld [vmem:[%s10105_s2 + $0xac8] sm:$0xff] }
 0x18d   : > { %5078 = vmatprep.subr.bf16.mxu0 %v5077_v13  ;;  %5142 = vmatprep.subr.bf16.mxu1 %v5141_v15  ;;  %v5161_v13 = vpack.c.bf16 %v4085_v5, %v4081_v4  ;;  %v4084_v15 = vld [vmem:[%s10105_s2 + $0x9b0] sm:$0xff]  ;;  %v5165_v27 = vpack.c.bf16 %v4093_v19, %v4089_v18  ;;  %v4125_v4 = vld [vmem:[%s10105_s2 + $0xaf8] sm:$0xff] }
 0x18e   : > { %v4133_v18 = vld [vmem:[%s10105_s2 + $0xb38] sm:$0xff] }
 0x18f   : > { %5080 = vmatpush1.bf16.msra.mxu0 %v5079_v21  ;;  %v5163_v21 = vpack.c.bf16 %v4084_v15, %v4080_v12  ;;  %v5181_v12 = vpack.c.bf16 %v4125_v4, %v4121_v7  ;;  %v4127_v15 = vld [vmem:[%s10105_s2 + $0xb08] sm:$0xff]  ;;  %v4149_v43 = vld [vmem:[%s10105_s2 + $0xbb8] sm:$0xff] }
 0x190   : > { %5144 = vmatpush1.bf16.msra.mxu1 %v5143_v22  ;;  %5082 = vmatprep.subr.bf16.mxu0 %v5081_v23  ;;  %v5101_v22 = vpack.c.bf16 %v4091_v17, %v4087_v16  ;;  %v4086_v23 = vld [vmem:[%s10105_s2 + $0x9c0] sm:$0xff]  ;;  %v4131_v16 = vld [vmem:[%s10105_s2 + $0xb28] sm:$0xff]  ;;  %v4129_v17 = vld [vmem:[%s10105_s2 + $0xb18] sm:$0xff] }
 0x191   : > { %5146 = vmatprep.subr.bf16.mxu1 %v5145_v28  ;;  %v4092_v28 = vld [vmem:[%s10105_s2 + $0x9f0] sm:$0xff]  ;;  %v5103_v33 = vpack.c.bf16 %v4090_v25, %v4086_v23  ;;  %v4130_v23 = vld [vmem:[%s10105_s2 + $0xb20] sm:$0xff]  ;;  %v4157_v55 = vld [vmem:[%s10105_s2 + $0xbf8] sm:$0xff] }
 0x192   : > { %v4128_v25 = vld [vmem:[%s10105_s2 + $0xb10] sm:$0xff]  ;;  %v1614_v7 = vld [vmem:[#allocation3 + $0x10] sm:$0x3]  ;;  %v4161_v4 = vld [vmem:[%s10106_s3 + $0x418] sm:$0xff] }
 0x193   : > { %5084 = vmatpush1.bf16.msra.mxu0 %v5083_v34  ;;  %v5167_v34 = vpack.c.bf16 %v4092_v28, %v4088_v26  ;;  %v5185_v26 = vpack.c.bf16 %v4133_v18, %v4129_v17  ;;  %v4135_v28 = vld [vmem:[%s10105_s2 + $0xb48] sm:$0xff]  ;;  %v4164_v17 = vld [vmem:[%s10106_s3 + $0x430] sm:$0xff] }
 0x194   : > { %5148 = vmatpush1.bf16.msra.mxu1 %v5147_v35  ;;  %5086 = vmatprep.subr.bf16.mxu0 %v5085_v36  ;;  %v5105_v35 = vpack.c.bf16 %v4099_v30, %v4095_v29  ;;  %v4094_v36 = vld [vmem:[%s10105_s2 + $0xa00] sm:$0xff]  ;;  %v4139_v29 = vld [vmem:[%s10105_s2 + $0xb68] sm:$0xff]  ;;  %v4137_v30 = vld [vmem:[%s10105_s2 + $0xb58] sm:$0xff] }
 0x195   : > { %5150 = vmatprep.subr.bf16.mxu1 %v5149_v40  ;;  %v4100_v40 = vld [vmem:[%s10105_s2 + $0xa30] sm:$0xff]  ;;  %v5107_v45 = vpack.c.bf16 %v4098_v37, %v4094_v36  ;;  %v4138_v36 = vld [vmem:[%s10105_s2 + $0xb60] sm:$0xff]  ;;  %v4167_v18 = vld [vmem:[%s10106_s3 + $0x448] sm:$0xff] }
 0x196   : > { %v4136_v37 = vld [vmem:[%s10105_s2 + $0xb50] sm:$0xff] }
 0x197   : > { %5088 = vmatpush1.bf16.msra.mxu0 %v5087_v46  ;;  %v5171_v46 = vpack.c.bf16 %v4100_v40, %v4096_v38  ;;  %v5189_v38 = vpack.c.bf16 %v4141_v31, %v4137_v30  ;;  %v4143_v40 = vld [vmem:[%s10105_s2 + $0xb88] sm:$0xff]  ;;  %v4172_v31 = vld [vmem:[%s10106_s3 + $0x470] sm:$0xff] }
 0x198   : > { %5152 = vmatpush1.bf16.msra.mxu1 %v5151_v47  ;;  %5090 = vmatprep.subr.bf16.mxu0 %v5089_v48  ;;  %v5109_v47 = vpack.c.bf16 %v4107_v42, %v4103_v41  ;;  %v4102_v48 = vld [vmem:[%s10105_s2 + $0xa40] sm:$0xff]  ;;  %v4147_v41 = vld [vmem:[%s10105_s2 + $0xba8] sm:$0xff]  ;;  %v4145_v42 = vld [vmem:[%s10105_s2 + $0xb98] sm:$0xff] }
 0x199   : > { %5154 = vmatprep.subr.bf16.mxu1 %v5153_v52  ;;  %v4108_v52 = vld [vmem:[%s10105_s2 + $0xa70] sm:$0xff]  ;;  %v5111_v57 = vpack.c.bf16 %v4106_v49, %v4102_v48  ;;  %v4146_v48 = vld [vmem:[%s10105_s2 + $0xba0] sm:$0xff] }
 0x19a   : > { %v4144_v49 = vld [vmem:[%s10105_s2 + $0xb90] sm:$0xff] }
 0x19b   : > { %5092 = vmatpush1.bf16.msra.mxu0 %v5091_v58  ;;  %v5175_v58 = vpack.c.bf16 %v4108_v52, %v4104_v50  ;;  %v5193_v50 = vpack.c.bf16 %v4149_v43, %v4145_v42  ;;  %v4151_v52 = vld [vmem:[%s10105_s2 + $0xbc8] sm:$0xff]  ;;  %v4180_v43 = vld [vmem:[%s10106_s3 + $0x4b0] sm:$0xff] }
 0x19c   : > { %5156 = vmatpush1.bf16.msra.mxu1 %v5155_v60  ;;  %5094 = vmatprep.subr.bf16.mxu0 %v5093_v61  ;;  %v5113_v60 = vpack.c.bf16 %v4115_v54, %v4111_v53  ;;  %v4110_v61 = vld [vmem:[%s10105_s2 + $0xa80] sm:$0xff]  ;;  %v4155_v53 = vld [vmem:[%s10105_s2 + $0xbe8] sm:$0xff]  ;;  %v4153_v54 = vld [vmem:[%s10105_s2 + $0xbd8] sm:$0xff] }
 0x19d   : > { %5158 = vmatprep.subr.bf16.mxu1 %v5157_v1  ;;  %v4116_v1 = vld [vmem:[%s10105_s2 + $0xab0] sm:$0xff]  ;;  %v5115_v5 = vpack.c.bf16 %v4114_v62, %v4110_v61  ;;  %v4154_v61 = vld [vmem:[%s10105_s2 + $0xbe0] sm:$0xff] }
 0x19e   : > { %v4152_v62 = vld [vmem:[%s10105_s2 + $0xbd0] sm:$0xff] }
 0x19f   : > { %5096 = vmatpush1.bf16.msra.mxu0 %v5095_v6  ;;  %v5179_v6 = vpack.c.bf16 %v4116_v1, %v4112_v63  ;;  %v4156_v63 = vld [vmem:[%s10105_s2 + $0xbf0] sm:$0xff]  ;;  %v1612_v1 = vld [vmem:[#allocation3] sm:$0xfc] }
 0x1a0   : > { %5160 = vmatpush1.bf16.msra.mxu1 %v5159_v8  ;;  %5098 = vmatprep.subr.bf16.mxu0 %v5097_v9  ;;  %v5117_v8 = vpack.c.bf16 %v4123_v3, %v4119_v2  ;;  %v4118_v9 = vld [vmem:[%s10105_s2 + $0xac0] sm:$0xff]  ;;  %v4159_v2 = vld [vmem:[%s10106_s3 + $0x408] sm:$0xff] }
 0x1a1   : > { %5162 = vmatprep.subr.bf16.mxu1 %v5161_v13  ;;  %v4124_v13 = vld [vmem:[%s10105_s2 + $0xaf0] sm:$0xff]  ;;  %v5119_v19 = vpack.c.bf16 %v4122_v10, %v4118_v9  ;;  %v4163_v3 = vld [vmem:[%s10106_s3 + $0x428] sm:$0xff]  ;;  %v4158_v10 = vld [vmem:[%s10106_s3 + $0x400] sm:$0xff] }
 0x1a2   : > { %v5201_v9 = vpack.c.bf16 %v4163_v3, %v4159_v2  ;;  %v4192_v2 = vld [vmem:[%s10106_s3 + $0x510] sm:$0xff] }
 0x1a3   : > { %5100 = vmatpush1.bf16.msra.mxu0 %v5099_v20  ;;  %v5183_v20 = vpack.c.bf16 %v4124_v13, %v4120_v11  ;;  %v4162_v11 = vld [vmem:[%s10106_s3 + $0x420] sm:$0xff]  ;;  %v1750_v13 = vrot.slane %v1612_v1, 2 }
 0x1a4   : > { %5164 = vmatpush1.bf16.msra.mxu1 %v5163_v21  ;;  %5102 = vmatprep.subr.bf16.mxu0 %v5101_v22  ;;  %v5121_v21 = vpack.c.bf16 %v4131_v16, %v4127_v15  ;;  %v4126_v22 = vld [vmem:[%s10105_s2 + $0xb00] sm:$0xff]  ;;  %v1751_v15 = vrot.slane %v1614_v7, 2  ;;  %v4196_v7 = vld [vmem:[%s10106_s3 + $0x530] sm:$0xff] }
 0x1a5   : > { %5166 = vmatprep.subr.bf16.mxu1 %v5165_v27  ;;  %v4132_v27 = vld [vmem:[%s10105_s2 + $0xb30] sm:$0xff]  ;;  %v5123_v32 = vpack.c.bf16 %v4130_v23, %v4126_v22  ;;  %v5203_v22 = vpack.c.bf16 %v4162_v11, %v4158_v10  ;;  %v4194_v1 = vld [vmem:[%s10106_s3 + $0x520] sm:$0xff]  ;;  %v5283_v10 = vpack.c.bf16 %v4196_v7, %v4192_v2 }
 0x1a6   : > { %v4236_v7 = vld [vmem:[%s10106_s3 + $0x670] sm:$0xff] }
 0x1a7   : > { %5104 = vmatpush1.bf16.msra.mxu0 %v5103_v33  ;;  %v5187_v33 = vpack.c.bf16 %v4132_v27, %v4128_v25  ;;  %v4170_v27 = vld [vmem:[%s10106_s3 + $0x460] sm:$0xff] }
 0x1a8   : > { %5168 = vmatpush1.bf16.msra.mxu1 %v5167_v34  ;;  %5106 = vmatprep.subr.bf16.mxu0 %v5105_v35  ;;  %v5125_v34 = vpack.c.bf16 %v4139_v29, %v4135_v28  ;;  %v4134_v35 = vld [vmem:[%s10105_s2 + $0xb40] sm:$0xff]  ;;  %v4168_v28 = vld [vmem:[%s10106_s3 + $0x450] sm:$0xff]  ;;  %v1752_v29 = vsel %vm1749_vm12, %v1750_v13, %v1751_v15 }
 0x1a9   : > { %5170 = vmatprep.subr.bf16.mxu1 %v5169_v39  ;;  %v4140_v39 = vld [vmem:[%s10105_s2 + $0xb70] sm:$0xff]  ;;  %v5127_v44 = vpack.c.bf16 %v4138_v36, %v4134_v35  ;;  %v4181_v35 = vld [vmem:[%s10106_s3 + $0x4b8] sm:$0xff]  ;;  %v4202_v13 = vld [vmem:[%s10106_s3 + $0x560] sm:$0xff] }
 0x1aa   : > { %v4200_v15 = vld [vmem:[%s10106_s3 + $0x550] sm:$0xff] }
 0x1ab   : > { %5108 = vmatpush1.bf16.msra.mxu0 %v5107_v45  ;;  %v5191_v45 = vpack.c.bf16 %v4140_v39, %v4136_v37  ;;  %v5271_v37 = vpack.c.bf16 %v4172_v31, %v4168_v28  ;;  %v4174_v39 = vld [vmem:[%s10106_s3 + $0x480] sm:$0xff]  ;;  %v4208_v28 = vld [vmem:[%s10106_s3 + $0x590] sm:$0xff]  ;;  %v4215_v31 = vld [vmem:[%s10106_s3 + $0x5c8] sm:$0xff] }
 0x1ac   : > { %5172 = vmatpush1.bf16.msra.mxu1 %v5171_v46  ;;  %5110 = vmatprep.subr.bf16.mxu0 %v5109_v47  ;;  %v5129_v46 = vpack.c.bf16 %v4147_v41, %v4143_v40  ;;  %v4142_v47 = vld [vmem:[%s10105_s2 + $0xb80] sm:$0xff]  ;;  %v4176_v41 = vld [vmem:[%s10106_s3 + $0x490] sm:$0xff] }
 0x1ad   : > { %5174 = vmatprep.subr.bf16.mxu1 %v5173_v51  ;;  %v4148_v51 = vld [vmem:[%s10105_s2 + $0xbb0] sm:$0xff]  ;;  %v5131_v56 = vpack.c.bf16 %v4146_v48, %v4142_v47  ;;  %v4178_v40 = vld [vmem:[%s10106_s3 + $0x4a0] sm:$0xff]  ;;  %v4189_v47 = vld [vmem:[%s10106_s3 + $0x4f8] sm:$0xff] }
 0x1ae   : > { %v5211_v48 = vpack.c.bf16 %v4178_v40, %v4174_v39  ;;  %v4218_v39 = vld [vmem:[%s10106_s3 + $0x5e0] sm:$0xff]  ;;  %v4216_v40 = vld [vmem:[%s10106_s3 + $0x5d0] sm:$0xff] }
 0x1af   : > { %5112 = vmatpush1.bf16.msra.mxu0 %v5111_v57  ;;  %v4150_v57 = vld [vmem:[%s10105_s2 + $0xbc0] sm:$0xff] }
 0x1b0   : > { %5176 = vmatpush1.bf16.msra.mxu1 %v5175_v58  ;;  %5114 = vmatprep.subr.bf16.mxu0 %v5113_v60  ;;  %v5195_v58 = vpack.c.bf16 %v4148_v51, %v4144_v49  ;;  %v5133_v60 = vpack.c.bf16 %v4155_v53, %v4151_v52  ;;  %v5275_v49 = vpack.c.bf16 %v4180_v43, %v4176_v41  ;;  %v4182_v51 = vld [vmem:[%s10106_s3 + $0x4c0] sm:$0xff]  ;;  %v4184_v53 = vld [vmem:[%s10106_s3 + $0x4d0] sm:$0xff]  ;;  %v4223_v43 = vld [vmem:[%s10106_s3 + $0x608] sm:$0xff] }
 0x1b1   : > { %5178 = vmatprep.subr.bf16.mxu1 %v5177_v0  ;;  %v5197_v0 = vpack.c.bf16 %v4157_v55, %v4153_v54  ;;  %v4186_v52 = vld [vmem:[%s10106_s3 + $0x4e0] sm:$0xff]  ;;  %v4188_v55 = vld [vmem:[%s10106_s3 + $0x4f0] sm:$0xff] }
 0x1b3   : > { %5116 = vmatpush1.bf16.msra.mxu0 %v5115_v5  ;;  %v4165_v5 = vld [vmem:[%s10106_s3 + $0x438] sm:$0xff] }
 0x1b4   : > { %5180 = vmatpush1.bf16.msra.mxu1 %v5179_v6  ;;  %5118 = vmatprep.subr.bf16.mxu0 %v5117_v8  ;;  %v5135_v6 = vpack.c.bf16 %v4154_v61, %v4150_v57  ;;  %v5199_v8 = vpack.c.bf16 %v4156_v63, %v4152_v62  ;;  %v5265_v16 = vpack.c.bf16 %v4165_v5, %v4161_v4  ;;  %v4195_v57 = vld [vmem:[%s10106_s3 + $0x528] sm:$0xff] }
 0x1b5   : > { %5182 = vmatprep.subr.bf16.mxu1 %v5181_v12  ;;  %v4160_v12 = vld [vmem:[%s10106_s3 + $0x410] sm:$0xff]  ;;  %v5215_v61 = vpack.c.bf16 %v4186_v52, %v4182_v51  ;;  %v5279_v62 = vpack.c.bf16 %v4188_v55, %v4184_v53  ;;  %v4199_v4 = vld [vmem:[%s10106_s3 + $0x548] sm:$0xff]  ;;  %v4226_v51 = vld [vmem:[%s10106_s3 + $0x620] sm:$0xff] }
 0x1b6   : > { %v5267_v23 = vpack.c.bf16 %v4164_v17, %v4160_v12  ;;  %v4203_v5 = vld [vmem:[%s10106_s3 + $0x568] sm:$0xff]  ;;  %v4198_v12 = vld [vmem:[%s10106_s3 + $0x540] sm:$0xff]  ;;  %v4204_v17 = vld [vmem:[%s10106_s3 + $0x570] sm:$0xff] }
 0x1b7   : > { %5120 = vmatpush1.bf16.msra.mxu0 %v5119_v19  ;;  %v4171_v19 = vld [vmem:[%s10106_s3 + $0x468] sm:$0xff]  ;;  %v5221_v11 = vpack.c.bf16 %v4203_v5, %v4199_v4  ;;  %v4224_v53 = vld [vmem:[%s10106_s3 + $0x610] sm:$0xff] }
 0x1b8   : > { %5184 = vmatpush1.bf16.msra.mxu1 %v5183_v20  ;;  %5122 = vmatprep.subr.bf16.mxu0 %v5121_v21  ;;  %v4169_v20 = vld [vmem:[%s10106_s3 + $0x458] sm:$0xff]  ;;  %v5205_v25 = vpack.c.bf16 %v4171_v19, %v4167_v18  ;;  %v4207_v18 = vld [vmem:[%s10106_s3 + $0x588] sm:$0xff] }
 0x1b9   : > { %5186 = vmatprep.subr.bf16.mxu1 %v5185_v26  ;;  %v4173_v21 = vld [vmem:[%s10106_s3 + $0x478] sm:$0xff]  ;;  %v4166_v26 = vld [vmem:[%s10106_s3 + $0x440] sm:$0xff]  ;;  %v4211_v19 = vld [vmem:[%s10106_s3 + $0x5a8] sm:$0xff] }
 0x1ba   : > { %v5269_v30 = vpack.c.bf16 %v4173_v21, %v4169_v20  ;;  %v5207_v36 = vpack.c.bf16 %v4170_v27, %v4166_v26  ;;  %v4209_v20 = vld [vmem:[%s10106_s3 + $0x598] sm:$0xff]  ;;  %v4206_v26 = vld [vmem:[%s10106_s3 + $0x580] sm:$0xff]  ;;  %v4239_v5 = vld [vmem:[%s10106_s3 + $0x688] sm:$0xff] }
 0x1bb   : > { %5124 = vmatpush1.bf16.msra.mxu0 %v5123_v32  ;;  %v4175_v32 = vld [vmem:[%s10106_s3 + $0x488] sm:$0xff]  ;;  %v4213_v21 = vld [vmem:[%s10106_s3 + $0x5b8] sm:$0xff]  ;;  %v4210_v27 = vld [vmem:[%s10106_s3 + $0x5a0] sm:$0xff] }
 0x1bc   : > { %5188 = vmatpush1.bf16.msra.mxu1 %v5187_v33  ;;  %5126 = vmatprep.subr.bf16.mxu0 %v5125_v34  ;;  %v4179_v33 = vld [vmem:[%s10106_s3 + $0x4a8] sm:$0xff]  ;;  %v4177_v34 = vld [vmem:[%s10106_s3 + $0x498] sm:$0xff] }
 0x1bd   : > { %5190 = vmatprep.subr.bf16.mxu1 %v5189_v38  ;;  %v5209_v38 = vpack.c.bf16 %v4179_v33, %v4175_v32  ;;  %v5273_v42 = vpack.c.bf16 %v4181_v35, %v4177_v34  ;;  %v4219_v32 = vld [vmem:[%s10106_s3 + $0x5e8] sm:$0xff]  ;;  %v4217_v33 = vld [vmem:[%s10106_s3 + $0x5d8] sm:$0xff]  ;;  %v5227_v35 = vpack.c.bf16 %v4210_v27, %v4206_v26  ;;  %v4250_v26 = vld [vmem:[%s10106_s3 + $0x6e0] sm:$0xff] }
 0x1be   : > { %v4221_v34 = vld [vmem:[%s10106_s3 + $0x5f8] sm:$0xff] }
 0x1bf   : > { %5128 = vmatpush1.bf16.msra.mxu0 %v5127_v44  ;;  %v4183_v44 = vld [vmem:[%s10106_s3 + $0x4c8] sm:$0xff]  ;;  %v5293_v41 = vpack.c.bf16 %v4221_v34, %v4217_v33  ;;  %v4257_v34 = vld [vmem:[%s10106_s3 + $0x718] sm:$0xff] }
 0x1c0   : > { %5192 = vmatpush1.bf16.msra.mxu1 %v5191_v45  ;;  %5130 = vmatprep.subr.bf16.mxu0 %v5129_v46  ;;  %v4187_v45 = vld [vmem:[%s10106_s3 + $0x4e8] sm:$0xff]  ;;  %v4185_v46 = vld [vmem:[%s10106_s3 + $0x4d8] sm:$0xff] }
 0x1c1   : > { %5194 = vmatprep.subr.bf16.mxu1 %v5193_v50  ;;  %v5213_v50 = vpack.c.bf16 %v4187_v45, %v4183_v44  ;;  %v5277_v54 = vpack.c.bf16 %v4189_v47, %v4185_v46  ;;  %v4227_v44 = vld [vmem:[%s10106_s3 + $0x628] sm:$0xff]  ;;  %v4225_v45 = vld [vmem:[%s10106_s3 + $0x618] sm:$0xff] }
 0x1c2   : > { %v4229_v46 = vld [vmem:[%s10106_s3 + $0x638] sm:$0xff]  ;;  %v4259_v33 = vld [vmem:[%s10106_s3 + $0x728] sm:$0xff] }
 0x1c3   : > { %5132 = vmatpush1.bf16.msra.mxu0 %v5131_v56  ;;  %v4191_v56 = vld [vmem:[%s10106_s3 + $0x508] sm:$0xff]  ;;  %v5297_v52 = vpack.c.bf16 %v4229_v46, %v4225_v45  ;;  %v4265_v46 = vld [vmem:[%s10106_s3 + $0x758] sm:$0xff] }
 0x1c4   : > { %5196 = vmatpush1.bf16.msra.mxu1 %v5195_v58  ;;  %5134 = vmatprep.subr.bf16.mxu0 %v5133_v60  ;;  %v4193_v58 = vld [vmem:[%s10106_s3 + $0x518] sm:$0xff]  ;;  %v5217_v63 = vpack.c.bf16 %v4195_v57, %v4191_v56  ;;  %v4231_v57 = vld [vmem:[%s10106_s3 + $0x648] sm:$0xff] }
 0x1c5   : > { %5198 = vmatprep.subr.bf16.mxu1 %v5197_v0  ;;  %v4197_v60 = vld [vmem:[%s10106_s3 + $0x538] sm:$0xff]  ;;  %v4190_v0 = vld [vmem:[%s10106_s3 + $0x500] sm:$0xff]  ;;  %v4267_v45 = vld [vmem:[%s10106_s3 + $0x768] sm:$0xff] }
 0x1c6   : > { %v5281_v3 = vpack.c.bf16 %v4197_v60, %v4193_v58  ;;  %v4235_v58 = vld [vmem:[%s10106_s3 + $0x668] sm:$0xff]  ;;  %v4233_v60 = vld [vmem:[%s10106_s3 + $0x658] sm:$0xff] }
 0x1c7   : > { %5136 = vmatpush1.bf16.msra.mxu0 %v5135_v6  ;;  %v4201_v6 = vld [vmem:[%s10106_s3 + $0x558] sm:$0xff] }
 0x1c8   : > { %5200 = vmatpush1.bf16.msra.mxu1 %v5199_v8  ;;  %5202 = vmatprep.subr.bf16.mxu0 %v5201_v9  ;;  %v4205_v8 = vld [vmem:[%s10106_s3 + $0x578] sm:$0xff]  ;;  %v5219_v9 = vpack.c.bf16 %v4194_v1, %v4190_v0  ;;  %v4234_v0 = vld [vmem:[%s10106_s3 + $0x660] sm:$0xff] }
 0x1c9   : > { %5266 = vmatprep.subr.bf16.mxu1 %v5265_v16  ;;  %v5285_v16 = vpack.c.bf16 %v4205_v8, %v4201_v6  ;;  %v4243_v6 = vld [vmem:[%s10106_s3 + $0x6a8] sm:$0xff]  ;;  %v4241_v8 = vld [vmem:[%s10106_s3 + $0x698] sm:$0xff] }
 0x1ca   : > { %1823 = vmatmul.mubr.f32.vlgmr.msra.gmra.mrb[4].mxu0 %v1752_v29 }
 0x1cb   : > { %1894 = vmatmul.mubr.f32.vlgmr.msra.gmra.mrb[4].mxu1 %v1752_v29  ;;  %5204 = vmatpush1.bf16.msra.mxu0 %v5203_v22  ;;  %v5223_v22 = vpack.c.bf16 %v4202_v13, %v4198_v12  ;;  %v5289_v29 = vpack.c.bf16 %v4213_v21, %v4209_v20  ;;  %v4242_v12 = vld [vmem:[%s10106_s3 + $0x6a0] sm:$0xff]  ;;  %v4251_v20 = vld [vmem:[%s10106_s3 + $0x6e8] sm:$0xff]  ;;  %v4249_v21 = vld [vmem:[%s10106_s3 + $0x6d8] sm:$0xff] }
 0x1cc   : > { %5268 = vmatpush1.bf16.msra.mxu1 %v5267_v23  ;;  %5206 = vmatprep.subr.bf16.mxu0 %v5205_v25  ;;  %v5287_v23 = vpack.c.bf16 %v4204_v17, %v4200_v15  ;;  %v5225_v25 = vpack.c.bf16 %v4211_v19, %v4207_v18  ;;  %v4244_v17 = vld [vmem:[%s10106_s3 + $0x6b0] sm:$0xff]  ;;  %v4247_v19 = vld [vmem:[%s10106_s3 + $0x6c8] sm:$0xff] }
 0x1cd   : > { %5270 = vmatprep.subr.bf16.mxu1 %v5269_v30  ;;  %v4212_v30 = vld [vmem:[%s10106_s3 + $0x5b0] sm:$0xff] }
 0x1cf   : > { %5208 = vmatpush1.bf16.msra.mxu0 %v5207_v36  ;;  %v5291_v36 = vpack.c.bf16 %v4212_v30, %v4208_v28  ;;  %v4252_v30 = vld [vmem:[%s10106_s3 + $0x6f0] sm:$0xff] }
 0x1d0   : > { %5272 = vmatpush1.bf16.msra.mxu1 %v5271_v37  ;;  %5210 = vmatprep.subr.bf16.mxu0 %v5209_v38  ;;  %v5229_v37 = vpack.c.bf16 %v4219_v32, %v4215_v31  ;;  %v4214_v38 = vld [vmem:[%s10106_s3 + $0x5c0] sm:$0xff]  ;;  %v4255_v32 = vld [vmem:[%s10106_s3 + $0x708] sm:$0xff] }
 0x1d1   : > { %5274 = vmatprep.subr.bf16.mxu1 %v5273_v42  ;;  %v4220_v42 = vld [vmem:[%s10106_s3 + $0x5f0] sm:$0xff]  ;;  %v5231_v47 = vpack.c.bf16 %v4218_v39, %v4214_v38  ;;  %v4258_v38 = vld [vmem:[%s10106_s3 + $0x720] sm:$0xff] }
 0x1d3   : > { %5212 = vmatpush1.bf16.msra.mxu0 %v5211_v48  ;;  %v5295_v48 = vpack.c.bf16 %v4220_v42, %v4216_v40  ;;  %v4260_v42 = vld [vmem:[%s10106_s3 + $0x730] sm:$0xff] }
 0x1d4   : > { %5276 = vmatpush1.bf16.msra.mxu1 %v5275_v49  ;;  %5214 = vmatprep.subr.bf16.mxu0 %v5213_v50  ;;  %v5233_v49 = vpack.c.bf16 %v4227_v44, %v4223_v43  ;;  %v4222_v50 = vld [vmem:[%s10106_s3 + $0x600] sm:$0xff]  ;;  %v4263_v44 = vld [vmem:[%s10106_s3 + $0x748] sm:$0xff] }
 0x1d5   : > { %5278 = vmatprep.subr.bf16.mxu1 %v5277_v54  ;;  %v4228_v54 = vld [vmem:[%s10106_s3 + $0x630] sm:$0xff]  ;;  %v5235_v55 = vpack.c.bf16 %v4226_v51, %v4222_v50  ;;  %v4266_v50 = vld [vmem:[%s10106_s3 + $0x760] sm:$0xff] }
 0x1d6   : > { %v5299_v56 = vpack.c.bf16 %v4228_v54, %v4224_v53  ;;  %v4264_v53 = vld [vmem:[%s10106_s3 + $0x750] sm:$0xff] }
 0x1d7   : > { %5216 = vmatpush1.bf16.msra.mxu0 %v5215_v61  ;;  %v5237_v61 = vpack.c.bf16 %v4235_v58, %v4231_v57  ;;  %v4268_v54 = vld [vmem:[%s10106_s3 + $0x770] sm:$0xff]  ;;  %v4275_v57 = vld [vmem:[%s10106_s3 + $0x7a8] sm:$0xff]  ;;  %v4273_v58 = vld [vmem:[%s10106_s3 + $0x798] sm:$0xff] }
 0x1d8   : > { %5280 = vmatpush1.bf16.msra.mxu1 %v5279_v62  ;;  %5218 = vmatprep.subr.bf16.mxu0 %v5217_v63  ;;  %v4237_v62 = vld [vmem:[%s10106_s3 + $0x678] sm:$0xff]  ;;  %v4230_v63 = vld [vmem:[%s10106_s3 + $0x640] sm:$0xff] }
 0x1d9   : > { %5282 = vmatprep.subr.bf16.mxu1 %v5281_v3  ;;  %v5301_v1 = vpack.c.bf16 %v4237_v62, %v4233_v60  ;;  %v5239_v2 = vpack.c.bf16 %v4234_v0, %v4230_v63  ;;  %v4232_v3 = vld [vmem:[%s10106_s3 + $0x650] sm:$0xff]  ;;  %v4270_v62 = vld [vmem:[%s10106_s3 + $0x780] sm:$0xff] }
 0x1da   : > { %v5303_v4 = vpack.c.bf16 %v4236_v7, %v4232_v3  ;;  %v4274_v63 = vld [vmem:[%s10106_s3 + $0x7a0] sm:$0xff]  ;;  %v4276_v3 = vld [vmem:[%s10106_s3 + $0x7b0] sm:$0xff]  ;;  %v4279_v7 = vld [vmem:[%s10106_s3 + $0x7c8] sm:$0xff] }
 0x1db   : > { %5220 = vmatpush1.bf16.msra.mxu0 %v5219_v9  ;;  %v5241_v9 = vpack.c.bf16 %v4243_v6, %v4239_v5  ;;  %v4283_v5 = vld [vmem:[%s10106_s3 + $0x7e8] sm:$0xff]  ;;  %v4281_v6 = vld [vmem:[%s10106_s3 + $0x7d8] sm:$0xff] }
 0x1dc   : > { %5284 = vmatpush1.bf16.msra.mxu1 %v5283_v10  ;;  %5222 = vmatprep.subr.bf16.mxu0 %v5221_v11  ;;  %v4245_v10 = vld [vmem:[%s10106_s3 + $0x6b8] sm:$0xff]  ;;  %v4238_v11 = vld [vmem:[%s10106_s3 + $0x680] sm:$0xff] }
 0x1dd   : > { %5286 = vmatprep.subr.bf16.mxu1 %v5285_v16  ;;  %v5305_v13 = vpack.c.bf16 %v4245_v10, %v4241_v8  ;;  %v5243_v15 = vpack.c.bf16 %v4242_v12, %v4238_v11  ;;  %v4240_v16 = vld [vmem:[%s10106_s3 + $0x690] sm:$0xff]  ;;  %v4285_v8 = vld [vmem:[%s10106_s3 + $0x7f8] sm:$0xff]  ;;  %v4278_v11 = vld [vmem:[%s10106_s3 + $0x7c0] sm:$0xff] }
 0x1de   : > { %v5307_v18 = vpack.c.bf16 %v4244_v17, %v4240_v16  ;;  %v5325_v10 = vpack.c.bf16 %v4285_v8, %v4281_v6  ;;  %v4282_v12 = vld [vmem:[%s10106_s3 + $0x7e0] sm:$0xff]  ;;  %v4284_v16 = vld [vmem:[%s10106_s3 + $0x7f0] sm:$0xff] }
 0x1df   : > { %5224 = vmatpush1.bf16.msra.mxu0 %v5223_v22  ;;  %v5245_v22 = vpack.c.bf16 %v4251_v20, %v4247_v19  ;;  %v1983_v19 = vld [vmem:[%s10106_s3 + $0x28] sm:$0xff]  ;;  %v1981_v20 = vld [vmem:[%s10106_s3 + $0x18] sm:$0xff] }
 0x1e0   : > { %5288 = vmatpush1.bf16.msra.mxu1 %v5287_v23  ;;  %5226 = vmatprep.subr.bf16.mxu0 %v5225_v25  ;;  %v4253_v23 = vld [vmem:[%s10106_s3 + $0x6f8] sm:$0xff]  ;;  %v4246_v25 = vld [vmem:[%s10106_s3 + $0x6c0] sm:$0xff] }
 0x1e1   : > { %5290 = vmatprep.subr.bf16.mxu1 %v5289_v29  ;;  %v5309_v27 = vpack.c.bf16 %v4253_v23, %v4249_v21  ;;  %v5247_v28 = vpack.c.bf16 %v4250_v26, %v4246_v25  ;;  %v4248_v29 = vld [vmem:[%s10106_s3 + $0x6d0] sm:$0xff] }
 0x1e2   : > { %v5311_v31 = vpack.c.bf16 %v4252_v30, %v4248_v29 }
 0x1e3   : > { %5228 = vmatpush1.bf16.msra.mxu0 %v5227_v35  ;;  %v5249_v35 = vpack.c.bf16 %v4259_v33, %v4255_v32 }
 0x1e4   : > { %5292 = vmatpush1.bf16.msra.mxu1 %v5291_v36  ;;  %5230 = vmatprep.subr.bf16.mxu0 %v5229_v37  ;;  %v4261_v36 = vld [vmem:[%s10106_s3 + $0x738] sm:$0xff]  ;;  %v4254_v37 = vld [vmem:[%s10106_s3 + $0x700] sm:$0xff] }
 0x1e5   : > { %5294 = vmatprep.subr.bf16.mxu1 %v5293_v41  ;;  %v5313_v39 = vpack.c.bf16 %v4261_v36, %v4257_v34  ;;  %v5251_v40 = vpack.c.bf16 %v4258_v38, %v4254_v37  ;;  %v4256_v41 = vld [vmem:[%s10106_s3 + $0x710] sm:$0xff] }
 0x1e6   : > { %v5315_v43 = vpack.c.bf16 %v4260_v42, %v4256_v41 }
 0x1e7   : > { %5232 = vmatpush1.bf16.msra.mxu0 %v5231_v47  ;;  %v5253_v47 = vpack.c.bf16 %v4267_v45, %v4263_v44 }
 0x1e8   : > { %5296 = vmatpush1.bf16.msra.mxu1 %v5295_v48  ;;  %5234 = vmatprep.subr.bf16.mxu0 %v5233_v49  ;;  %v4269_v48 = vld [vmem:[%s10106_s3 + $0x778] sm:$0xff]  ;;  %v4262_v49 = vld [vmem:[%s10106_s3 + $0x740] sm:$0xff] }
 0x1e9   : > { %5298 = vmatprep.subr.bf16.mxu1 %v5297_v52  ;;  %v5317_v51 = vpack.c.bf16 %v4269_v48, %v4265_v46  ;;  %v5255_v52 = vpack.c.bf16 %v4266_v50, %v4262_v49 }
 0x1eb   : > { %5236 = vmatpush1.bf16.msra.mxu0 %v5235_v55  ;;  %v5319_v55 = vpack.c.bf16 %v4268_v54, %v4264_v53  ;;  %v1980_v53 = vld [vmem:[%s10106_s3 + $0x10] sm:$0xff] }
 0x1ec   : > { %5300 = vmatpush1.bf16.msra.mxu1 %v5299_v56  ;;  %5238 = vmatprep.subr.bf16.mxu0 %v5237_v61  ;;  %v4271_v56 = vld [vmem:[%s10106_s3 + $0x788] sm:$0xff]  ;;  %v4277_v61 = vld [vmem:[%s10106_s3 + $0x7b8] sm:$0xff]  ;;  %v1984_v54 = vld [vmem:[%s10106_s3 + $0x30] sm:$0xff] }
 0x1ed   : > { %5302 = vmatprep.subr.bf16.mxu1 %v5301_v1  ;;  %v5257_v60 = vpack.c.bf16 %v4275_v57, %v4271_v56  ;;  %v5321_v0 = vpack.c.bf16 %v4277_v61, %v4273_v58  ;;  %v5259_v1 = vpack.c.bf16 %v4274_v63, %v4270_v62  ;;  %v1991_v56 = vld [vmem:[%s10106_s3 + $0x68] sm:$0xff]  ;;  %v1989_v57 = vld [vmem:[%s10106_s3 + $0x58] sm:$0xff] }
 0x1ee   : > { %v1993_v61 = vld [vmem:[%s10106_s3 + $0x78] sm:$0xff] }
 0x1ef   : > { %5240 = vmatpush1.bf16.msra.mxu0 %v5239_v2  ;;  %v4272_v2 = vld [vmem:[%s10106_s3 + $0x790] sm:$0xff]  ;;  %v5397_v8 = vpack.c.bf16 %v1993_v61, %v1989_v57  ;;  %v2031_v61 = vld [vmem:[%s10106_s3 + $0x1a8] sm:$0xff] }
 0x1f0   : > { %5304 = vmatpush1.bf16.msra.mxu1 %v5303_v4  ;;  %5242 = vmatprep.subr.bf16.mxu0 %v5241_v9  ;;  %v5323_v4 = vpack.c.bf16 %v4276_v3, %v4272_v2  ;;  %v5261_v9 = vpack.c.bf16 %v4283_v5, %v4279_v7  ;;  %v1986_v2 = vld [vmem:[%s10106_s3 + $0x40] sm:$0xff]  ;;  %v1988_v7 = vld [vmem:[%s10106_s3 + $0x50] sm:$0xff]  ;;  %v1995_v5 = vld [vmem:[%s10106_s3 + $0x88] sm:$0xff] }
 0x1f1   : > { %5306 = vmatprep.subr.bf16.mxu1 %v5305_v13  ;;  %v4280_v13 = vld [vmem:[%s10106_s3 + $0x7d0] sm:$0xff]  ;;  %v1990_v3 = vld [vmem:[%s10106_s3 + $0x60] sm:$0xff] }
 0x1f2   : > { %v5327_v17 = vpack.c.bf16 %v4284_v16, %v4280_v13  ;;  %v5335_v13 = vpack.c.bf16 %v1990_v3, %v1986_v2  ;;  %v1994_v16 = vld [vmem:[%s10106_s3 + $0x80] sm:$0xff]  ;;  %v2020_v57 = vld [vmem:[%s10106_s3 + $0x150] sm:$0xff] }
 0x1f3   : > { %5244 = vmatpush1.bf16.msra.mxu0 %v5243_v15  ;;  %v5263_v15 = vpack.c.bf16 %v4282_v12, %v4278_v11  ;;  %v2001_v11 = vld [vmem:[%s10106_s3 + $0xb8] sm:$0xff]  ;;  %v2026_v2 = vld [vmem:[%s10106_s3 + $0x180] sm:$0xff] }
 0x1f4   : > { %5308 = vmatpush1.bf16.msra.mxu1 %v5307_v18  ;;  %5246 = vmatprep.subr.bf16.mxu0 %v5245_v22  ;;  %v1979_v18 = vld [vmem:[%s10106_s3 + $0x8] sm:$0xff]  ;;  %v1985_v22 = vld [vmem:[%s10106_s3 + $0x38] sm:$0xff]  ;;  %v2030_v3 = vld [vmem:[%s10106_s3 + $0x1a0] sm:$0xff] }
 0x1f5   : > { %5310 = vmatprep.subr.bf16.mxu1 %v5309_v27  ;;  %v5329_v21 = vpack.c.bf16 %v1983_v19, %v1979_v18  ;;  %v5393_v23 = vpack.c.bf16 %v1985_v22, %v1981_v20  ;;  %v1996_v20 = vld [vmem:[%s10106_s3 + $0x90] sm:$0xff]  ;;  %v2003_v22 = vld [vmem:[%s10106_s3 + $0xc8] sm:$0xff] }
 0x1f7   : > { %5248 = vmatpush1.bf16.msra.mxu0 %v5247_v28 }
 0x1f8   : > { %5312 = vmatpush1.bf16.msra.mxu1 %v5311_v31  ;;  %5250 = vmatprep.subr.bf16.mxu0 %v5249_v35 }
 0x1f9   : > { %5314 = vmatprep.subr.bf16.mxu1 %v5313_v39 }
 0x1fb   : > { %5252 = vmatpush1.bf16.msra.mxu0 %v5251_v40 }
 0x1fc   : > { %5316 = vmatpush1.bf16.msra.mxu1 %v5315_v43  ;;  %5254 = vmatprep.subr.bf16.mxu0 %v5253_v47 }
 0x1fd   : > { %5318 = vmatprep.subr.bf16.mxu1 %v5317_v51  ;;  %v1978_v51 = vld [vmem:[%s10106_s3] sm:$0xff] }
 0x1ff   : > { %5256 = vmatpush1.bf16.msra.mxu0 %v5255_v52  ;;  %v1982_v52 = vld [vmem:[%s10106_s3 + $0x20] sm:$0xff] }
 0x200   : > { %5320 = vmatpush1.bf16.msra.mxu1 %v5319_v55  ;;  %5258 = vmatprep.subr.bf16.mxu0 %v5257_v60  ;;  %v1987_v55 = vld [vmem:[%s10106_s3 + $0x48] sm:$0xff] }
 0x201   : > { %5322 = vmatprep.subr.bf16.mxu1 %v5321_v0  ;;  %v5331_v0 = vpack.c.bf16 %v1982_v52, %v1978_v51  ;;  %v5333_v6 = vpack.c.bf16 %v1991_v56, %v1987_v55 }
 0x203   : > { %5260 = vmatpush1.bf16.msra.mxu0 %v5259_v1  ;;  %v5395_v1 = vpack.c.bf16 %v1984_v54, %v1980_v53  ;;  %v2018_v53 = vld [vmem:[%s10106_s3 + $0x140] sm:$0xff] }
 0x204   : > { %5324 = vmatpush1.bf16.msra.mxu1 %v5323_v4  ;;  %5262 = vmatprep.subr.bf16.mxu0 %v5261_v9  ;;  %v1992_v4 = vld [vmem:[%s10106_s3 + $0x70] sm:$0xff]  ;;  %v1999_v9 = vld [vmem:[%s10106_s3 + $0xa8] sm:$0xff]  ;;  %v2022_v54 = vld [vmem:[%s10106_s3 + $0x160] sm:$0xff] }
 0x205   : > { %5326 = vmatprep.subr.bf16.mxu1 %v5325_v10  ;;  %v1997_v10 = vld [vmem:[%s10106_s3 + $0x98] sm:$0xff]  ;;  %v5337_v18 = vpack.c.bf16 %v1999_v9, %v1995_v5  ;;  %v2028_v5 = vld [vmem:[%s10106_s3 + $0x190] sm:$0xff]  ;;  %v2039_v9 = vld [vmem:[%s10106_s3 + $0x1e8] sm:$0xff] }
 0x206   : > { %v5401_v19 = vpack.c.bf16 %v2001_v11, %v1997_v10  ;;  %v2037_v10 = vld [vmem:[%s10106_s3 + $0x1d8] sm:$0xff] }
 0x207   : > { %5264 = vmatpush1.bf16.msra.mxu0 %v5263_v15  ;;  %v5399_v15 = vpack.c.bf16 %v1992_v4, %v1988_v7  ;;  %v2041_v11 = vld [vmem:[%s10106_s3 + $0x1f8] sm:$0xff] }
 0x208   : > { %5328 = vmatpush1.bf16.msra.mxu1 %v5327_v17  ;;  %5330 = vmatprep.subr.bf16.mxu0 %v5329_v21  ;;  %v1998_v17 = vld [vmem:[%s10106_s3 + $0xa0] sm:$0xff]  ;;  %v2000_v21 = vld [vmem:[%s10106_s3 + $0xb0] sm:$0xff] }
 0x209   : > { %5394 = vmatprep.subr.bf16.mxu1 %v5393_v23  ;;  %v2007_v23 = vld [vmem:[%s10106_s3 + $0xe8] sm:$0xff] }
 0x29d   : > { %v1824_v25 = vpop.f32.mrb[4].mxu0 }
 0x29e   : > { %vm1904_vm13 = vcmp.ge.f32.partialorder %v1824_v25, 0.0  ;;  %v1908_v26 = vmul.f32 0.2, %v1824_v25  ;;  %v1895_v27 = vpop.f32.mrb[4].mxu1  ;;  %v1826_v28 = vpop.f32.mrb[5].mxu0 }
 0x29f   : > { %vm1906_vm14 = vcmp.ge.f32.partialorder %v1895_v27, 0.0  ;;  %v1910_v29 = vmul.f32 0.2, %v1895_v27  ;;  %vm1905_vm15 = vcmp.ge.f32.partialorder %v1826_v28, 0.0  ;;  %v1909_v30 = vmul.f32 0.2, %v1826_v28 }
 0x2a0   : > { %v1912_v31 = vsel %vm1904_vm13, %v1824_v25, %v1908_v26  ;;  %v1897_v32 = vpop.f32.mrb[5].mxu1  ;;  %v2005_v25 = vld [vmem:[%s10106_s3 + $0xd8] sm:$0xff] }
 0x2a1   : > { %v1914_v33 = vsel %vm1906_vm14, %v1895_v27, %v1910_v29  ;;  %v1913_v34 = vsel %vm1905_vm15, %v1826_v28, %v1909_v30  ;;  %vm1907_vm0 = vcmp.ge.f32.partialorder %v1897_v32, 0.0  ;;  %v1911_v35 = vmul.f32 0.2, %v1897_v32  ;;  %v2009_v26 = vld [vmem:[%s10106_s3 + $0xf8] sm:$0xff]  ;;  %v2002_v29 = vld [vmem:[%s10106_s3 + $0xc0] sm:$0xff] }
 0x2a2   : > { %v1916_v36 = vmax.f32 %v1912_v31, %v1914_v33  ;;  %v5339_v27 = vpack.c.bf16 %v1998_v17, %v1994_v16  ;;  %v5403_v28 = vpack.c.bf16 %v2000_v21, %v1996_v20  ;;  %v2006_v30 = vld [vmem:[%s10106_s3 + $0xe0] sm:$0xff]  ;;  %v5341_v31 = vpack.c.bf16 %v2007_v23, %v2003_v22  ;;  %v2004_v33 = vld [vmem:[%s10106_s3 + $0xd0] sm:$0xff]  ;;  %v2043_v21 = vld [vmem:[%s10106_s3 + $0x208] sm:$0xff] }
 0x2a3   : > { %v1915_v37 = vsel %vm1907_vm0, %v1897_v32, %v1911_v35  ;;  %v5405_v32 = vpack.c.bf16 %v2009_v26, %v2005_v25  ;;  %v2011_v35 = vld [vmem:[%s10106_s3 + $0x108] sm:$0xff]  ;;  %v2038_v16 = vld [vmem:[%s10106_s3 + $0x1e0] sm:$0xff]  ;;  %v2040_v20 = vld [vmem:[%s10106_s3 + $0x1f0] sm:$0xff] }
 0x2a4   : > { %v1920_v38 = vrot.slane %v1916_v36, 1  ;;  %v1917_v39 = vmax.f32 %v1913_v34, %v1915_v37  ;;  %v2008_v34 = vld [vmem:[%s10106_s3 + $0xf0] sm:$0xff]  ;;  %v2013_v37 = vld [vmem:[%s10106_s3 + $0x118] sm:$0xff]  ;;  %v2047_v22 = vld [vmem:[%s10106_s3 + $0x228] sm:$0xff] }
 0x2a5   : > { %v2045_v23 = vld [vmem:[%s10106_s3 + $0x218] sm:$0xff] }
 0x2a6   : > { %v1924_v40 = vmax.f32 %v1916_v36, %v1920_v38  ;;  %v1921_v41 = vrot.slane %v1917_v39, 1  ;;  %v2015_v36 = vld [vmem:[%s10106_s3 + $0x128] sm:$0xff]  ;;  %v2017_v38 = vld [vmem:[%s10106_s3 + $0x138] sm:$0xff] }
 0x2a7   : > { %v2049_v25 = vld [vmem:[%s10106_s3 + $0x238] sm:$0xff] }
 0x2a8   : > { %v1925_v42 = vmax.f32 %v1917_v39, %v1921_v41  ;;  %v5343_v39 = vpack.c.bf16 %v2006_v30, %v2002_v29  ;;  %v2010_v41 = vld [vmem:[%s10106_s3 + $0x100] sm:$0xff]  ;;  %v5361_v30 = vpack.c.bf16 %v2047_v22, %v2043_v21  ;;  %v2087_v21 = vld [vmem:[%s10106_s3 + $0x368] sm:$0xff]  ;;  %v2085_v22 = vld [vmem:[%s10106_s3 + $0x358] sm:$0xff] }
 0x2a9   : > { %v2046_v29 = vld [vmem:[%s10106_s3 + $0x220] sm:$0xff] }
 0x2aa   : > { %v1928_v43 = vcombine.low %v1924_v40, %v1925_v42  ;;  %v1952_v44 = vcombine.high %v1924_v40, %v1925_v42  ;;  %v5407_v40 = vpack.c.bf16 %v2008_v34, %v2004_v33  ;;  %v2014_v42 = vld [vmem:[%s10106_s3 + $0x120] sm:$0xff]  ;;  %v2048_v33 = vld [vmem:[%s10106_s3 + $0x230] sm:$0xff]  ;;  %v2051_v34 = vld [vmem:[%s10106_s3 + $0x248] sm:$0xff] }
 0x2ab   : > { %v5347_v51 = vpack.c.bf16 %v2014_v42, %v2010_v41  ;;  %v2054_v41 = vld [vmem:[%s10106_s3 + $0x260] sm:$0xff] }
 0x2ac   : > { %v1935_v45 = vrot.slane %v1928_v43, %v6968_v14  ;;  %v1959_v46 = vrot.slane %v1952_v44, %v6968_v14  ;;  %v5345_v43 = vpack.c.bf16 %v2015_v36, %v2011_v35  ;;  %v5409_v44 = vpack.c.bf16 %v2017_v38, %v2013_v37  ;;  %v2055_v35 = vld [vmem:[%s10106_s3 + $0x268] sm:$0xff]  ;;  %v2053_v36 = vld [vmem:[%s10106_s3 + $0x258] sm:$0xff] }
 0x2ad   : > { %v2057_v37 = vld [vmem:[%s10106_s3 + $0x278] sm:$0xff]  ;;  %v5365_v42 = vpack.c.bf16 %v2055_v35, %v2051_v34  ;;  %v2095_v34 = vld [vmem:[%s10106_s3 + $0x3a8] sm:$0xff] }
 0x2ae   : > { %v1942_v47 = vrot.slane %v1935_v45, %v6968_v14  ;;  %v1966_v48 = vrot.slane %v1959_v46, %v6968_v14  ;;  %v2012_v45 = vld [vmem:[%s10106_s3 + $0x110] sm:$0xff]  ;;  %v2093_v35 = vld [vmem:[%s10106_s3 + $0x398] sm:$0xff] }
 0x2af   : > { %v2016_v46 = vld [vmem:[%s10106_s3 + $0x130] sm:$0xff] }
 0x2b0   : > { %1945 = vst.msk [vmem:[#allocation4 + $0x1] ss:$8 sm:$0x3] %vm6972_vm10, %v1942_v47  ;;  %v1947_v49 = vcombine.high %v1942_v47, %v1942_v47  ;;  %1969 = vst.msk [vmem:[#allocation4 + $0x3] ss:$8 sm:$0x3] %vm6972_vm10, %v1966_v48  ;;  %v1971_v50 = vcombine.high %v1966_v48, %v1966_v48  ;;  %v5411_v52 = vpack.c.bf16 %v2016_v46, %v2012_v45 }
 0x2b1   : > { %v2019_v47 = vld [vmem:[%s10106_s3 + $0x148] sm:$0xff]  ;;  %v2056_v45 = vld [vmem:[%s10106_s3 + $0x270] sm:$0xff] }
 0x2b2   : > { %1950 = vst.msk [vmem:[#allocation4 + $0x2] ss:$8 sm:$0x3] %vm6972_vm10, %v1947_v49  ;;  %1974 = vst.msk [vmem:[#allocation4 + $0x4] ss:$8 sm:$0x3] %vm6972_vm10, %v1971_v50 }
 0x2b3   : > { %v2023_v48 = vld [vmem:[%s10106_s3 + $0x168] sm:$0xff]  ;;  %v2021_v49 = vld [vmem:[%s10106_s3 + $0x158] sm:$0xff] }
 0x2b4   : > { %v2025_v50 = vld [vmem:[%s10106_s3 + $0x178] sm:$0xff]  ;;  %v5349_v55 = vpack.c.bf16 %v2023_v48, %v2019_v47  ;;  %v2059_v46 = vld [vmem:[%s10106_s3 + $0x288] sm:$0xff] }
 0x2b5   : > { %v5413_v56 = vpack.c.bf16 %v2025_v50, %v2021_v49  ;;  %v2063_v47 = vld [vmem:[%s10106_s3 + $0x2a8] sm:$0xff]  ;;  %v2061_v48 = vld [vmem:[%s10106_s3 + $0x298] sm:$0xff] }
 0x2b6   : > { %v2065_v49 = vld [vmem:[%s10106_s3 + $0x2b8] sm:$0xff] }
 0x2b9   : > { %v2107_v58 = vld [vmem:[#allocation4 + $0x8] sm:$0x1e]  ;;  %v2106_v60 = vld [vmem:[#allocation4] sm:$0x1e] }
 0x2ba   : > { %v2240_v62 = vrot.slane %v2107_v58, 1  ;;  %v2239_v63 = vrot.slane %v2106_v60, 1  ;;  %v1977_v12 = vld [vmem:[#allocation4 + $0x8] sm:$0xf]  ;;  %v2024_v58 = vld [vmem:[%s10106_s3 + $0x170] sm:$0xff]  ;;  %v2027_v60 = vld [vmem:[%s10106_s3 + $0x188] sm:$0xff] }
 0x2bb   : > { %v5353_v7 = vpack.c.bf16 %v2031_v61, %v2027_v60  ;;  %v2071_v60 = vld [vmem:[%s10106_s3 + $0x2e8] sm:$0xff]  ;;  %v2069_v61 = vld [vmem:[%s10106_s3 + $0x2d8] sm:$0xff] }
 0x2bc   : > { %2307 = vmatprep.mubr.f32.mxu0 %v2240_v62  ;;  %2378 = vmatprep.mubr.f32.mxu1 %v2240_v62  ;;  %v2029_v62 = vld [vmem:[%s10106_s3 + $0x198] sm:$0xff] }
 0x2bd   : > { %2308 = vmatmul.mubr.f32.vlgmr.msra.gmra.mrb[6].mxu0 %v2239_v63  ;;  %2379 = vmatmul.mubr.f32.vlgmr.msra.gmra.mrb[6].mxu1 %v2239_v63  ;;  %v2033_v63 = vld [vmem:[%s10106_s3 + $0x1b8] sm:$0xff] }
 0x2be   : > { %5332 = vmatpush1.bf16.msra.mxu0 %v5331_v0  ;;  %5396 = vmatpush1.bf16.msra.mxu1 %v5395_v1  ;;  %v5351_v0 = vpack.c.bf16 %v2022_v54, %v2018_v53  ;;  %v5415_v1 = vpack.c.bf16 %v2024_v58, %v2020_v57  ;;  %v5417_v4 = vpack.c.bf16 %v2033_v63, %v2029_v62  ;;  %v2062_v53 = vld [vmem:[%s10106_s3 + $0x2a0] sm:$0xff]  ;;  %v2064_v57 = vld [vmem:[%s10106_s3 + $0x2b0] sm:$0xff]  ;;  %v2067_v58 = vld [vmem:[%s10106_s3 + $0x2c8] sm:$0xff] }
 0x2bf   : > { %2449 = vmatprep.mubr.f32.mxu0 %v1977_v12  ;;  %2520 = vmatprep.mubr.f32.mxu1 %v1977_v12  ;;  %v5355_v12 = vpack.c.bf16 %v2030_v3, %v2026_v2  ;;  %v5369_v54 = vpack.c.bf16 %v2063_v47, %v2059_v46  ;;  %v2073_v62 = vld [vmem:[%s10106_s3 + $0x2f8] sm:$0xff]  ;;  %v2070_v2 = vld [vmem:[%s10106_s3 + $0x2e0] sm:$0xff]  ;;  %v5373_v3 = vpack.c.bf16 %v2071_v60, %v2067_v58  ;;  %v2103_v46 = vld [vmem:[%s10106_s3 + $0x3e8] sm:$0xff] }
 0x2c0   : > { %5334 = vmatprep.subr.bf16.mxu0 %v5333_v6  ;;  %5398 = vmatprep.subr.bf16.mxu1 %v5397_v8  ;;  %v2032_v6 = vld [vmem:[%s10106_s3 + $0x1b0] sm:$0xff]  ;;  %v2035_v8 = vld [vmem:[%s10106_s3 + $0x1c8] sm:$0xff]  ;;  %v2101_v47 = vld [vmem:[%s10106_s3 + $0x3d8] sm:$0xff] }
 0x2c1   : > { %v5357_v17 = vpack.c.bf16 %v2039_v9, %v2035_v8  ;;  %v2079_v8 = vld [vmem:[%s10106_s3 + $0x328] sm:$0xff]  ;;  %v2077_v9 = vld [vmem:[%s10106_s3 + $0x318] sm:$0xff] }
 0x2c2   : > { %5336 = vmatpush1.bf16.msra.mxu0 %v5335_v13  ;;  %5400 = vmatpush1.bf16.msra.mxu1 %v5399_v15  ;;  %v5419_v13 = vpack.c.bf16 %v2032_v6, %v2028_v5  ;;  %v2034_v15 = vld [vmem:[%s10106_s3 + $0x1c0] sm:$0xff]  ;;  %v2072_v5 = vld [vmem:[%s10106_s3 + $0x2f0] sm:$0xff]  ;;  %v2075_v6 = vld [vmem:[%s10106_s3 + $0x308] sm:$0xff] }
 0x2c3   : > { %5338 = vmatprep.subr.bf16.mxu0 %v5337_v18  ;;  %5402 = vmatprep.subr.bf16.mxu1 %v5401_v19  ;;  %v5421_v18 = vpack.c.bf16 %v2041_v11, %v2037_v10  ;;  %v2036_v19 = vld [vmem:[%s10106_s3 + $0x1d0] sm:$0xff]  ;;  %v5359_v26 = vpack.c.bf16 %v2038_v16, %v2034_v15  ;;  %v2081_v10 = vld [vmem:[%s10106_s3 + $0x338] sm:$0xff]  ;;  %v2078_v15 = vld [vmem:[%s10106_s3 + $0x320] sm:$0xff]  ;;  %v5377_v16 = vpack.c.bf16 %v2079_v8, %v2075_v6 }
 0x2c4   : > { %v4291_v58 = vld [vmem:[%s10106_s3 + $0x828] sm:$0xff]  ;;  %v4289_v60 = vld [vmem:[%s10106_s3 + $0x818] sm:$0xff]  ;;  %v2528_v8 = vld [vmem:[#allocation4 + $0x8] sm:$0x3c] }
 0x2c5   : > { %v4299_v6 = vld [vmem:[%s10106_s3 + $0x868] sm:$0xff] }
 0x2c6   : > { %5340 = vmatpush1.bf16.msra.mxu0 %v5339_v27  ;;  %5404 = vmatpush1.bf16.msra.mxu1 %v5403_v28  ;;  %v5423_v27 = vpack.c.bf16 %v2040_v20, %v2036_v19  ;;  %v2042_v28 = vld [vmem:[%s10106_s3 + $0x200] sm:$0xff]  ;;  %v2080_v19 = vld [vmem:[%s10106_s3 + $0x330] sm:$0xff]  ;;  %v2083_v20 = vld [vmem:[%s10106_s3 + $0x348] sm:$0xff] }
 0x2c7   : > { %5342 = vmatprep.subr.bf16.mxu0 %v5341_v31  ;;  %5406 = vmatprep.subr.bf16.mxu1 %v5405_v32  ;;  %v5425_v31 = vpack.c.bf16 %v2049_v25, %v2045_v23  ;;  %v2044_v32 = vld [vmem:[%s10106_s3 + $0x210] sm:$0xff]  ;;  %v5363_v38 = vpack.c.bf16 %v2046_v29, %v2042_v28  ;;  %v2089_v23 = vld [vmem:[%s10106_s3 + $0x378] sm:$0xff]  ;;  %v2086_v28 = vld [vmem:[%s10106_s3 + $0x360] sm:$0xff]  ;;  %v5381_v29 = vpack.c.bf16 %v2087_v21, %v2083_v20 }
 0x2ca   : > { %5344 = vmatpush1.bf16.msra.mxu0 %v5343_v39  ;;  %5408 = vmatpush1.bf16.msra.mxu1 %v5407_v40  ;;  %v5427_v39 = vpack.c.bf16 %v2048_v33, %v2044_v32  ;;  %v2050_v40 = vld [vmem:[%s10106_s3 + $0x240] sm:$0xff]  ;;  %v2088_v32 = vld [vmem:[%s10106_s3 + $0x370] sm:$0xff]  ;;  %v2091_v33 = vld [vmem:[%s10106_s3 + $0x388] sm:$0xff] }
 0x2cb   : > { %5346 = vmatprep.subr.bf16.mxu0 %v5345_v43  ;;  %5410 = vmatprep.subr.bf16.mxu1 %v5409_v44  ;;  %v5429_v43 = vpack.c.bf16 %v2057_v37, %v2053_v36  ;;  %v2052_v44 = vld [vmem:[%s10106_s3 + $0x250] sm:$0xff]  ;;  %v5367_v50 = vpack.c.bf16 %v2054_v41, %v2050_v40  ;;  %v2097_v36 = vld [vmem:[%s10106_s3 + $0x3b8] sm:$0xff]  ;;  %v2094_v40 = vld [vmem:[%s10106_s3 + $0x3a0] sm:$0xff]  ;;  %v5385_v41 = vpack.c.bf16 %v2095_v34, %v2091_v33 }
 0x2cc   : > { %v4308_v34 = vld [vmem:[%s10106_s3 + $0x8b0] sm:$0xff] }
 0x2ce   : > { %5348 = vmatpush1.bf16.msra.mxu0 %v5347_v51  ;;  %5412 = vmatpush1.bf16.msra.mxu1 %v5411_v52  ;;  %v5431_v51 = vpack.c.bf16 %v2056_v45, %v2052_v44  ;;  %v2058_v52 = vld [vmem:[%s10106_s3 + $0x280] sm:$0xff]  ;;  %v2096_v44 = vld [vmem:[%s10106_s3 + $0x3b0] sm:$0xff]  ;;  %v2099_v45 = vld [vmem:[%s10106_s3 + $0x3c8] sm:$0xff] }
 0x2cf   : > { %5350 = vmatprep.subr.bf16.mxu0 %v5349_v55  ;;  %5414 = vmatprep.subr.bf16.mxu1 %v5413_v56  ;;  %v5433_v55 = vpack.c.bf16 %v2065_v49, %v2061_v48  ;;  %v2060_v56 = vld [vmem:[%s10106_s3 + $0x290] sm:$0xff]  ;;  %v5371_v63 = vpack.c.bf16 %v2062_v53, %v2058_v52  ;;  %v2105_v48 = vld [vmem:[%s10106_s3 + $0x3f8] sm:$0xff]  ;;  %v2102_v52 = vld [vmem:[%s10106_s3 + $0x3e0] sm:$0xff]  ;;  %v5389_v53 = vpack.c.bf16 %v2103_v46, %v2099_v45 }
 0x2d0   : > { %v4316_v46 = vld [vmem:[%s10106_s3 + $0x8f0] sm:$0xff] }
 0x2d2   : > { %5352 = vmatpush1.bf16.msra.mxu0 %v5351_v0  ;;  %5416 = vmatpush1.bf16.msra.mxu1 %v5415_v1  ;;  %v5435_v0 = vpack.c.bf16 %v2064_v57, %v2060_v56  ;;  %v2066_v1 = vld [vmem:[%s10106_s3 + $0x2c0] sm:$0xff]  ;;  %v2104_v56 = vld [vmem:[%s10106_s3 + $0x3f0] sm:$0xff]  ;;  %v4287_v57 = vld [vmem:[%s10106_s3 + $0x808] sm:$0xff] }
 0x2d3   : > { %5354 = vmatprep.subr.bf16.mxu0 %v5353_v7  ;;  %5418 = vmatprep.subr.bf16.mxu1 %v5417_v4  ;;  %v5437_v7 = vpack.c.bf16 %v2073_v62, %v2069_v61  ;;  %v2068_v4 = vld [vmem:[%s10106_s3 + $0x2d0] sm:$0xff]  ;;  %v5375_v11 = vpack.c.bf16 %v2070_v2, %v2066_v1  ;;  %v4293_v61 = vld [vmem:[%s10106_s3 + $0x838] sm:$0xff]  ;;  %v4286_v2 = vld [vmem:[%s10106_s3 + $0x800] sm:$0xff] }
 0x2d4   : > { %v5521_v1 = vpack.c.bf16 %v4293_v61, %v4289_v60  ;;  %v4327_v60 = vld [vmem:[%s10106_s3 + $0x948] sm:$0xff] }
 0x2d5   : > { %v4331_v61 = vld [vmem:[%s10106_s3 + $0x968] sm:$0xff] }
 0x2d6   : > { %5356 = vmatpush1.bf16.msra.mxu0 %v5355_v12  ;;  %5420 = vmatpush1.bf16.msra.mxu1 %v5419_v13  ;;  %v5439_v12 = vpack.c.bf16 %v2072_v5, %v2068_v4  ;;  %v2074_v13 = vld [vmem:[%s10106_s3 + $0x300] sm:$0xff]  ;;  %v4292_v4 = vld [vmem:[%s10106_s3 + $0x830] sm:$0xff]  ;;  %v4295_v5 = vld [vmem:[%s10106_s3 + $0x848] sm:$0xff] }
 0x2d7   : > { %5358 = vmatprep.subr.bf16.mxu0 %v5357_v17  ;;  %5422 = vmatprep.subr.bf16.mxu1 %v5421_v18  ;;  %v5441_v17 = vpack.c.bf16 %v2081_v10, %v2077_v9  ;;  %v2076_v18 = vld [vmem:[%s10106_s3 + $0x310] sm:$0xff]  ;;  %v5379_v25 = vpack.c.bf16 %v2078_v15, %v2074_v13  ;;  %v4297_v9 = vld [vmem:[%s10106_s3 + $0x858] sm:$0xff]  ;;  %v4298_v15 = vld [vmem:[%s10106_s3 + $0x860] sm:$0xff]  ;;  %v5461_v20 = vpack.c.bf16 %v4299_v6, %v4295_v5 }
 0x2d8   : > { %v4301_v10 = vld [vmem:[%s10106_s3 + $0x878] sm:$0xff]  ;;  %v4332_v6 = vld [vmem:[%s10106_s3 + $0x970] sm:$0xff] }
 0x2d9   : > { %v5525_v21 = vpack.c.bf16 %v4301_v10, %v4297_v9  ;;  %v4339_v9 = vld [vmem:[%s10106_s3 + $0x9a8] sm:$0xff]  ;;  %v4337_v10 = vld [vmem:[%s10106_s3 + $0x998] sm:$0xff] }
 0x2da   : > { %5360 = vmatpush1.bf16.msra.mxu0 %v5359_v26  ;;  %5424 = vmatpush1.bf16.msra.mxu1 %v5423_v27  ;;  %v5443_v26 = vpack.c.bf16 %v2080_v19, %v2076_v18  ;;  %v2082_v27 = vld [vmem:[%s10106_s3 + $0x340] sm:$0xff]  ;;  %v1976_v18 = vld [vmem:[#allocation4] sm:$0xf]  ;;  %v2661_v19 = vrot.slane %v2528_v8, 2  ;;  %v4335_v8 = vld [vmem:[%s10106_s3 + $0x988] sm:$0xff] }
 0x2db   : > { %5362 = vmatprep.subr.bf16.mxu0 %v5361_v30  ;;  %5426 = vmatprep.subr.bf16.mxu1 %v5425_v31  ;;  %v5445_v30 = vpack.c.bf16 %v2089_v23, %v2085_v22  ;;  %v2084_v31 = vld [vmem:[%s10106_s3 + $0x350] sm:$0xff]  ;;  %v5383_v37 = vpack.c.bf16 %v2086_v28, %v2082_v27  ;;  %v4303_v22 = vld [vmem:[%s10106_s3 + $0x888] sm:$0xff] }
 0x2dc   : > { %v4307_v23 = vld [vmem:[%s10106_s3 + $0x8a8] sm:$0xff] }
 0x2de   : > { %5364 = vmatpush1.bf16.msra.mxu0 %v5363_v38  ;;  %5428 = vmatpush1.bf16.msra.mxu1 %v5427_v39  ;;  %v5447_v38 = vpack.c.bf16 %v2088_v32, %v2084_v31  ;;  %v2090_v39 = vld [vmem:[%s10106_s3 + $0x380] sm:$0xff]  ;;  %v4304_v32 = vld [vmem:[%s10106_s3 + $0x890] sm:$0xff] }
 0x2df   : > { %5366 = vmatprep.subr.bf16.mxu0 %v5365_v42  ;;  %5430 = vmatprep.subr.bf16.mxu1 %v5429_v43  ;;  %v5449_v42 = vpack.c.bf16 %v2097_v36, %v2093_v35  ;;  %v2092_v43 = vld [vmem:[%s10106_s3 + $0x390] sm:$0xff]  ;;  %v5387_v49 = vpack.c.bf16 %v2094_v40, %v2090_v39  ;;  %v4306_v31 = vld [vmem:[%s10106_s3 + $0x8a0] sm:$0xff]  ;;  %v4311_v35 = vld [vmem:[%s10106_s3 + $0x8c8] sm:$0xff]  ;;  %v5531_v40 = vpack.c.bf16 %v4308_v34, %v4304_v32 }
 0x2e0   : > { %v4315_v36 = vld [vmem:[%s10106_s3 + $0x8e8] sm:$0xff] }
 0x2e1   : > { %v4351_v34 = vld [vmem:[%s10106_s3 + $0xa08] sm:$0xff] }
 0x2e2   : > { %5368 = vmatpush1.bf16.msra.mxu0 %v5367_v50  ;;  %5432 = vmatpush1.bf16.msra.mxu1 %v5431_v51  ;;  %v5451_v50 = vpack.c.bf16 %v2096_v44, %v2092_v43  ;;  %v2098_v51 = vld [vmem:[%s10106_s3 + $0x3c0] sm:$0xff]  ;;  %v4312_v44 = vld [vmem:[%s10106_s3 + $0x8d0] sm:$0xff] }
 0x2e3   : > { %5370 = vmatprep.subr.bf16.mxu0 %v5369_v54  ;;  %5434 = vmatprep.subr.bf16.mxu1 %v5433_v55  ;;  %v5453_v54 = vpack.c.bf16 %v2105_v48, %v2101_v47  ;;  %v2100_v55 = vld [vmem:[%s10106_s3 + $0x3d0] sm:$0xff]  ;;  %v5391_v62 = vpack.c.bf16 %v2102_v52, %v2098_v51  ;;  %v4314_v43 = vld [vmem:[%s10106_s3 + $0x8e0] sm:$0xff]  ;;  %v4319_v47 = vld [vmem:[%s10106_s3 + $0x908] sm:$0xff]  ;;  %v5535_v52 = vpack.c.bf16 %v4316_v46, %v4312_v44 }
 0x2e4   : > { %v4323_v48 = vld [vmem:[%s10106_s3 + $0x928] sm:$0xff] }
 0x2e5   : > { %v4359_v46 = vld [vmem:[%s10106_s3 + $0xa48] sm:$0xff] }
 0x2e6   : > { %5372 = vmatpush1.bf16.msra.mxu0 %v5371_v63  ;;  %5436 = vmatpush1.bf16.msra.mxu1 %v5435_v0  ;;  %v5455_v63 = vpack.c.bf16 %v2104_v56, %v2100_v55  ;;  %v5457_v0 = vpack.c.bf16 %v4291_v58, %v4287_v57  ;;  %v4322_v55 = vld [vmem:[%s10106_s3 + $0x920] sm:$0xff]  ;;  %v4320_v56 = vld [vmem:[%s10106_s3 + $0x910] sm:$0xff] }
 0x2e7   : > { %5374 = vmatprep.subr.bf16.mxu0 %v5373_v3  ;;  %5438 = vmatprep.subr.bf16.mxu1 %v5437_v7  ;;  %v4290_v3 = vld [vmem:[%s10106_s3 + $0x820] sm:$0xff]  ;;  %v4288_v7 = vld [vmem:[%s10106_s3 + $0x810] sm:$0xff] }
 0x2e8   : > { %v5523_v13 = vpack.c.bf16 %v4292_v4, %v4288_v7  ;;  %v4324_v58 = vld [vmem:[%s10106_s3 + $0x930] sm:$0xff]  ;;  %v4330_v7 = vld [vmem:[%s10106_s3 + $0x960] sm:$0xff] }
 0x2e9   : > { %v4328_v4 = vld [vmem:[%s10106_s3 + $0x950] sm:$0xff] }
 0x2ea   : > { %5376 = vmatpush1.bf16.msra.mxu0 %v5375_v11  ;;  %5440 = vmatpush1.bf16.msra.mxu1 %v5439_v12  ;;  %v5459_v11 = vpack.c.bf16 %v4290_v3, %v4286_v2  ;;  %v4294_v12 = vld [vmem:[%s10106_s3 + $0x840] sm:$0xff]  ;;  %v5477_v2 = vpack.c.bf16 %v4331_v61, %v4327_v60  ;;  %v4371_v60 = vld [vmem:[%s10106_s3 + $0xaa8] sm:$0xff]  ;;  %v4369_v61 = vld [vmem:[%s10106_s3 + $0xa98] sm:$0xff] }
 0x2eb   : > { %5378 = vmatprep.subr.bf16.mxu0 %v5377_v16  ;;  %5442 = vmatprep.subr.bf16.mxu1 %v5441_v17  ;;  %v4296_v16 = vld [vmem:[%s10106_s3 + $0x850] sm:$0xff]  ;;  %v5463_v27 = vpack.c.bf16 %v4298_v15, %v4294_v12  ;;  %v4326_v3 = vld [vmem:[%s10106_s3 + $0x940] sm:$0xff]  ;;  %v5481_v15 = vpack.c.bf16 %v4339_v9, %v4335_v8  ;;  %v4379_v8 = vld [vmem:[%s10106_s3 + $0xae8] sm:$0xff] }
 0x2ec   : > { %v4300_v17 = vld [vmem:[%s10106_s3 + $0x870] sm:$0xff]  ;;  %v5479_v12 = vpack.c.bf16 %v4330_v7, %v4326_v3  ;;  %v4370_v3 = vld [vmem:[%s10106_s3 + $0xaa0] sm:$0xff]  ;;  %v4377_v9 = vld [vmem:[%s10106_s3 + $0xad8] sm:$0xff] }
 0x2ed   : > { %v5527_v28 = vpack.c.bf16 %v4300_v17, %v4296_v16  ;;  %v4334_v16 = vld [vmem:[%s10106_s3 + $0x980] sm:$0xff]  ;;  %v4368_v7 = vld [vmem:[%s10106_s3 + $0xa90] sm:$0xff] }
 0x2ee   : > { %5380 = vmatpush1.bf16.msra.mxu0 %v5379_v25  ;;  %5444 = vmatpush1.bf16.msra.mxu1 %v5443_v26  ;;  %v4305_v25 = vld [vmem:[%s10106_s3 + $0x898] sm:$0xff]  ;;  %v4338_v17 = vld [vmem:[%s10106_s3 + $0x9a0] sm:$0xff] }
 0x2ef   : > { %5382 = vmatprep.subr.bf16.mxu0 %v5381_v29  ;;  %5446 = vmatprep.subr.bf16.mxu1 %v5445_v30  ;;  %v4309_v26 = vld [vmem:[%s10106_s3 + $0x8b8] sm:$0xff]  ;;  %v5465_v29 = vpack.c.bf16 %v4307_v23, %v4303_v22  ;;  %v4302_v30 = vld [vmem:[%s10106_s3 + $0x880] sm:$0xff]  ;;  %v4347_v22 = vld [vmem:[%s10106_s3 + $0x9e8] sm:$0xff] }
 0x2f0   : > { %v5529_v33 = vpack.c.bf16 %v4309_v26, %v4305_v25  ;;  %v5467_v39 = vpack.c.bf16 %v4306_v31, %v4302_v30  ;;  %v4345_v23 = vld [vmem:[%s10106_s3 + $0x9d8] sm:$0xff]  ;;  %v5483_v26 = vpack.c.bf16 %v4338_v17, %v4334_v16  ;;  %v4346_v30 = vld [vmem:[%s10106_s3 + $0x9e0] sm:$0xff]  ;;  %v4344_v31 = vld [vmem:[%s10106_s3 + $0x9d0] sm:$0xff] }
 0x2f1   : > { %v4349_v25 = vld [vmem:[%s10106_s3 + $0x9f8] sm:$0xff]  ;;  %v4378_v16 = vld [vmem:[%s10106_s3 + $0xae0] sm:$0xff]  ;;  %v4376_v17 = vld [vmem:[%s10106_s3 + $0xad0] sm:$0xff] }
 0x2f2   : > { %5384 = vmatpush1.bf16.msra.mxu0 %v5383_v37  ;;  %5448 = vmatpush1.bf16.msra.mxu1 %v5447_v38  ;;  %v4313_v37 = vld [vmem:[%s10106_s3 + $0x8d8] sm:$0xff]  ;;  %v5549_v32 = vpack.c.bf16 %v4349_v25, %v4345_v23 }
 0x2f3   : > { %5386 = vmatprep.subr.bf16.mxu0 %v5385_v41  ;;  %5450 = vmatprep.subr.bf16.mxu1 %v5449_v42  ;;  %v4317_v38 = vld [vmem:[%s10106_s3 + $0x8f8] sm:$0xff]  ;;  %v5469_v41 = vpack.c.bf16 %v4315_v36, %v4311_v35  ;;  %v4310_v42 = vld [vmem:[%s10106_s3 + $0x8c0] sm:$0xff]  ;;  %v4355_v35 = vld [vmem:[%s10106_s3 + $0xa28] sm:$0xff] }
 0x2f4   : > { %v5533_v45 = vpack.c.bf16 %v4317_v38, %v4313_v37  ;;  %v5471_v51 = vpack.c.bf16 %v4314_v43, %v4310_v42  ;;  %v4353_v36 = vld [vmem:[%s10106_s3 + $0xa18] sm:$0xff]  ;;  %v4354_v42 = vld [vmem:[%s10106_s3 + $0xa20] sm:$0xff]  ;;  %v4352_v43 = vld [vmem:[%s10106_s3 + $0xa10] sm:$0xff] }
 0x2f5   : > { %v4357_v37 = vld [vmem:[%s10106_s3 + $0xa38] sm:$0xff] }
 0x2f6   : > { %5388 = vmatpush1.bf16.msra.mxu0 %v5387_v49  ;;  %5452 = vmatpush1.bf16.msra.mxu1 %v5451_v50  ;;  %v4321_v49 = vld [vmem:[%s10106_s3 + $0x918] sm:$0xff]  ;;  %v5553_v44 = vpack.c.bf16 %v4357_v37, %v4353_v36 }
 0x2f7   : > { %5390 = vmatprep.subr.bf16.mxu0 %v5389_v53  ;;  %5454 = vmatprep.subr.bf16.mxu1 %v5453_v54  ;;  %v4325_v50 = vld [vmem:[%s10106_s3 + $0x938] sm:$0xff]  ;;  %v5473_v53 = vpack.c.bf16 %v4323_v48, %v4319_v47  ;;  %v4318_v54 = vld [vmem:[%s10106_s3 + $0x900] sm:$0xff]  ;;  %v4363_v47 = vld [vmem:[%s10106_s3 + $0xa68] sm:$0xff] }
 0x2f8   : > { %v5537_v57 = vpack.c.bf16 %v4325_v50, %v4321_v49  ;;  %v4361_v48 = vld [vmem:[%s10106_s3 + $0xa58] sm:$0xff] }
 0x2f9   : > { %v4365_v49 = vld [vmem:[%s10106_s3 + $0xa78] sm:$0xff] }
 0x2fa   : > { %5392 = vmatpush1.bf16.msra.mxu0 %v5391_v62  ;;  %5456 = vmatpush1.bf16.msra.mxu1 %v5455_v63  ;;  %v4329_v62 = vld [vmem:[%s10106_s3 + $0x958] sm:$0xff] }
 0x2fb   : > { %5458 = vmatprep.subr.bf16.mxu0 %v5457_v0  ;;  %5522 = vmatprep.subr.bf16.mxu1 %v5521_v1  ;;  %v4333_v63 = vld [vmem:[%s10106_s3 + $0x978] sm:$0xff]  ;;  %v5475_v0 = vpack.c.bf16 %v4322_v55, %v4318_v54  ;;  %v5539_v1 = vpack.c.bf16 %v4324_v58, %v4320_v56  ;;  %v4362_v54 = vld [vmem:[%s10106_s3 + $0xa60] sm:$0xff]  ;;  %v4360_v55 = vld [vmem:[%s10106_s3 + $0xa50] sm:$0xff]  ;;  %v5557_v56 = vpack.c.bf16 %v4365_v49, %v4361_v48 }
 0x2fc   : > { %v5541_v5 = vpack.c.bf16 %v4333_v63, %v4329_v62  ;;  %v4367_v58 = vld [vmem:[%s10106_s3 + $0xa88] sm:$0xff]  ;;  %v4373_v62 = vld [vmem:[%s10106_s3 + $0xab8] sm:$0xff] }
 0x2fd   : > { %2450 = vmatmul.mubr.f32.vlgmr.msra.gmra.mrb[6].mxu0 %v1976_v18  ;;  %2521 = vmatmul.mubr.f32.vlgmr.msra.gmra.mrb[6].mxu1 %v1976_v18  ;;  %v4336_v18 = vld [vmem:[%s10106_s3 + $0x990] sm:$0xff]  ;;  %v4389_v23 = vld [vmem:[%s10106_s3 + $0xb38] sm:$0xff] }
 0x2fe   : > { %5460 = vmatpush1.bf16.msra.mxu0 %v5459_v11  ;;  %2728 = vmatprep.mubr.f32.mxu0 %v2661_v19  ;;  %v4341_v11 = vld [vmem:[%s10106_s3 + $0x9b8] sm:$0xff] }
 0x2ff   : > { %5524 = vmatpush1.bf16.msra.mxu1 %v5523_v13  ;;  %2799 = vmatprep.mubr.f32.mxu1 %v2661_v19  ;;  %v5543_v13 = vpack.c.bf16 %v4332_v6, %v4328_v4  ;;  %v5545_v19 = vpack.c.bf16 %v4341_v11, %v4337_v10  ;;  %v5561_v4 = vpack.c.bf16 %v4373_v62, %v4369_v61  ;;  %v4375_v6 = vld [vmem:[%s10106_s3 + $0xac8] sm:$0xff]  ;;  %v4381_v10 = vld [vmem:[%s10106_s3 + $0xaf8] sm:$0xff] }
 0x300   : > { %5462 = vmatprep.subr.bf16.mxu0 %v5461_v20  ;;  %5526 = vmatprep.subr.bf16.mxu1 %v5525_v21  ;;  %v4340_v20 = vld [vmem:[%s10106_s3 + $0x9b0] sm:$0xff]  ;;  %v4343_v21 = vld [vmem:[%s10106_s3 + $0x9c8] sm:$0xff]  ;;  %v4397_v36 = vld [vmem:[%s10106_s3 + $0xb78] sm:$0xff] }
 0x301   : > { %v4405_v48 = vld [vmem:[%s10106_s3 + $0xbb8] sm:$0xff] }
 0x302   : > { %5464 = vmatpush1.bf16.msra.mxu0 %v5463_v27  ;;  %v5547_v27 = vpack.c.bf16 %v4340_v20, %v4336_v18  ;;  %v5565_v18 = vpack.c.bf16 %v4381_v10, %v4377_v9  ;;  %v4383_v20 = vld [vmem:[%s10106_s3 + $0xb08] sm:$0xff]  ;;  %v4413_v61 = vld [vmem:[%s10106_s3 + $0xbf8] sm:$0xff] }
 0x303   : > { %5528 = vmatpush1.bf16.msra.mxu1 %v5527_v28  ;;  %5466 = vmatprep.subr.bf16.mxu0 %v5465_v29  ;;  %v5485_v28 = vpack.c.bf16 %v4347_v22, %v4343_v21  ;;  %v4342_v29 = vld [vmem:[%s10106_s3 + $0x9c0] sm:$0xff]  ;;  %v4387_v21 = vld [vmem:[%s10106_s3 + $0xb28] sm:$0xff]  ;;  %v4385_v22 = vld [vmem:[%s10106_s3 + $0xb18] sm:$0xff] }
 0x304   : > { %5530 = vmatprep.subr.bf16.mxu1 %v5529_v33  ;;  %v4348_v33 = vld [vmem:[%s10106_s3 + $0x9f0] sm:$0xff]  ;;  %v5487_v38 = vpack.c.bf16 %v4346_v30, %v4342_v29  ;;  %v4386_v29 = vld [vmem:[%s10106_s3 + $0xb20] sm:$0xff]  ;;  %v4421_v9 = vld [vmem:[%s10107_s4 + $0x438] sm:$0xff] }
 0x305   : > { %v4384_v30 = vld [vmem:[%s10106_s3 + $0xb10] sm:$0xff] }
 0x306   : > { %5468 = vmatpush1.bf16.msra.mxu0 %v5467_v39  ;;  %v5551_v39 = vpack.c.bf16 %v4348_v33, %v4344_v31  ;;  %v5569_v31 = vpack.c.bf16 %v4389_v23, %v4385_v22  ;;  %v4391_v33 = vld [vmem:[%s10106_s3 + $0xb48] sm:$0xff]  ;;  %v4425_v22 = vld [vmem:[%s10107_s4 + $0x458] sm:$0xff] }
 0x307   : > { %5532 = vmatpush1.bf16.msra.mxu1 %v5531_v40  ;;  %5470 = vmatprep.subr.bf16.mxu0 %v5469_v41  ;;  %v5489_v40 = vpack.c.bf16 %v4355_v35, %v4351_v34  ;;  %v4350_v41 = vld [vmem:[%s10106_s3 + $0xa00] sm:$0xff]  ;;  %v4395_v34 = vld [vmem:[%s10106_s3 + $0xb68] sm:$0xff]  ;;  %v4393_v35 = vld [vmem:[%s10106_s3 + $0xb58] sm:$0xff] }
 0x308   : > { %5534 = vmatprep.subr.bf16.mxu1 %v5533_v45  ;;  %v4356_v45 = vld [vmem:[%s10106_s3 + $0xa30] sm:$0xff]  ;;  %v5491_v50 = vpack.c.bf16 %v4354_v42, %v4350_v41  ;;  %v4394_v41 = vld [vmem:[%s10106_s3 + $0xb60] sm:$0xff]  ;;  %v4429_v23 = vld [vmem:[%s10107_s4 + $0x478] sm:$0xff] }
 0x309   : > { %v4392_v42 = vld [vmem:[%s10106_s3 + $0xb50] sm:$0xff] }
 0x30a   : > { %5472 = vmatpush1.bf16.msra.mxu0 %v5471_v51  ;;  %v5555_v51 = vpack.c.bf16 %v4356_v45, %v4352_v43  ;;  %v5573_v43 = vpack.c.bf16 %v4397_v36, %v4393_v35  ;;  %v4399_v45 = vld [vmem:[%s10106_s3 + $0xb88] sm:$0xff]  ;;  %v4433_v36 = vld [vmem:[%s10107_s4 + $0x498] sm:$0xff] }
 0x30b   : > { %5536 = vmatpush1.bf16.msra.mxu1 %v5535_v52  ;;  %5474 = vmatprep.subr.bf16.mxu0 %v5473_v53  ;;  %v5493_v52 = vpack.c.bf16 %v4363_v47, %v4359_v46  ;;  %v4358_v53 = vld [vmem:[%s10106_s3 + $0xa40] sm:$0xff]  ;;  %v4403_v46 = vld [vmem:[%s10106_s3 + $0xba8] sm:$0xff]  ;;  %v4401_v47 = vld [vmem:[%s10106_s3 + $0xb98] sm:$0xff] }
 0x30c   : > { %5538 = vmatprep.subr.bf16.mxu1 %v5537_v57  ;;  %v4364_v57 = vld [vmem:[%s10106_s3 + $0xa70] sm:$0xff]  ;;  %v5495_v63 = vpack.c.bf16 %v4362_v54, %v4358_v53  ;;  %v4402_v53 = vld [vmem:[%s10106_s3 + $0xba0] sm:$0xff]  ;;  %v4435_v35 = vld [vmem:[%s10107_s4 + $0x4a8] sm:$0xff] }
 0x30d   : > { %v4400_v54 = vld [vmem:[%s10106_s3 + $0xb90] sm:$0xff] }
 0x30e   : > { %5476 = vmatpush1.bf16.msra.mxu0 %v5475_v0  ;;  %v5559_v0 = vpack.c.bf16 %v4364_v57, %v4360_v55  ;;  %v5577_v55 = vpack.c.bf16 %v4405_v48, %v4401_v47  ;;  %v4407_v57 = vld [vmem:[%s10106_s3 + $0xbc8] sm:$0xff]  ;;  %v4441_v48 = vld [vmem:[%s10107_s4 + $0x4d8] sm:$0xff] }
 0x30f   : > { %5540 = vmatpush1.bf16.msra.mxu1 %v5539_v1  ;;  %5478 = vmatprep.subr.bf16.mxu0 %v5477_v2  ;;  %v5497_v1 = vpack.c.bf16 %v4371_v60, %v4367_v58  ;;  %v4366_v2 = vld [vmem:[%s10106_s3 + $0xa80] sm:$0xff]  ;;  %v4411_v58 = vld [vmem:[%s10106_s3 + $0xbe8] sm:$0xff]  ;;  %v4409_v60 = vld [vmem:[%s10106_s3 + $0xbd8] sm:$0xff] }
 0x310   : > { %5542 = vmatprep.subr.bf16.mxu1 %v5541_v5  ;;  %v4372_v5 = vld [vmem:[%s10106_s3 + $0xab0] sm:$0xff]  ;;  %v5499_v11 = vpack.c.bf16 %v4370_v3, %v4366_v2  ;;  %v4410_v2 = vld [vmem:[%s10106_s3 + $0xbe0] sm:$0xff]  ;;  %v4443_v47 = vld [vmem:[%s10107_s4 + $0x4e8] sm:$0xff] }
 0x311   : > { %v4408_v3 = vld [vmem:[%s10106_s3 + $0xbd0] sm:$0xff] }
 0x312   : > { %5480 = vmatpush1.bf16.msra.mxu0 %v5479_v12  ;;  %v5563_v12 = vpack.c.bf16 %v4372_v5, %v4368_v7  ;;  %v5581_v7 = vpack.c.bf16 %v4413_v61, %v4409_v60  ;;  %v4415_v5 = vld [vmem:[%s10107_s4 + $0x408] sm:$0xff]  ;;  %v4449_v61 = vld [vmem:[%s10107_s4 + $0x518] sm:$0xff] }
 0x313   : > { %5544 = vmatpush1.bf16.msra.mxu1 %v5543_v13  ;;  %5482 = vmatprep.subr.bf16.mxu0 %v5481_v15  ;;  %v5501_v13 = vpack.c.bf16 %v4379_v8, %v4375_v6  ;;  %v4374_v15 = vld [vmem:[%s10106_s3 + $0xac0] sm:$0xff]  ;;  %v4419_v6 = vld [vmem:[%s10107_s4 + $0x428] sm:$0xff]  ;;  %v4417_v8 = vld [vmem:[%s10107_s4 + $0x418] sm:$0xff] }
 0x314   : > { %5546 = vmatprep.subr.bf16.mxu1 %v5545_v19  ;;  %v4380_v19 = vld [vmem:[%s10106_s3 + $0xaf0] sm:$0xff]  ;;  %v5503_v25 = vpack.c.bf16 %v4378_v16, %v4374_v15  ;;  %v4414_v15 = vld [vmem:[%s10107_s4 + $0x400] sm:$0xff]  ;;  %v4451_v60 = vld [vmem:[%s10107_s4 + $0x528] sm:$0xff] }
 0x315   : > { %v4418_v16 = vld [vmem:[%s10107_s4 + $0x420] sm:$0xff] }
 0x316   : > { %5484 = vmatpush1.bf16.msra.mxu0 %v5483_v26  ;;  %v5567_v26 = vpack.c.bf16 %v4380_v19, %v4376_v17  ;;  %v4416_v17 = vld [vmem:[%s10107_s4 + $0x410] sm:$0xff] }
 0x317   : > { %5548 = vmatpush1.bf16.msra.mxu1 %v5547_v27  ;;  %5486 = vmatprep.subr.bf16.mxu0 %v5485_v28  ;;  %v5505_v27 = vpack.c.bf16 %v4387_v21, %v4383_v20  ;;  %v4382_v28 = vld [vmem:[%s10106_s3 + $0xb00] sm:$0xff]  ;;  %v4420_v19 = vld [vmem:[%s10107_s4 + $0x430] sm:$0xff]  ;;  %v4423_v20 = vld [vmem:[%s10107_s4 + $0x448] sm:$0xff] }
 0x318   : > { %5550 = vmatprep.subr.bf16.mxu1 %v5549_v32  ;;  %v4388_v32 = vld [vmem:[%s10106_s3 + $0xb30] sm:$0xff]  ;;  %v5507_v37 = vpack.c.bf16 %v4386_v29, %v4382_v28  ;;  %v4427_v21 = vld [vmem:[%s10107_s4 + $0x468] sm:$0xff]  ;;  %v4422_v29 = vld [vmem:[%s10107_s4 + $0x440] sm:$0xff] }
 0x319   : > { %v5589_v28 = vpack.c.bf16 %v4427_v21, %v4423_v20  ;;  %v4463_v20 = vld [vmem:[%s10107_s4 + $0x588] sm:$0xff] }
 0x31a   : > { %5488 = vmatpush1.bf16.msra.mxu0 %v5487_v38  ;;  %v5571_v38 = vpack.c.bf16 %v4388_v32, %v4384_v30  ;;  %v4426_v30 = vld [vmem:[%s10107_s4 + $0x460] sm:$0xff]  ;;  %v5653_v32 = vpack.c.bf16 %v4429_v23, %v4425_v22  ;;  %v4467_v21 = vld [vmem:[%s10107_s4 + $0x5a8] sm:$0xff]  ;;  %v4465_v22 = vld [vmem:[%s10107_s4 + $0x598] sm:$0xff] }
 0x31b   : > { %5552 = vmatpush1.bf16.msra.mxu1 %v5551_v39  ;;  %5490 = vmatprep.subr.bf16.mxu0 %v5489_v40  ;;  %v5509_v39 = vpack.c.bf16 %v4395_v34, %v4391_v33  ;;  %v4390_v40 = vld [vmem:[%s10106_s3 + $0xb40] sm:$0xff]  ;;  %v4428_v33 = vld [vmem:[%s10107_s4 + $0x470] sm:$0xff]  ;;  %v4431_v34 = vld [vmem:[%s10107_s4 + $0x488] sm:$0xff] }
 0x31c   : > { %5554 = vmatprep.subr.bf16.mxu1 %v5553_v44  ;;  %v4396_v44 = vld [vmem:[%s10106_s3 + $0xb70] sm:$0xff]  ;;  %v5511_v49 = vpack.c.bf16 %v4394_v41, %v4390_v40  ;;  %v5593_v40 = vpack.c.bf16 %v4435_v35, %v4431_v34  ;;  %v4430_v41 = vld [vmem:[%s10107_s4 + $0x480] sm:$0xff]  ;;  %v4469_v23 = vld [vmem:[%s10107_s4 + $0x5b8] sm:$0xff] }
 0x31d   : > { %v4475_v34 = vld [vmem:[%s10107_s4 + $0x5e8] sm:$0xff]  ;;  %v4473_v35 = vld [vmem:[%s10107_s4 + $0x5d8] sm:$0xff] }
 0x31e   : > { %5492 = vmatpush1.bf16.msra.mxu0 %v5491_v50  ;;  %v5575_v50 = vpack.c.bf16 %v4396_v44, %v4392_v42  ;;  %v4434_v42 = vld [vmem:[%s10107_s4 + $0x4a0] sm:$0xff] }
 0x31f   : > { %5556 = vmatpush1.bf16.msra.mxu1 %v5555_v51  ;;  %5494 = vmatprep.subr.bf16.mxu0 %v5493_v52  ;;  %v5513_v51 = vpack.c.bf16 %v4403_v46, %v4399_v45  ;;  %v4398_v52 = vld [vmem:[%s10106_s3 + $0xb80] sm:$0xff]  ;;  %v4436_v45 = vld [vmem:[%s10107_s4 + $0x4b0] sm:$0xff]  ;;  %v4439_v46 = vld [vmem:[%s10107_s4 + $0x4c8] sm:$0xff] }
 0x320   : > { %5558 = vmatprep.subr.bf16.mxu1 %v5557_v56  ;;  %v4404_v56 = vld [vmem:[%s10106_s3 + $0xbb0] sm:$0xff]  ;;  %v5515_v62 = vpack.c.bf16 %v4402_v53, %v4398_v52  ;;  %v5597_v52 = vpack.c.bf16 %v4443_v47, %v4439_v46  ;;  %v4438_v53 = vld [vmem:[%s10107_s4 + $0x4c0] sm:$0xff]  ;;  %v4483_v46 = vld [vmem:[%s10107_s4 + $0x628] sm:$0xff] }
 0x321   : > { %v4481_v47 = vld [vmem:[%s10107_s4 + $0x618] sm:$0xff] }
 0x322   : > { %5496 = vmatpush1.bf16.msra.mxu0 %v5495_v63  ;;  %v5579_v63 = vpack.c.bf16 %v4404_v56, %v4400_v54  ;;  %v4442_v54 = vld [vmem:[%s10107_s4 + $0x4e0] sm:$0xff] }
 0x323   : > { %5560 = vmatpush1.bf16.msra.mxu1 %v5559_v0  ;;  %5498 = vmatprep.subr.bf16.mxu0 %v5497_v1  ;;  %v5517_v0 = vpack.c.bf16 %v4411_v58, %v4407_v57  ;;  %v4406_v1 = vld [vmem:[%s10106_s3 + $0xbc0] sm:$0xff]  ;;  %v4444_v57 = vld [vmem:[%s10107_s4 + $0x4f0] sm:$0xff]  ;;  %v4447_v58 = vld [vmem:[%s10107_s4 + $0x508] sm:$0xff] }
 0x324   : > { %5562 = vmatprep.subr.bf16.mxu1 %v5561_v4  ;;  %v4412_v4 = vld [vmem:[%s10106_s3 + $0xbf0] sm:$0xff]  ;;  %v5519_v10 = vpack.c.bf16 %v4410_v2, %v4406_v1  ;;  %v5601_v1 = vpack.c.bf16 %v4451_v60, %v4447_v58  ;;  %v4446_v2 = vld [vmem:[%s10107_s4 + $0x500] sm:$0xff]  ;;  %v4487_v60 = vld [vmem:[%s10107_s4 + $0x648] sm:$0xff] }
 0x326   : > { %5500 = vmatpush1.bf16.msra.mxu0 %v5499_v11  ;;  %v2527_v11 = vld [vmem:[#allocation4] sm:$0x3c] }
 0x327   : > { %5564 = vmatpush1.bf16.msra.mxu1 %v5563_v12  ;;  %5502 = vmatprep.subr.bf16.mxu0 %v5501_v13  ;;  %v5583_v12 = vpack.c.bf16 %v4412_v4, %v4408_v3  ;;  %v5585_v13 = vpack.c.bf16 %v4419_v6, %v4415_v5  ;;  %v4450_v3 = vld [vmem:[%s10107_s4 + $0x520] sm:$0xff]  ;;  %v4452_v5 = vld [vmem:[%s10107_s4 + $0x530] sm:$0xff]  ;;  %v4455_v6 = vld [vmem:[%s10107_s4 + $0x548] sm:$0xff] }
 0x328   : > { %5566 = vmatprep.subr.bf16.mxu1 %v5565_v18  ;;  %v5649_v18 = vpack.c.bf16 %v4421_v9, %v4417_v8  ;;  %v4459_v8 = vld [vmem:[%s10107_s4 + $0x568] sm:$0xff]  ;;  %v4457_v9 = vld [vmem:[%s10107_s4 + $0x558] sm:$0xff] }
 0x32a   : > { %5504 = vmatpush1.bf16.msra.mxu0 %v5503_v25  ;;  %v5587_v25 = vpack.c.bf16 %v4418_v16, %v4414_v15  ;;  %v4454_v15 = vld [vmem:[%s10107_s4 + $0x540] sm:$0xff] }
 0x32b   : > { %5568 = vmatpush1.bf16.msra.mxu1 %v5567_v26  ;;  %5506 = vmatprep.subr.bf16.mxu0 %v5505_v27  ;;  %v2660_v26 = vrot.slane %v2527_v11, 2  ;;  %v5651_v27 = vpack.c.bf16 %v4420_v19, %v4416_v17  ;;  %v5603_v11 = vpack.c.bf16 %v4450_v3, %v4446_v2  ;;  %v4458_v16 = vld [vmem:[%s10107_s4 + $0x560] sm:$0xff]  ;;  %v4456_v17 = vld [vmem:[%s10107_s4 + $0x550] sm:$0xff] }
 0x32c   : > { %5570 = vmatprep.subr.bf16.mxu1 %v5569_v31  ;;  %v4424_v31 = vld [vmem:[%s10107_s4 + $0x450] sm:$0xff]  ;;  %v4490_v2 = vld [vmem:[%s10107_s4 + $0x660] sm:$0xff] }
 0x32d   : > { %v4460_v19 = vld [vmem:[%s10107_s4 + $0x570] sm:$0xff] }
 0x32e   : > { %5508 = vmatpush1.bf16.msra.mxu0 %v5507_v37  ;;  %v4437_v37 = vld [vmem:[%s10107_s4 + $0x4b8] sm:$0xff] }
 0x32f   : > { %5572 = vmatpush1.bf16.msra.mxu1 %v5571_v38  ;;  %5510 = vmatprep.subr.bf16.mxu0 %v5509_v39  ;;  %v5591_v38 = vpack.c.bf16 %v4426_v30, %v4422_v29  ;;  %v5655_v39 = vpack.c.bf16 %v4428_v33, %v4424_v31  ;;  %v5657_v44 = vpack.c.bf16 %v4437_v37, %v4433_v36  ;;  %v4466_v29 = vld [vmem:[%s10107_s4 + $0x5a0] sm:$0xff]  ;;  %v4464_v30 = vld [vmem:[%s10107_s4 + $0x590] sm:$0xff]  ;;  %v4471_v33 = vld [vmem:[%s10107_s4 + $0x5c8] sm:$0xff] }
 0x330   : > { %5574 = vmatprep.subr.bf16.mxu1 %v5573_v43  ;;  %v4432_v43 = vld [vmem:[%s10107_s4 + $0x490] sm:$0xff]  ;;  %v5673_v31 = vpack.c.bf16 %v4469_v23, %v4465_v22  ;;  %v4477_v36 = vld [vmem:[%s10107_s4 + $0x5f8] sm:$0xff]  ;;  %v4507_v22 = vld [vmem:[%s10107_s4 + $0x6e8] sm:$0xff] }
 0x331   : > { %v4505_v23 = vld [vmem:[%s10107_s4 + $0x6d8] sm:$0xff] }
 0x332   : > { %5512 = vmatpush1.bf16.msra.mxu0 %v5511_v49  ;;  %v4445_v49 = vld [vmem:[%s10107_s4 + $0x4f8] sm:$0xff] }
 0x333   : > { %5576 = vmatpush1.bf16.msra.mxu1 %v5575_v50  ;;  %5514 = vmatprep.subr.bf16.mxu0 %v5513_v51  ;;  %v5595_v50 = vpack.c.bf16 %v4434_v42, %v4430_v41  ;;  %v5659_v51 = vpack.c.bf16 %v4436_v45, %v4432_v43  ;;  %v5661_v56 = vpack.c.bf16 %v4445_v49, %v4441_v48  ;;  %v4474_v41 = vld [vmem:[%s10107_s4 + $0x5e0] sm:$0xff]  ;;  %v4472_v42 = vld [vmem:[%s10107_s4 + $0x5d0] sm:$0xff]  ;;  %v4479_v45 = vld [vmem:[%s10107_s4 + $0x608] sm:$0xff] }
 0x334   : > { %5578 = vmatprep.subr.bf16.mxu1 %v5577_v55  ;;  %v4440_v55 = vld [vmem:[%s10107_s4 + $0x4d0] sm:$0xff]  ;;  %v5677_v43 = vpack.c.bf16 %v4477_v36, %v4473_v35  ;;  %v4485_v48 = vld [vmem:[%s10107_s4 + $0x638] sm:$0xff]  ;;  %v4515_v35 = vld [vmem:[%s10107_s4 + $0x728] sm:$0xff] }
 0x335   : > { %v4513_v36 = vld [vmem:[%s10107_s4 + $0x718] sm:$0xff] }
 0x336   : > { %5516 = vmatpush1.bf16.msra.mxu0 %v5515_v62  ;;  %v4453_v62 = vld [vmem:[%s10107_s4 + $0x538] sm:$0xff] }
 0x337   : > { %5580 = vmatpush1.bf16.msra.mxu1 %v5579_v63  ;;  %5518 = vmatprep.subr.bf16.mxu0 %v5517_v0  ;;  %v5599_v63 = vpack.c.bf16 %v4442_v54, %v4438_v53  ;;  %v5663_v0 = vpack.c.bf16 %v4444_v57, %v4440_v55  ;;  %v5665_v4 = vpack.c.bf16 %v4453_v62, %v4449_v61  ;;  %v4478_v53 = vld [vmem:[%s10107_s4 + $0x600] sm:$0xff]  ;;  %v4480_v55 = vld [vmem:[%s10107_s4 + $0x610] sm:$0xff]  ;;  %v4491_v61 = vld [vmem:[%s10107_s4 + $0x668] sm:$0xff] }
 0x338   : > { %5582 = vmatprep.subr.bf16.mxu1 %v5581_v7  ;;  %v4448_v7 = vld [vmem:[%s10107_s4 + $0x510] sm:$0xff]  ;;  %v4482_v54 = vld [vmem:[%s10107_s4 + $0x620] sm:$0xff]  ;;  %v4489_v62 = vld [vmem:[%s10107_s4 + $0x658] sm:$0xff] }
 0x339   : > { %v4484_v57 = vld [vmem:[%s10107_s4 + $0x630] sm:$0xff] }
 0x33a   : > { %5520 = vmatpush1.bf16.msra.mxu0 %v5519_v10  ;;  %v4461_v10 = vld [vmem:[%s10107_s4 + $0x578] sm:$0xff]  ;;  %v5683_v58 = vpack.c.bf16 %v4484_v57, %v4480_v55  ;;  %v4520_v55 = vld [vmem:[%s10107_s4 + $0x750] sm:$0xff] }
 0x33b   : > { %5584 = vmatpush1.bf16.msra.mxu1 %v5583_v12  ;;  %5586 = vmatprep.subr.bf16.mxu0 %v5585_v13  ;;  %v5667_v12 = vpack.c.bf16 %v4452_v5, %v4448_v7  ;;  %v5605_v13 = vpack.c.bf16 %v4459_v8, %v4455_v6  ;;  %v4492_v5 = vld [vmem:[%s10107_s4 + $0x670] sm:$0xff]  ;;  %v4495_v8 = vld [vmem:[%s10107_s4 + $0x688] sm:$0xff] }
 0x33c   : > { %5650 = vmatprep.subr.bf16.mxu1 %v5649_v18  ;;  %v5669_v18 = vpack.c.bf16 %v4461_v10, %v4457_v9  ;;  %v4499_v9 = vld [vmem:[%s10107_s4 + $0x6a8] sm:$0xff]  ;;  %v4497_v10 = vld [vmem:[%s10107_s4 + $0x698] sm:$0xff] }
 0x33d   : > { %2729 = vmatmul.mubr.f32.vlgmr.msra.gmra.mrb[6].mxu0 %v2660_v26 }
 0x33e   : > { %2800 = vmatmul.mubr.f32.vlgmr.msra.gmra.mrb[6].mxu1 %v2660_v26  ;;  %5588 = vmatpush1.bf16.msra.mxu0 %v5587_v25  ;;  %v5607_v25 = vpack.c.bf16 %v4458_v16, %v4454_v15  ;;  %v5671_v26 = vpack.c.bf16 %v4460_v19, %v4456_v17  ;;  %v4498_v15 = vld [vmem:[%s10107_s4 + $0x6a0] sm:$0xff]  ;;  %v4500_v19 = vld [vmem:[%s10107_s4 + $0x6b0] sm:$0xff] }
 0x33f   : > { %5652 = vmatpush1.bf16.msra.mxu1 %v5651_v27  ;;  %5590 = vmatprep.subr.bf16.mxu0 %v5589_v28  ;;  %v5609_v27 = vpack.c.bf16 %v4467_v21, %v4463_v20  ;;  %v4462_v28 = vld [vmem:[%s10107_s4 + $0x580] sm:$0xff]  ;;  %v4503_v21 = vld [vmem:[%s10107_s4 + $0x6c8] sm:$0xff] }
 0x340   : > { %5654 = vmatprep.subr.bf16.mxu1 %v5653_v32  ;;  %v4468_v32 = vld [vmem:[%s10107_s4 + $0x5b0] sm:$0xff]  ;;  %v5611_v37 = vpack.c.bf16 %v4466_v29, %v4462_v28  ;;  %v4506_v28 = vld [vmem:[%s10107_s4 + $0x6e0] sm:$0xff] }
 0x342   : > { %5592 = vmatpush1.bf16.msra.mxu0 %v5591_v38  ;;  %v5675_v38 = vpack.c.bf16 %v4468_v32, %v4464_v30  ;;  %v4508_v32 = vld [vmem:[%s10107_s4 + $0x6f0] sm:$0xff] }
 0x343   : > { %5656 = vmatpush1.bf16.msra.mxu1 %v5655_v39  ;;  %5594 = vmatprep.subr.bf16.mxu0 %v5593_v40  ;;  %v5613_v39 = vpack.c.bf16 %v4475_v34, %v4471_v33  ;;  %v4470_v40 = vld [vmem:[%s10107_s4 + $0x5c0] sm:$0xff]  ;;  %v4511_v34 = vld [vmem:[%s10107_s4 + $0x708] sm:$0xff] }
 0x344   : > { %5658 = vmatprep.subr.bf16.mxu1 %v5657_v44  ;;  %v4476_v44 = vld [vmem:[%s10107_s4 + $0x5f0] sm:$0xff]  ;;  %v5615_v49 = vpack.c.bf16 %v4474_v41, %v4470_v40  ;;  %v4514_v40 = vld [vmem:[%s10107_s4 + $0x720] sm:$0xff] }
 0x346   : > { %5596 = vmatpush1.bf16.msra.mxu0 %v5595_v50  ;;  %v5679_v50 = vpack.c.bf16 %v4476_v44, %v4472_v42  ;;  %v4516_v44 = vld [vmem:[%s10107_s4 + $0x730] sm:$0xff] }
 0x347   : > { %5660 = vmatpush1.bf16.msra.mxu1 %v5659_v51  ;;  %5598 = vmatprep.subr.bf16.mxu0 %v5597_v52  ;;  %v5617_v51 = vpack.c.bf16 %v4483_v46, %v4479_v45  ;;  %v5681_v52 = vpack.c.bf16 %v4485_v48, %v4481_v47  ;;  %v4519_v46 = vld [vmem:[%s10107_s4 + $0x748] sm:$0xff]  ;;  %v4521_v48 = vld [vmem:[%s10107_s4 + $0x758] sm:$0xff] }
 0x348   : > { %5662 = vmatprep.subr.bf16.mxu1 %v5661_v56  ;;  %v5619_v56 = vpack.c.bf16 %v4482_v54, %v4478_v53  ;;  %v4523_v47 = vld [vmem:[%s10107_s4 + $0x768] sm:$0xff] }
 0x34a   : > { %5600 = vmatpush1.bf16.msra.mxu0 %v5599_v63  ;;  %v5621_v63 = vpack.c.bf16 %v4491_v61, %v4487_v60  ;;  %v4531_v60 = vld [vmem:[%s10107_s4 + $0x7a8] sm:$0xff]  ;;  %v4529_v61 = vld [vmem:[%s10107_s4 + $0x798] sm:$0xff] }
 0x34b   : > { %5664 = vmatpush1.bf16.msra.mxu1 %v5663_v0  ;;  %5602 = vmatprep.subr.bf16.mxu0 %v5601_v1  ;;  %v4493_v0 = vld [vmem:[%s10107_s4 + $0x678] sm:$0xff]  ;;  %v4486_v1 = vld [vmem:[%s10107_s4 + $0x640] sm:$0xff] }
 0x34c   : > { %5666 = vmatprep.subr.bf16.mxu1 %v5665_v4  ;;  %v5685_v3 = vpack.c.bf16 %v4493_v0, %v4489_v62  ;;  %v5623_v7 = vpack.c.bf16 %v4490_v2, %v4486_v1  ;;  %v4488_v4 = vld [vmem:[%s10107_s4 + $0x650] sm:$0xff]  ;;  %v4526_v0 = vld [vmem:[%s10107_s4 + $0x780] sm:$0xff] }
 0x34d   : > { %v5687_v6 = vpack.c.bf16 %v4492_v5, %v4488_v4  ;;  %v4530_v1 = vld [vmem:[%s10107_s4 + $0x7a0] sm:$0xff]  ;;  %v4532_v4 = vld [vmem:[%s10107_s4 + $0x7b0] sm:$0xff]  ;;  %v4535_v5 = vld [vmem:[%s10107_s4 + $0x7c8] sm:$0xff] }
 0x34e   : > { %5604 = vmatpush1.bf16.msra.mxu0 %v5603_v11  ;;  %v5625_v11 = vpack.c.bf16 %v4499_v9, %v4495_v8  ;;  %v4539_v8 = vld [vmem:[%s10107_s4 + $0x7e8] sm:$0xff]  ;;  %v4537_v9 = vld [vmem:[%s10107_s4 + $0x7d8] sm:$0xff] }
 0x34f   : > { %5668 = vmatpush1.bf16.msra.mxu1 %v5667_v12  ;;  %5606 = vmatprep.subr.bf16.mxu0 %v5605_v13  ;;  %v4501_v12 = vld [vmem:[%s10107_s4 + $0x6b8] sm:$0xff]  ;;  %v4494_v13 = vld [vmem:[%s10107_s4 + $0x680] sm:$0xff] }
 0x350   : > { %5670 = vmatprep.subr.bf16.mxu1 %v5669_v18  ;;  %v5689_v16 = vpack.c.bf16 %v4501_v12, %v4497_v10  ;;  %v5627_v17 = vpack.c.bf16 %v4498_v15, %v4494_v13  ;;  %v4496_v18 = vld [vmem:[%s10107_s4 + $0x690] sm:$0xff]  ;;  %v4541_v10 = vld [vmem:[%s10107_s4 + $0x7f8] sm:$0xff]  ;;  %v4534_v13 = vld [vmem:[%s10107_s4 + $0x7c0] sm:$0xff] }
 0x351   : > { %v5691_v20 = vpack.c.bf16 %v4500_v19, %v4496_v18  ;;  %v5709_v12 = vpack.c.bf16 %v4541_v10, %v4537_v9  ;;  %v4538_v15 = vld [vmem:[%s10107_s4 + $0x7e0] sm:$0xff]  ;;  %v4540_v18 = vld [vmem:[%s10107_s4 + $0x7f0] sm:$0xff] }
 0x352   : > { %5608 = vmatpush1.bf16.msra.mxu0 %v5607_v25  ;;  %v5629_v25 = vpack.c.bf16 %v4507_v22, %v4503_v21  ;;  %v2862_v21 = vld [vmem:[%s10107_s4 + $0x28] sm:$0xff]  ;;  %v2860_v22 = vld [vmem:[%s10107_s4 + $0x18] sm:$0xff] }
 0x353   : > { %5672 = vmatpush1.bf16.msra.mxu1 %v5671_v26  ;;  %5610 = vmatprep.subr.bf16.mxu0 %v5609_v27  ;;  %v4509_v26 = vld [vmem:[%s10107_s4 + $0x6f8] sm:$0xff]  ;;  %v4502_v27 = vld [vmem:[%s10107_s4 + $0x6c0] sm:$0xff] }
 0x354   : > { %5674 = vmatprep.subr.bf16.mxu1 %v5673_v31  ;;  %v5693_v29 = vpack.c.bf16 %v4509_v26, %v4505_v23  ;;  %v5631_v30 = vpack.c.bf16 %v4506_v28, %v4502_v27  ;;  %v4504_v31 = vld [vmem:[%s10107_s4 + $0x6d0] sm:$0xff] }
 0x355   : > { %v5695_v33 = vpack.c.bf16 %v4508_v32, %v4504_v31 }
 0x356   : > { %5612 = vmatpush1.bf16.msra.mxu0 %v5611_v37  ;;  %v5633_v37 = vpack.c.bf16 %v4515_v35, %v4511_v34 }
 0x357   : > { %5676 = vmatpush1.bf16.msra.mxu1 %v5675_v38  ;;  %5614 = vmatprep.subr.bf16.mxu0 %v5613_v39  ;;  %v4517_v38 = vld [vmem:[%s10107_s4 + $0x738] sm:$0xff]  ;;  %v4510_v39 = vld [vmem:[%s10107_s4 + $0x700] sm:$0xff] }
 0x358   : > { %5678 = vmatprep.subr.bf16.mxu1 %v5677_v43  ;;  %v5697_v41 = vpack.c.bf16 %v4517_v38, %v4513_v36  ;;  %v5635_v42 = vpack.c.bf16 %v4514_v40, %v4510_v39  ;;  %v4512_v43 = vld [vmem:[%s10107_s4 + $0x710] sm:$0xff] }
 0x359   : > { %v5699_v45 = vpack.c.bf16 %v4516_v44, %v4512_v43 }
 0x35a   : > { %5616 = vmatpush1.bf16.msra.mxu0 %v5615_v49  ;;  %v5637_v49 = vpack.c.bf16 %v4523_v47, %v4519_v46 }
 0x35b   : > { %5680 = vmatpush1.bf16.msra.mxu1 %v5679_v50  ;;  %5618 = vmatprep.subr.bf16.mxu0 %v5617_v51  ;;  %v4525_v50 = vld [vmem:[%s10107_s4 + $0x778] sm:$0xff]  ;;  %v4518_v51 = vld [vmem:[%s10107_s4 + $0x740] sm:$0xff] }
 0x35c   : > { %5682 = vmatprep.subr.bf16.mxu1 %v5681_v52  ;;  %v4522_v52 = vld [vmem:[%s10107_s4 + $0x760] sm:$0xff]  ;;  %v5701_v53 = vpack.c.bf16 %v4525_v50, %v4521_v48 }
 0x35d   : > { %v5639_v54 = vpack.c.bf16 %v4522_v52, %v4518_v51  ;;  %v2861_v50 = vld [vmem:[%s10107_s4 + $0x20] sm:$0xff]  ;;  %v2863_v52 = vld [vmem:[%s10107_s4 + $0x30] sm:$0xff] }
 0x35e   : > { %5620 = vmatpush1.bf16.msra.mxu0 %v5619_v56  ;;  %v4524_v56 = vld [vmem:[%s10107_s4 + $0x770] sm:$0xff] }
 0x35f   : > { %5684 = vmatpush1.bf16.msra.mxu1 %v5683_v58  ;;  %5622 = vmatprep.subr.bf16.mxu0 %v5621_v63  ;;  %v5703_v57 = vpack.c.bf16 %v4524_v56, %v4520_v55  ;;  %v4527_v58 = vld [vmem:[%s10107_s4 + $0x788] sm:$0xff]  ;;  %v4533_v63 = vld [vmem:[%s10107_s4 + $0x7b8] sm:$0xff] }
 0x360   : > { %5686 = vmatprep.subr.bf16.mxu1 %v5685_v3  ;;  %v5641_v62 = vpack.c.bf16 %v4531_v60, %v4527_v58  ;;  %v5705_v2 = vpack.c.bf16 %v4533_v63, %v4529_v61  ;;  %v5643_v3 = vpack.c.bf16 %v4530_v1, %v4526_v0  ;;  %v2868_v55 = vld [vmem:[%s10107_s4 + $0x58] sm:$0xff]  ;;  %v2869_v63 = vld [vmem:[%s10107_s4 + $0x60] sm:$0xff]  ;;  %v2867_v1 = vld [vmem:[%s10107_s4 + $0x50] sm:$0xff] }
 0x361   : > { %v2872_v56 = vld [vmem:[%s10107_s4 + $0x78] sm:$0xff] }
 0x362   : > { %5624 = vmatpush1.bf16.msra.mxu0 %v5623_v7  ;;  %v4528_v7 = vld [vmem:[%s10107_s4 + $0x790] sm:$0xff] }
 0x363   : > { %5688 = vmatpush1.bf16.msra.mxu1 %v5687_v6  ;;  %5626 = vmatprep.subr.bf16.mxu0 %v5625_v11  ;;  %v5707_v6 = vpack.c.bf16 %v4532_v4, %v4528_v7  ;;  %v5645_v11 = vpack.c.bf16 %v4539_v8, %v4535_v5  ;;  %v5781_v4 = vpack.c.bf16 %v2872_v56, %v2868_v55  ;;  %v2878_v5 = vld [vmem:[%s10107_s4 + $0xa8] sm:$0xff]  ;;  %v2880_v8 = vld [vmem:[%s10107_s4 + $0xb8] sm:$0xff] }
 0x364   : > { %5690 = vmatprep.subr.bf16.mxu1 %v5689_v16  ;;  %v4536_v16 = vld [vmem:[%s10107_s4 + $0x7d0] sm:$0xff]  ;;  %v2910_v55 = vld [vmem:[%s10107_s4 + $0x1a8] sm:$0xff]  ;;  %v2908_v56 = vld [vmem:[%s10107_s4 + $0x198] sm:$0xff] }
 0x365   : > { %v5711_v19 = vpack.c.bf16 %v4540_v18, %v4536_v16  ;;  %v2879_v18 = vld [vmem:[%s10107_s4 + $0xb0] sm:$0xff] }
 0x366   : > { %5628 = vmatpush1.bf16.msra.mxu0 %v5627_v17  ;;  %v5647_v17 = vpack.c.bf16 %v4538_v15, %v4534_v13  ;;  %v2877_v13 = vld [vmem:[%s10107_s4 + $0xa0] sm:$0xff] }
 0x367   : > { %5692 = vmatpush1.bf16.msra.mxu1 %v5691_v20  ;;  %5630 = vmatprep.subr.bf16.mxu0 %v5629_v25  ;;  %v2858_v20 = vld [vmem:[%s10107_s4 + $0x8] sm:$0xff]  ;;  %v2864_v25 = vld [vmem:[%s10107_s4 + $0x38] sm:$0xff] }
 0x368   : > { %5694 = vmatprep.subr.bf16.mxu1 %v5693_v29  ;;  %v5713_v23 = vpack.c.bf16 %v2862_v21, %v2858_v20  ;;  %v5777_v26 = vpack.c.bf16 %v2864_v25, %v2860_v22  ;;  %v2886_v20 = vld [vmem:[%s10107_s4 + $0xe8] sm:$0xff]  ;;  %v2884_v21 = vld [vmem:[%s10107_s4 + $0xd8] sm:$0xff] }
 0x369   : > { %v2888_v22 = vld [vmem:[%s10107_s4 + $0xf8] sm:$0xff] }
 0x36a   : > { %5632 = vmatpush1.bf16.msra.mxu0 %v5631_v30 }
 0x36b   : > { %5696 = vmatpush1.bf16.msra.mxu1 %v5695_v33  ;;  %5634 = vmatprep.subr.bf16.mxu0 %v5633_v37 }
 0x36c   : > { %5698 = vmatprep.subr.bf16.mxu1 %v5697_v41 }
 0x36e   : > { %5636 = vmatpush1.bf16.msra.mxu0 %v5635_v42 }
 0x36f   : > { %5700 = vmatpush1.bf16.msra.mxu1 %v5699_v45  ;;  %5638 = vmatprep.subr.bf16.mxu0 %v5637_v49  ;;  %v2857_v49 = vld [vmem:[%s10107_s4] sm:$0xff] }
 0x370   : > { %5702 = vmatprep.subr.bf16.mxu1 %v5701_v53  ;;  %v5715_v58 = vpack.c.bf16 %v2861_v50, %v2857_v49  ;;  %v2897_v50 = vld [vmem:[%s10107_s4 + $0x140] sm:$0xff] }
 0x372   : > { %5640 = vmatpush1.bf16.msra.mxu0 %v5639_v54  ;;  %v2870_v54 = vld [vmem:[%s10107_s4 + $0x68] sm:$0xff] }
 0x373   : > { %5704 = vmatpush1.bf16.msra.mxu1 %v5703_v57  ;;  %5642 = vmatprep.subr.bf16.mxu0 %v5641_v62  ;;  %v2865_v62 = vld [vmem:[%s10107_s4 + $0x40] sm:$0xff]  ;;  %v5717_v7 = vpack.c.bf16 %v2870_v54, %v2866_v24  ;;  %v2903_v24 = vld [vmem:[%s10107_s4 + $0x170] sm:$0xff]  ;;  %v2906_v54 = vld [vmem:[%s10107_s4 + $0x188] sm:$0xff] }
 0x374   : > { %5706 = vmatprep.subr.bf16.mxu1 %v5705_v2  ;;  %v2871_v2 = vld [vmem:[%s10107_s4 + $0x70] sm:$0xff]  ;;  %v5719_v10 = vpack.c.bf16 %v2869_v63, %v2865_v62  ;;  %v2905_v62 = vld [vmem:[%s10107_s4 + $0x180] sm:$0xff] }
 0x375   : > { %v2909_v63 = vld [vmem:[%s10107_s4 + $0x1a0] sm:$0xff] }
 0x376   : > { %5644 = vmatpush1.bf16.msra.mxu0 %v5643_v3  ;;  %v2874_v3 = vld [vmem:[%s10107_s4 + $0x88] sm:$0xff] }
 0x377   : > { %5708 = vmatpush1.bf16.msra.mxu1 %v5707_v6  ;;  %5646 = vmatprep.subr.bf16.mxu0 %v5645_v11  ;;  %v2876_v6 = vld [vmem:[%s10107_s4 + $0x98] sm:$0xff]  ;;  %v5783_v11 = vpack.c.bf16 %v2871_v2, %v2867_v1  ;;  %v5721_v15 = vpack.c.bf16 %v2878_v5, %v2874_v3  ;;  %v2907_v2 = vld [vmem:[%s10107_s4 + $0x190] sm:$0xff] }
 0x378   : > { %5710 = vmatprep.subr.bf16.mxu1 %v5709_v12  ;;  %v2873_v12 = vld [vmem:[%s10107_s4 + $0x80] sm:$0xff]  ;;  %v5785_v16 = vpack.c.bf16 %v2880_v8, %v2876_v6  ;;  %v2911_v3 = vld [vmem:[%s10107_s4 + $0x1b0] sm:$0xff]  ;;  %v2916_v5 = vld [vmem:[%s10107_s4 + $0x1d8] sm:$0xff]  ;;  %v5739_v8 = vpack.c.bf16 %v2909_v63, %v2905_v62 }
 0x379   : > { %v2920_v6 = vld [vmem:[%s10107_s4 + $0x1f8] sm:$0xff] }
 0x37a   : > { %5648 = vmatpush1.bf16.msra.mxu0 %v5647_v17  ;;  %v2875_v17 = vld [vmem:[%s10107_s4 + $0x90] sm:$0xff] }
 0x37b   : > { %5712 = vmatpush1.bf16.msra.mxu1 %v5711_v19  ;;  %5714 = vmatprep.subr.bf16.mxu0 %v5713_v23  ;;  %v2882_v19 = vld [vmem:[%s10107_s4 + $0xc8] sm:$0xff]  ;;  %v5723_v23 = vpack.c.bf16 %v2877_v13, %v2873_v12  ;;  %v5787_v25 = vpack.c.bf16 %v2879_v18, %v2875_v17  ;;  %v5805_v13 = vpack.c.bf16 %v2920_v6, %v2916_v5 }
 0x37c   : > { %5778 = vmatprep.subr.bf16.mxu1 %v5777_v26  ;;  %v2881_v26 = vld [vmem:[%s10107_s4 + $0xc0] sm:$0xff]  ;;  %v2922_v17 = vld [vmem:[%s10107_s4 + $0x208] sm:$0xff] }
 0x37d   : > { %v2926_v18 = vld [vmem:[%s10107_s4 + $0x228] sm:$0xff] }
 0x410   : > { %v2730_v27 = vpop.f32.mrb[6].mxu0 }
 0x411   : > { %vm2810_vm1 = vcmp.ge.f32.partialorder %v2730_v27, 0.0  ;;  %v2814_v28 = vmul.f32 0.2, %v2730_v27  ;;  %v2801_v29 = vpop.f32.mrb[6].mxu1  ;;  %v2732_v30 = vpop.f32.mrb[7].mxu0 }
 0x412   : > { %vm2812_vm2 = vcmp.ge.f32.partialorder %v2801_v29, 0.0  ;;  %v2816_v31 = vmul.f32 0.2, %v2801_v29  ;;  %vm2811_vm3 = vcmp.ge.f32.partialorder %v2732_v30, 0.0  ;;  %v2815_v32 = vmul.f32 0.2, %v2732_v30 }
 0x413   : > { %v2818_v33 = vsel %vm2810_vm1, %v2730_v27, %v2814_v28  ;;  %v2803_v34 = vpop.f32.mrb[7].mxu1  ;;  %v2885_v27 = vld [vmem:[%s10107_s4 + $0xe0] sm:$0xff]  ;;  %v5725_v28 = vpack.c.bf16 %v2886_v20, %v2882_v19  ;;  %v2924_v19 = vld [vmem:[%s10107_s4 + $0x218] sm:$0xff] }
 0x414   : > { %v2820_v35 = vsel %vm2812_vm2, %v2801_v29, %v2816_v31  ;;  %v2819_v36 = vsel %vm2811_vm3, %v2732_v30, %v2815_v32  ;;  %vm2813_vm4 = vcmp.ge.f32.partialorder %v2803_v34, 0.0  ;;  %v2817_v37 = vmul.f32 0.2, %v2803_v34  ;;  %v2883_v30 = vld [vmem:[%s10107_s4 + $0xd0] sm:$0xff]  ;;  %v2890_v32 = vld [vmem:[%s10107_s4 + $0x108] sm:$0xff]  ;;  %v2928_v20 = vld [vmem:[%s10107_s4 + $0x238] sm:$0xff] }
 0x415   : > { %v2822_v38 = vmax.f32 %v2818_v33, %v2820_v35  ;;  %v5789_v29 = vpack.c.bf16 %v2888_v22, %v2884_v21  ;;  %v2887_v31 = vld [vmem:[%s10107_s4 + $0xf0] sm:$0xff]  ;;  %v2894_v33 = vld [vmem:[%s10107_s4 + $0x128] sm:$0xff]  ;;  %v2896_v35 = vld [vmem:[%s10107_s4 + $0x138] sm:$0xff] }
 0x416   : > { %v2821_v39 = vsel %vm2813_vm4, %v2803_v34, %v2817_v37  ;;  %v2892_v34 = vld [vmem:[%s10107_s4 + $0x118] sm:$0xff]  ;;  %v5791_v37 = vpack.c.bf16 %v2887_v31, %v2883_v30  ;;  %v2930_v30 = vld [vmem:[%s10107_s4 + $0x248] sm:$0xff] }
 0x417   : > { %v2826_v40 = vrot.slane %v2822_v38, 1  ;;  %v2823_v41 = vmax.f32 %v2819_v36, %v2821_v39  ;;  %v5727_v36 = vpack.c.bf16 %v2885_v27, %v2881_v26  ;;  %v2893_v39 = vld [vmem:[%s10107_s4 + $0x120] sm:$0xff]  ;;  %v5745_v26 = vpack.c.bf16 %v2926_v18, %v2922_v17  ;;  %v2934_v31 = vld [vmem:[%s10107_s4 + $0x268] sm:$0xff]  ;;  %v2964_v17 = vld [vmem:[%s10107_s4 + $0x358] sm:$0xff] }
 0x418   : > { %v5809_v27 = vpack.c.bf16 %v2928_v20, %v2924_v19  ;;  %v2968_v18 = vld [vmem:[%s10107_s4 + $0x378] sm:$0xff] }
 0x419   : > { %v2830_v42 = vmax.f32 %v2822_v38, %v2826_v40  ;;  %v2827_v43 = vrot.slane %v2823_v41, 1  ;;  %v2889_v38 = vld [vmem:[%s10107_s4 + $0x100] sm:$0xff]  ;;  %v5729_v40 = vpack.c.bf16 %v2894_v33, %v2890_v32  ;;  %v2932_v32 = vld [vmem:[%s10107_s4 + $0x258] sm:$0xff] }
 0x41a   : > { %v2936_v33 = vld [vmem:[%s10107_s4 + $0x278] sm:$0xff] }
 0x41b   : > { %v2831_v44 = vmax.f32 %v2823_v41, %v2827_v43  ;;  %v5793_v41 = vpack.c.bf16 %v2896_v35, %v2892_v34  ;;  %v2895_v43 = vld [vmem:[%s10107_s4 + $0x130] sm:$0xff] }
 0x41d   : > { %v2834_v45 = vcombine.low %v2830_v42, %v2831_v44  ;;  %v2891_v42 = vld [vmem:[%s10107_s4 + $0x110] sm:$0xff]  ;;  %v2898_v44 = vld [vmem:[%s10107_s4 + $0x148] sm:$0xff] }
 0x41e   : > { %v5795_v49 = vpack.c.bf16 %v2895_v43, %v2891_v42  ;;  %v2938_v42 = vld [vmem:[%s10107_s4 + $0x288] sm:$0xff] }
 0x41f   : > { %v2841_v46 = vrot.slane %v2834_v45, %v6968_v14  ;;  %v2902_v45 = vld [vmem:[%s10107_s4 + $0x168] sm:$0xff] }
 0x420   : > { %v2942_v43 = vld [vmem:[%s10107_s4 + $0x2a8] sm:$0xff] }
 0x421   : > { %v2848_v47 = vrot.slane %v2841_v46, %v6968_v14  ;;  %v2859_v14 = vld [vmem:[%s10107_s4 + $0x10] sm:$0xff]  ;;  %v2900_v46 = vld [vmem:[%s10107_s4 + $0x158] sm:$0xff] }
 0x422   : > { %v5779_v60 = vpack.c.bf16 %v2863_v52, %v2859_v14  ;;  %v5733_v14 = vpack.c.bf16 %v2902_v45, %v2898_v44  ;;  %v2940_v44 = vld [vmem:[%s10107_s4 + $0x298] sm:$0xff] }
 0x423   : > { %2851 = vst.msk [vmem:[#allocation5 + $0x1] ss:$4 sm:$0x3] %vm6972_vm10, %v2848_v47  ;;  %v2852_v48 = vcombine.high %v2848_v47, %v2848_v47  ;;  %v2904_v47 = vld [vmem:[%s10107_s4 + $0x178] sm:$0xff] }
 0x424   : > { %v5797_v52 = vpack.c.bf16 %v2904_v47, %v2900_v46  ;;  %v2944_v45 = vld [vmem:[%s10107_s4 + $0x2b8] sm:$0xff] }
 0x425   : > { %2855 = vst.msk [vmem:[#allocation5 + $0x2] ss:$4 sm:$0x3] %vm6972_vm10, %v2852_v48  ;;  %v5731_v48 = vpack.c.bf16 %v2893_v39, %v2889_v38  ;;  %v5749_v38 = vpack.c.bf16 %v2934_v31, %v2930_v30  ;;  %v5813_v39 = vpack.c.bf16 %v2936_v33, %v2932_v32  ;;  %v2972_v30 = vld [vmem:[%s10107_s4 + $0x398] sm:$0xff]  ;;  %vm3738_vm10 = vcmask 0  }
 0x426   : > { %v2976_v31 = vld [vmem:[%s10107_s4 + $0x3b8] sm:$0xff] }
 0x42a   : > { %v9348_v61 = vld [vmem:[#allocation5] sm:$0x33] }
 0x42b   : > { %v3264_v9 = vcombine.high %v9348_v61, %v9348_v61 }
 0x42c   : > { %v2985_v51 = vld [vmem:[#allocation5] sm:$0x66] }
 0x42d   : > { %v3116_v53 = vcombine.high %v2985_v51, %v2985_v51  ;;  %v3117_v0 = vrot.slane %v2985_v51, 1  ;;  %v2901_v51 = vld [vmem:[%s10107_s4 + $0x160] sm:$0xff] }
 0x42f   : > { %v3118_v57 = vrot.slane %v3116_v53, 1  ;;  %v2899_v53 = vld [vmem:[%s10107_s4 + $0x150] sm:$0xff] }
 0x431   : > { %3185 = vmatprep.mubr.f32.mxu0 %v3118_v57  ;;  %3256 = vmatprep.mubr.f32.mxu1 %v3118_v57  ;;  %v2912_v57 = vld [vmem:[%s10107_s4 + $0x1b8] sm:$0xff] }
 0x432   : > { %3186 = vmatmul.mubr.f32.vlgmr.msra.gmra.mrb[8].mxu0 %v3117_v0  ;;  %3257 = vmatmul.mubr.f32.vlgmr.msra.gmra.mrb[8].mxu1 %v3117_v0  ;;  %v5737_v0 = vpack.c.bf16 %v2910_v55, %v2906_v54  ;;  %v5801_v1 = vpack.c.bf16 %v2912_v57, %v2908_v56  ;;  %v2948_v54 = vld [vmem:[%s10107_s4 + $0x2d8] sm:$0xff] }
 0x433   : > { %5716 = vmatpush1.bf16.msra.mxu0 %v5715_v58  ;;  %5780 = vmatpush1.bf16.msra.mxu1 %v5779_v60  ;;  %v5735_v58 = vpack.c.bf16 %v2901_v51, %v2897_v50  ;;  %v5799_v60 = vpack.c.bf16 %v2903_v24, %v2899_v53  ;;  %v5753_v50 = vpack.c.bf16 %v2942_v43, %v2938_v42  ;;  %v2946_v53 = vld [vmem:[%s10107_s4 + $0x2c8] sm:$0xff]  ;;  %v2952_v55 = vld [vmem:[%s10107_s4 + $0x2f8] sm:$0xff] }
 0x434   : > { %3330 = vmatprep.mubr.f32.mxu0 %v3264_v9  ;;  %3401 = vmatprep.mubr.f32.mxu1 %v3264_v9  ;;  %v5803_v9 = vpack.c.bf16 %v2911_v3, %v2907_v2  ;;  %v5817_v51 = vpack.c.bf16 %v2944_v45, %v2940_v44  ;;  %v2950_v24 = vld [vmem:[%s10107_s4 + $0x2e8] sm:$0xff]  ;;  %v5821_v63 = vpack.c.bf16 %v2952_v55, %v2948_v54  ;;  %v2980_v42 = vld [vmem:[%s10107_s4 + $0x3d8] sm:$0xff] }
 0x435   : > { %5718 = vmatprep.subr.bf16.mxu0 %v5717_v7  ;;  %5782 = vmatprep.subr.bf16.mxu1 %v5781_v4  ;;  %v2914_v7 = vld [vmem:[%s10107_s4 + $0x1c8] sm:$0xff]  ;;  %v5757_v62 = vpack.c.bf16 %v2950_v24, %v2946_v53  ;;  %v2984_v43 = vld [vmem:[%s10107_s4 + $0x3f8] sm:$0xff] }
 0x436   : > { %v2918_v4 = vld [vmem:[%s10107_s4 + $0x1e8] sm:$0xff]  ;;  %v4545_v53 = vld [vmem:[%s10107_s4 + $0x818] sm:$0xff] }
 0x437   : > { %5720 = vmatpush1.bf16.msra.mxu0 %v5719_v10  ;;  %5784 = vmatpush1.bf16.msra.mxu1 %v5783_v11  ;;  %v2913_v10 = vld [vmem:[%s10107_s4 + $0x1c0] sm:$0xff]  ;;  %v5741_v12 = vpack.c.bf16 %v2918_v4, %v2914_v7  ;;  %v2954_v2 = vld [vmem:[%s10107_s4 + $0x308] sm:$0xff]  ;;  %v2956_v7 = vld [vmem:[%s10107_s4 + $0x318] sm:$0xff] }
 0x438   : > { %5722 = vmatprep.subr.bf16.mxu0 %v5721_v15  ;;  %5786 = vmatprep.subr.bf16.mxu1 %v5785_v16  ;;  %v2917_v11 = vld [vmem:[%s10107_s4 + $0x1e0] sm:$0xff]  ;;  %v2915_v15 = vld [vmem:[%s10107_s4 + $0x1d0] sm:$0xff]  ;;  %v2958_v3 = vld [vmem:[%s10107_s4 + $0x328] sm:$0xff] }
 0x439   : > { %v2919_v16 = vld [vmem:[%s10107_s4 + $0x1f0] sm:$0xff]  ;;  %v5743_v21 = vpack.c.bf16 %v2917_v11, %v2913_v10  ;;  %v2960_v4 = vld [vmem:[%s10107_s4 + $0x338] sm:$0xff]  ;;  %v5761_v10 = vpack.c.bf16 %v2958_v3, %v2954_v2  ;;  %v9712_v54 = vld [vmem:[#allocation5] sm:$0xcc] }
 0x43a   : > { %v5807_v22 = vpack.c.bf16 %v2919_v16, %v2915_v15  ;;  %v5825_v11 = vpack.c.bf16 %v2960_v4, %v2956_v7  ;;  %v2962_v15 = vld [vmem:[%s10107_s4 + $0x348] sm:$0xff]  ;;  %v4549_v24 = vld [vmem:[%s10107_s4 + $0x838] sm:$0xff] }
 0x43b   : > { %5724 = vmatpush1.bf16.msra.mxu0 %v5723_v23  ;;  %5788 = vmatpush1.bf16.msra.mxu1 %v5787_v25  ;;  %v2921_v23 = vld [vmem:[%s10107_s4 + $0x200] sm:$0xff]  ;;  %v2966_v16 = vld [vmem:[%s10107_s4 + $0x368] sm:$0xff]  ;;  %v4553_v7 = vld [vmem:[%s10107_s4 + $0x858] sm:$0xff] }
 0x43c   : > { %5726 = vmatprep.subr.bf16.mxu0 %v5725_v28  ;;  %5790 = vmatprep.subr.bf16.mxu1 %v5789_v29  ;;  %v2925_v25 = vld [vmem:[%s10107_s4 + $0x220] sm:$0xff]  ;;  %v2923_v28 = vld [vmem:[%s10107_s4 + $0x210] sm:$0xff]  ;;  %v4551_v2 = vld [vmem:[%s10107_s4 + $0x848] sm:$0xff] }
 0x43d   : > { %v2927_v29 = vld [vmem:[%s10107_s4 + $0x230] sm:$0xff]  ;;  %v5747_v34 = vpack.c.bf16 %v2925_v25, %v2921_v23  ;;  %v5765_v23 = vpack.c.bf16 %v2966_v16, %v2962_v15  ;;  %v5829_v25 = vpack.c.bf16 %v2968_v18, %v2964_v17  ;;  %v4555_v3 = vld [vmem:[%s10107_s4 + $0x868] sm:$0xff]  ;;  %v4557_v4 = vld [vmem:[%s10107_s4 + $0x878] sm:$0xff] }
 0x43e   : > { %v5811_v35 = vpack.c.bf16 %v2927_v29, %v2923_v28  ;;  %v2970_v28 = vld [vmem:[%s10107_s4 + $0x388] sm:$0xff]  ;;  %v4556_v15 = vld [vmem:[%s10107_s4 + $0x870] sm:$0xff]  ;;  %v4561_v18 = vld [vmem:[%s10107_s4 + $0x898] sm:$0xff] }
 0x43f   : > { %5728 = vmatpush1.bf16.msra.mxu0 %v5727_v36  ;;  %5792 = vmatpush1.bf16.msra.mxu1 %v5791_v37  ;;  %v2929_v36 = vld [vmem:[%s10107_s4 + $0x240] sm:$0xff]  ;;  %v2974_v29 = vld [vmem:[%s10107_s4 + $0x3a8] sm:$0xff] }
 0x440   : > { %5730 = vmatprep.subr.bf16.mxu0 %v5729_v40  ;;  %5794 = vmatprep.subr.bf16.mxu1 %v5793_v41  ;;  %v2933_v37 = vld [vmem:[%s10107_s4 + $0x260] sm:$0xff]  ;;  %v2931_v40 = vld [vmem:[%s10107_s4 + $0x250] sm:$0xff]  ;;  %v4559_v16 = vld [vmem:[%s10107_s4 + $0x888] sm:$0xff] }
 0x441   : > { %v2935_v41 = vld [vmem:[%s10107_s4 + $0x270] sm:$0xff]  ;;  %v5751_v46 = vpack.c.bf16 %v2933_v37, %v2929_v36  ;;  %v5769_v36 = vpack.c.bf16 %v2974_v29, %v2970_v28  ;;  %v5833_v37 = vpack.c.bf16 %v2976_v31, %v2972_v30  ;;  %v4563_v17 = vld [vmem:[%s10107_s4 + $0x8a8] sm:$0xff]  ;;  %v4569_v30 = vld [vmem:[%s10107_s4 + $0x8d8] sm:$0xff] }
 0x442   : > { %v5815_v47 = vpack.c.bf16 %v2935_v41, %v2931_v40  ;;  %v2978_v40 = vld [vmem:[%s10107_s4 + $0x3c8] sm:$0xff]  ;;  %v4573_v31 = vld [vmem:[%s10107_s4 + $0x8f8] sm:$0xff] }
 0x443   : > { %5732 = vmatpush1.bf16.msra.mxu0 %v5731_v48  ;;  %5796 = vmatpush1.bf16.msra.mxu1 %v5795_v49  ;;  %v2937_v48 = vld [vmem:[%s10107_s4 + $0x280] sm:$0xff]  ;;  %v2982_v41 = vld [vmem:[%s10107_s4 + $0x3e8] sm:$0xff] }
 0x444   : > { %5734 = vmatprep.subr.bf16.mxu0 %v5733_v14  ;;  %5798 = vmatprep.subr.bf16.mxu1 %v5797_v52  ;;  %v2941_v49 = vld [vmem:[%s10107_s4 + $0x2a0] sm:$0xff]  ;;  %v2939_v14 = vld [vmem:[%s10107_s4 + $0x290] sm:$0xff]  ;;  %v4567_v28 = vld [vmem:[%s10107_s4 + $0x8c8] sm:$0xff] }
 0x445   : > { %v2943_v52 = vld [vmem:[%s10107_s4 + $0x2b0] sm:$0xff]  ;;  %v5755_v56 = vpack.c.bf16 %v2941_v49, %v2937_v48  ;;  %v5773_v48 = vpack.c.bf16 %v2982_v41, %v2978_v40  ;;  %v5837_v49 = vpack.c.bf16 %v2984_v43, %v2980_v42  ;;  %v4571_v29 = vld [vmem:[%s10107_s4 + $0x8e8] sm:$0xff]  ;;  %v4577_v42 = vld [vmem:[%s10107_s4 + $0x918] sm:$0xff] }
 0x446   : > { %v5819_v57 = vpack.c.bf16 %v2943_v52, %v2939_v14  ;;  %v4543_v14 = vld [vmem:[%s10107_s4 + $0x808] sm:$0xff]  ;;  %v4581_v43 = vld [vmem:[%s10107_s4 + $0x938] sm:$0xff] }
 0x447   : > { %5736 = vmatpush1.bf16.msra.mxu0 %v5735_v58  ;;  %5800 = vmatpush1.bf16.msra.mxu1 %v5799_v60  ;;  %v2945_v58 = vld [vmem:[%s10107_s4 + $0x2c0] sm:$0xff]  ;;  %v4547_v52 = vld [vmem:[%s10107_s4 + $0x828] sm:$0xff] }
 0x448   : > { %5738 = vmatprep.subr.bf16.mxu0 %v5737_v0  ;;  %5802 = vmatprep.subr.bf16.mxu1 %v5801_v1  ;;  %v2949_v60 = vld [vmem:[%s10107_s4 + $0x2e0] sm:$0xff]  ;;  %v2947_v0 = vld [vmem:[%s10107_s4 + $0x2d0] sm:$0xff]  ;;  %v4575_v40 = vld [vmem:[%s10107_s4 + $0x908] sm:$0xff] }
 0x449   : > { %v2951_v1 = vld [vmem:[%s10107_s4 + $0x2f0] sm:$0xff]  ;;  %v5759_v5 = vpack.c.bf16 %v2949_v60, %v2945_v58  ;;  %v5905_v58 = vpack.c.bf16 %v4549_v24, %v4545_v53  ;;  %v4542_v60 = vld [vmem:[%s10107_s4 + $0x800] sm:$0xff]  ;;  %v4579_v41 = vld [vmem:[%s10107_s4 + $0x928] sm:$0xff] }
 0x44a   : > { %v5823_v6 = vpack.c.bf16 %v2951_v1, %v2947_v0  ;;  %v4544_v0 = vld [vmem:[%s10107_s4 + $0x810] sm:$0xff]  ;;  %v4585_v53 = vld [vmem:[%s10107_s4 + $0x958] sm:$0xff] }
 0x44b   : > { %5740 = vmatpush1.bf16.msra.mxu0 %v5739_v8  ;;  %5804 = vmatpush1.bf16.msra.mxu1 %v5803_v9  ;;  %v2953_v8 = vld [vmem:[%s10107_s4 + $0x300] sm:$0xff]  ;;  %v4548_v1 = vld [vmem:[%s10107_s4 + $0x830] sm:$0xff]  ;;  %v4589_v24 = vld [vmem:[%s10107_s4 + $0x978] sm:$0xff] }
 0x44c   : > { %5742 = vmatprep.subr.bf16.mxu0 %v5741_v12  ;;  %5806 = vmatprep.subr.bf16.mxu1 %v5805_v13  ;;  %v2957_v9 = vld [vmem:[%s10107_s4 + $0x320] sm:$0xff]  ;;  %v2955_v12 = vld [vmem:[%s10107_s4 + $0x310] sm:$0xff] }
 0x44d   : > { %v2959_v13 = vld [vmem:[%s10107_s4 + $0x330] sm:$0xff]  ;;  %v5763_v19 = vpack.c.bf16 %v2957_v9, %v2953_v8  ;;  %v4550_v8 = vld [vmem:[%s10107_s4 + $0x840] sm:$0xff] }
 0x44e   : > { %v5827_v20 = vpack.c.bf16 %v2959_v13, %v2955_v12  ;;  %v4554_v9 = vld [vmem:[%s10107_s4 + $0x860] sm:$0xff]  ;;  %v5845_v12 = vpack.c.bf16 %v4555_v3, %v4551_v2  ;;  %v5909_v13 = vpack.c.bf16 %v4557_v4, %v4553_v7  ;;  %v4595_v2 = vld [vmem:[%s10107_s4 + $0x9a8] sm:$0xff]  ;;  %v4593_v3 = vld [vmem:[%s10107_s4 + $0x998] sm:$0xff] }
 0x44f   : > { %5744 = vmatpush1.bf16.msra.mxu0 %v5743_v21  ;;  %5808 = vmatpush1.bf16.msra.mxu1 %v5807_v22  ;;  %v2961_v21 = vld [vmem:[%s10107_s4 + $0x340] sm:$0xff]  ;;  %v4597_v7 = vld [vmem:[%s10107_s4 + $0x9b8] sm:$0xff] }
 0x450   : > { %5746 = vmatprep.subr.bf16.mxu0 %v5745_v26  ;;  %5810 = vmatprep.subr.bf16.mxu1 %v5809_v27  ;;  %v2965_v22 = vld [vmem:[%s10107_s4 + $0x360] sm:$0xff]  ;;  %v2963_v26 = vld [vmem:[%s10107_s4 + $0x350] sm:$0xff] }
 0x451   : > { %v2967_v27 = vld [vmem:[%s10107_s4 + $0x370] sm:$0xff]  ;;  %v5767_v32 = vpack.c.bf16 %v2965_v22, %v2961_v21  ;;  %v5849_v22 = vpack.c.bf16 %v4563_v17, %v4559_v16  ;;  %v4601_v16 = vld [vmem:[%s10107_s4 + $0x9d8] sm:$0xff] }
 0x452   : > { %v5831_v33 = vpack.c.bf16 %v2967_v27, %v2963_v26  ;;  %v4564_v27 = vld [vmem:[%s10107_s4 + $0x8b0] sm:$0xff]  ;;  %v4605_v17 = vld [vmem:[%s10107_s4 + $0x9f8] sm:$0xff] }
 0x453   : > { %5748 = vmatpush1.bf16.msra.mxu0 %v5747_v34  ;;  %5812 = vmatpush1.bf16.msra.mxu1 %v5811_v35  ;;  %v2969_v34 = vld [vmem:[%s10107_s4 + $0x380] sm:$0xff] }
 0x454   : > { %5750 = vmatprep.subr.bf16.mxu0 %v5749_v38  ;;  %5814 = vmatprep.subr.bf16.mxu1 %v5813_v39  ;;  %v2973_v35 = vld [vmem:[%s10107_s4 + $0x3a0] sm:$0xff]  ;;  %v2971_v38 = vld [vmem:[%s10107_s4 + $0x390] sm:$0xff] }
 0x455   : > { %v2975_v39 = vld [vmem:[%s10107_s4 + $0x3b0] sm:$0xff]  ;;  %v5771_v44 = vpack.c.bf16 %v2973_v35, %v2969_v34  ;;  %v5853_v34 = vpack.c.bf16 %v4571_v29, %v4567_v28  ;;  %v4566_v35 = vld [vmem:[%s10107_s4 + $0x8c0] sm:$0xff]  ;;  %v4609_v28 = vld [vmem:[%s10107_s4 + $0xa18] sm:$0xff] }
 0x456   : > { %v5835_v45 = vpack.c.bf16 %v2975_v39, %v2971_v38  ;;  %v5917_v38 = vpack.c.bf16 %v4573_v31, %v4569_v30  ;;  %v4572_v39 = vld [vmem:[%s10107_s4 + $0x8f0] sm:$0xff]  ;;  %v4613_v29 = vld [vmem:[%s10107_s4 + $0xa38] sm:$0xff] }
 0x457   : > { %5752 = vmatpush1.bf16.msra.mxu0 %v5751_v46  ;;  %5816 = vmatpush1.bf16.msra.mxu1 %v5815_v47  ;;  %v2977_v46 = vld [vmem:[%s10107_s4 + $0x3c0] sm:$0xff] }
 0x458   : > { %5754 = vmatprep.subr.bf16.mxu0 %v5753_v50  ;;  %5818 = vmatprep.subr.bf16.mxu1 %v5817_v51  ;;  %v2981_v47 = vld [vmem:[%s10107_s4 + $0x3e0] sm:$0xff]  ;;  %v2979_v50 = vld [vmem:[%s10107_s4 + $0x3d0] sm:$0xff] }
 0x459   : > { %v2983_v51 = vld [vmem:[%s10107_s4 + $0x3f0] sm:$0xff]  ;;  %v5775_v55 = vpack.c.bf16 %v2981_v47, %v2977_v46  ;;  %v5857_v46 = vpack.c.bf16 %v4579_v41, %v4575_v40  ;;  %v4574_v47 = vld [vmem:[%s10107_s4 + $0x900] sm:$0xff]  ;;  %v4617_v40 = vld [vmem:[%s10107_s4 + $0xa58] sm:$0xff] }
 0x45a   : > { %v4621_v41 = vld [vmem:[%s10107_s4 + $0xa78] sm:$0xff] }
 0x45b   : > { %5756 = vmatpush1.bf16.msra.mxu0 %v5755_v56  ;;  %5820 = vmatpush1.bf16.msra.mxu1 %v5819_v57  ;;  %v5839_v56 = vpack.c.bf16 %v2983_v51, %v2979_v50  ;;  %v5841_v57 = vpack.c.bf16 %v4547_v52, %v4543_v14  ;;  %v5921_v50 = vpack.c.bf16 %v4581_v43, %v4577_v42  ;;  %v4580_v51 = vld [vmem:[%s10107_s4 + $0x930] sm:$0xff]  ;;  %v4583_v14 = vld [vmem:[%s10107_s4 + $0x948] sm:$0xff] }
 0x45c   : > { %5758 = vmatprep.subr.bf16.mxu0 %v5757_v62  ;;  %5822 = vmatprep.subr.bf16.mxu1 %v5821_v63  ;;  %v4546_v62 = vld [vmem:[%s10107_s4 + $0x820] sm:$0xff]  ;;  %v3539_v63 = vcombine.high %v9712_v54, %v9712_v54  ;;  %v4587_v52 = vld [vmem:[%s10107_s4 + $0x968] sm:$0xff] }
 0x45f   : > { %5760 = vmatpush1.bf16.msra.mxu0 %v5759_v5  ;;  %5824 = vmatpush1.bf16.msra.mxu1 %v5823_v6  ;;  %v5843_v5 = vpack.c.bf16 %v4546_v62, %v4542_v60  ;;  %v5907_v6 = vpack.c.bf16 %v4548_v1, %v4544_v0  ;;  %v4586_v60 = vld [vmem:[%s10107_s4 + $0x960] sm:$0xff]  ;;  %v4584_v62 = vld [vmem:[%s10107_s4 + $0x950] sm:$0xff]  ;;  %v4591_v1 = vld [vmem:[%s10107_s4 + $0x988] sm:$0xff] }
 0x460   : > { %5762 = vmatprep.subr.bf16.mxu0 %v5761_v10  ;;  %5826 = vmatprep.subr.bf16.mxu1 %v5825_v11  ;;  %v4552_v10 = vld [vmem:[%s10107_s4 + $0x850] sm:$0xff]  ;;  %v3541_v11 = vrot.slane %v3539_v63, 2  ;;  %v5925_v63 = vpack.c.bf16 %v4589_v24, %v4585_v53 }
 0x461   : > { %v5911_v21 = vpack.c.bf16 %v4556_v15, %v4552_v10  ;;  %v4588_v0 = vld [vmem:[%s10107_s4 + $0x970] sm:$0xff]  ;;  %v4603_v15 = vld [vmem:[%s10107_s4 + $0x9e8] sm:$0xff] }
 0x462   : > { %v4592_v10 = vld [vmem:[%s10107_s4 + $0x990] sm:$0xff] }
 0x463   : > { %5764 = vmatpush1.bf16.msra.mxu0 %v5763_v19  ;;  %5828 = vmatpush1.bf16.msra.mxu1 %v5827_v20  ;;  %v4565_v19 = vld [vmem:[%s10107_s4 + $0x8b8] sm:$0xff]  ;;  %v5847_v20 = vpack.c.bf16 %v4554_v9, %v4550_v8  ;;  %v4590_v8 = vld [vmem:[%s10107_s4 + $0x980] sm:$0xff] }
 0x464   : > { %5766 = vmatprep.subr.bf16.mxu0 %v5765_v23  ;;  %5830 = vmatprep.subr.bf16.mxu1 %v5829_v25  ;;  %v4558_v23 = vld [vmem:[%s10107_s4 + $0x880] sm:$0xff]  ;;  %v4560_v25 = vld [vmem:[%s10107_s4 + $0x890] sm:$0xff]  ;;  %v5913_v26 = vpack.c.bf16 %v4565_v19, %v4561_v18 }
 0x465   : > { %v4594_v9 = vld [vmem:[%s10107_s4 + $0x9a0] sm:$0xff] }
 0x466   : > { %v5867_v18 = vpack.c.bf16 %v4594_v9, %v4590_v8  ;;  %v4632_v8 = vld [vmem:[%s10107_s4 + $0xad0] sm:$0xff] }
 0x467   : > { %5768 = vmatpush1.bf16.msra.mxu0 %v5767_v32  ;;  %5832 = vmatpush1.bf16.msra.mxu1 %v5831_v33  ;;  %v5915_v33 = vpack.c.bf16 %v4564_v27, %v4560_v25  ;;  %v4604_v25 = vld [vmem:[%s10107_s4 + $0x9f0] sm:$0xff]  ;;  %v4611_v27 = vld [vmem:[%s10107_s4 + $0xa28] sm:$0xff] }
 0x468   : > { %5770 = vmatprep.subr.bf16.mxu0 %v5769_v36  ;;  %5834 = vmatprep.subr.bf16.mxu1 %v5833_v37  ;;  %v4570_v36 = vld [vmem:[%s10107_s4 + $0x8e0] sm:$0xff]  ;;  %v4568_v37 = vld [vmem:[%s10107_s4 + $0x8d0] sm:$0xff] }
 0x46b   : > { %5772 = vmatpush1.bf16.msra.mxu0 %v5771_v44  ;;  %5836 = vmatpush1.bf16.msra.mxu1 %v5835_v45  ;;  %v5855_v44 = vpack.c.bf16 %v4570_v36, %v4566_v35  ;;  %v5919_v45 = vpack.c.bf16 %v4572_v39, %v4568_v37  ;;  %v4608_v35 = vld [vmem:[%s10107_s4 + $0xa10] sm:$0xff]  ;;  %v5937_v36 = vpack.c.bf16 %v4613_v29, %v4609_v28  ;;  %v4619_v39 = vld [vmem:[%s10107_s4 + $0xa68] sm:$0xff] }
 0x46c   : > { %5774 = vmatprep.subr.bf16.mxu0 %v5773_v48  ;;  %5838 = vmatprep.subr.bf16.mxu1 %v5837_v49  ;;  %v4578_v48 = vld [vmem:[%s10107_s4 + $0x920] sm:$0xff]  ;;  %v4576_v49 = vld [vmem:[%s10107_s4 + $0x910] sm:$0xff] }
 0x46d   : > { %v4612_v37 = vld [vmem:[%s10107_s4 + $0xa30] sm:$0xff] }
 0x46e   : > { %v5939_v43 = vpack.c.bf16 %v4612_v37, %v4608_v35  ;;  %v4652_v35 = vld [vmem:[%s10107_s4 + $0xb70] sm:$0xff]  ;;  %v4659_v37 = vld [vmem:[%s10107_s4 + $0xba8] sm:$0xff] }
 0x46f   : > { %5776 = vmatpush1.bf16.msra.mxu0 %v5775_v55  ;;  %5840 = vmatpush1.bf16.msra.mxu1 %v5839_v56  ;;  %v5859_v55 = vpack.c.bf16 %v4578_v48, %v4574_v47  ;;  %v5923_v56 = vpack.c.bf16 %v4580_v51, %v4576_v49  ;;  %v4616_v47 = vld [vmem:[%s10107_s4 + $0xa50] sm:$0xff]  ;;  %v5941_v48 = vpack.c.bf16 %v4621_v41, %v4617_v40  ;;  %v4627_v51 = vld [vmem:[%s10107_s4 + $0xaa8] sm:$0xff] }
 0x470   : > { %5842 = vmatprep.subr.bf16.mxu0 %v5841_v57  ;;  %5906 = vmatprep.subr.bf16.mxu1 %v5905_v58  ;;  %v5861_v57 = vpack.c.bf16 %v4587_v52, %v4583_v14  ;;  %v4582_v58 = vld [vmem:[%s10107_s4 + $0x940] sm:$0xff]  ;;  %v4620_v49 = vld [vmem:[%s10107_s4 + $0xa70] sm:$0xff]  ;;  %v4625_v14 = vld [vmem:[%s10107_s4 + $0xa98] sm:$0xff] }
 0x471   : > { %v5863_v4 = vpack.c.bf16 %v4586_v60, %v4582_v58  ;;  %v4629_v52 = vld [vmem:[%s10107_s4 + $0xab8] sm:$0xff]  ;;  %v5943_v24 = vpack.c.bf16 %v4620_v49, %v4616_v47  ;;  %v4624_v58 = vld [vmem:[%s10107_s4 + $0xa90] sm:$0xff]  ;;  %v4667_v49 = vld [vmem:[%s10107_s4 + $0xbe8] sm:$0xff] }
 0x472   : > { %3331 = vmatmul.mubr.f32.vlgmr.msra.gmra.mrb[8].mxu0 %v9348_v61  ;;  %3402 = vmatmul.mubr.f32.vlgmr.msra.gmra.mrb[8].mxu1 %v9348_v61  ;;  %v4562_v61 = vld [vmem:[%s10107_s4 + $0x8a0] sm:$0xff]  ;;  %v5945_v60 = vpack.c.bf16 %v4629_v52, %v4625_v14  ;;  %v4660_v47 = vld [vmem:[%s10107_s4 + $0xbb0] sm:$0xff] }
 0x473   : > { %5844 = vmatpush1.bf16.msra.mxu0 %v5843_v5  ;;  %3608 = vmatprep.mubr.f32.mxu0 %v3541_v11  ;;  %v5851_v32 = vpack.c.bf16 %v4562_v61, %v4558_v23  ;;  %v5927_v5 = vpack.c.bf16 %v4588_v0, %v4584_v62  ;;  %v4600_v23 = vld [vmem:[%s10107_s4 + $0x9d0] sm:$0xff]  ;;  %v5933_v61 = vpack.c.bf16 %v4605_v17, %v4601_v16  ;;  %v4635_v0 = vld [vmem:[%s10107_s4 + $0xae8] sm:$0xff] }
 0x474   : > { %5908 = vmatpush1.bf16.msra.mxu1 %v5907_v6  ;;  %3679 = vmatprep.mubr.f32.mxu1 %v3541_v11  ;;  %v5865_v6 = vpack.c.bf16 %v4595_v2, %v4591_v1  ;;  %v5929_v11 = vpack.c.bf16 %v4597_v7, %v4593_v3  ;;  %v5935_v31 = vpack.c.bf16 %v4604_v25, %v4600_v23  ;;  %v4628_v62 = vld [vmem:[%s10107_s4 + $0xab0] sm:$0xff]  ;;  %v4633_v1 = vld [vmem:[%s10107_s4 + $0xad8] sm:$0xff]  ;;  %v4651_v25 = vld [vmem:[%s10107_s4 + $0xb68] sm:$0xff] }
 0x475   : > { %5846 = vmatprep.subr.bf16.mxu0 %v5845_v12  ;;  %5910 = vmatprep.subr.bf16.mxu1 %v5909_v13  ;;  %v4596_v12 = vld [vmem:[%s10107_s4 + $0x9b0] sm:$0xff]  ;;  %v4599_v13 = vld [vmem:[%s10107_s4 + $0x9c8] sm:$0xff]  ;;  %v4637_v2 = vld [vmem:[%s10107_s4 + $0xaf8] sm:$0xff]  ;;  %v5947_v7 = vpack.c.bf16 %v4628_v62, %v4624_v58 }
 0x476   : > { %v5931_v19 = vpack.c.bf16 %v4596_v12, %v4592_v10  ;;  %v5949_v9 = vpack.c.bf16 %v4637_v2, %v4633_v1  ;;  %v4636_v10 = vld [vmem:[%s10107_s4 + $0xaf0] sm:$0xff]  ;;  %v4643_v12 = vld [vmem:[%s10107_s4 + $0xb28] sm:$0xff] }
 0x477   : > { %5848 = vmatpush1.bf16.msra.mxu0 %v5847_v20  ;;  %v5869_v20 = vpack.c.bf16 %v4603_v15, %v4599_v13  ;;  %v4641_v13 = vld [vmem:[%s10107_s4 + $0xb18] sm:$0xff]  ;;  %v5951_v17 = vpack.c.bf16 %v4636_v10, %v4632_v8  ;;  %v4644_v23 = vld [vmem:[%s10107_s4 + $0xb30] sm:$0xff]  ;;  %v3716_v8 = vsub.s32 0, %v6965_v59 }
 0x478   : > { %5912 = vmatpush1.bf16.msra.mxu1 %v5911_v21  ;;  %5850 = vmatprep.subr.bf16.mxu0 %v5849_v22  ;;  %v4598_v21 = vld [vmem:[%s10107_s4 + $0x9c0] sm:$0xff]  ;;  %v4645_v15 = vld [vmem:[%s10107_s4 + $0xb38] sm:$0xff]  ;;  %v4668_v58 = vld [vmem:[%s10107_s4 + $0xbf0] sm:$0xff] }
 0x479   : > { %5914 = vmatprep.subr.bf16.mxu1 %v5913_v26  ;;  %v4602_v22 = vld [vmem:[%s10107_s4 + $0x9e0] sm:$0xff]  ;;  %v4607_v26 = vld [vmem:[%s10107_s4 + $0xa08] sm:$0xff] }
 0x47a   : > { %v5871_v30 = vpack.c.bf16 %v4602_v22, %v4598_v21  ;;  %v4640_v21 = vld [vmem:[%s10107_s4 + $0xb10] sm:$0xff]  ;;  %v5953_v22 = vpack.c.bf16 %v4645_v15, %v4641_v13  ;;  %v3720_v13 = vsub.s32 1, %v6965_v59 }
 0x47b   : > { %5852 = vmatpush1.bf16.msra.mxu0 %v5851_v32  ;;  %v5873_v32 = vpack.c.bf16 %v4611_v27, %v4607_v26  ;;  %v4649_v26 = vld [vmem:[%s10107_s4 + $0xb58] sm:$0xff]  ;;  %v5955_v29 = vpack.c.bf16 %v4644_v23, %v4640_v21 }
 0x47c   : > { %5916 = vmatpush1.bf16.msra.mxu1 %v5915_v33  ;;  %5854 = vmatprep.subr.bf16.mxu0 %v5853_v34  ;;  %v4606_v33 = vld [vmem:[%s10107_s4 + $0xa00] sm:$0xff]  ;;  %v4653_v27 = vld [vmem:[%s10107_s4 + $0xb78] sm:$0xff] }
 0x47d   : > { %5918 = vmatprep.subr.bf16.mxu1 %v5917_v38  ;;  %v4610_v34 = vld [vmem:[%s10107_s4 + $0xa20] sm:$0xff]  ;;  %v4615_v38 = vld [vmem:[%s10107_s4 + $0xa48] sm:$0xff] }
 0x47e   : > { %v5875_v42 = vpack.c.bf16 %v4610_v34, %v4606_v33  ;;  %v4648_v33 = vld [vmem:[%s10107_s4 + $0xb50] sm:$0xff]  ;;  %v5957_v34 = vpack.c.bf16 %v4653_v27, %v4649_v26 }
 0x47f   : > { %5856 = vmatpush1.bf16.msra.mxu0 %v5855_v44  ;;  %v5877_v44 = vpack.c.bf16 %v4619_v39, %v4615_v38  ;;  %v4657_v38 = vld [vmem:[%s10107_s4 + $0xb98] sm:$0xff]  ;;  %v5959_v41 = vpack.c.bf16 %v4652_v35, %v4648_v33 }
 0x480   : > { %5920 = vmatpush1.bf16.msra.mxu1 %v5919_v45  ;;  %5858 = vmatprep.subr.bf16.mxu0 %v5857_v46  ;;  %v4614_v45 = vld [vmem:[%s10107_s4 + $0xa40] sm:$0xff]  ;;  %v4661_v39 = vld [vmem:[%s10107_s4 + $0xbb8] sm:$0xff] }
 0x481   : > { %5922 = vmatprep.subr.bf16.mxu1 %v5921_v50  ;;  %v4618_v46 = vld [vmem:[%s10107_s4 + $0xa60] sm:$0xff]  ;;  %v4623_v50 = vld [vmem:[%s10107_s4 + $0xa88] sm:$0xff] }
 0x482   : > { %v5879_v53 = vpack.c.bf16 %v4618_v46, %v4614_v45  ;;  %v4656_v45 = vld [vmem:[%s10107_s4 + $0xb90] sm:$0xff]  ;;  %v5961_v46 = vpack.c.bf16 %v4661_v39, %v4657_v38 }
 0x483   : > { %5860 = vmatpush1.bf16.msra.mxu0 %v5859_v55  ;;  %v5881_v55 = vpack.c.bf16 %v4627_v51, %v4623_v50  ;;  %v4665_v50 = vld [vmem:[%s10107_s4 + $0xbd8] sm:$0xff]  ;;  %v5963_v52 = vpack.c.bf16 %v4660_v47, %v4656_v45 }
 0x484   : > { %5924 = vmatpush1.bf16.msra.mxu1 %v5923_v56  ;;  %5862 = vmatprep.subr.bf16.mxu0 %v5861_v57  ;;  %v4622_v56 = vld [vmem:[%s10107_s4 + $0xa80] sm:$0xff]  ;;  %v4669_v51 = vld [vmem:[%s10107_s4 + $0xbf8] sm:$0xff] }
 0x485   : > { %5926 = vmatprep.subr.bf16.mxu1 %v5925_v63  ;;  %v4626_v57 = vld [vmem:[%s10107_s4 + $0xaa0] sm:$0xff]  ;;  %v4631_v63 = vld [vmem:[%s10107_s4 + $0xac8] sm:$0xff] }
 0x486   : > { %v5883_v3 = vpack.c.bf16 %v4626_v57, %v4622_v56  ;;  %v5965_v56 = vpack.c.bf16 %v4669_v51, %v4665_v50  ;;  %v4664_v57 = vld [vmem:[%s10107_s4 + $0xbd0] sm:$0xff] }
 0x487   : > { %5864 = vmatpush1.bf16.msra.mxu0 %v5863_v4  ;;  %v5885_v4 = vpack.c.bf16 %v4635_v0, %v4631_v63  ;;  %v5967_v62 = vpack.c.bf16 %v4668_v58, %v4664_v57  ;;  %v3540_v63 = vrot.slane %v9712_v54, 2 }
 0x488   : > { %5928 = vmatpush1.bf16.msra.mxu1 %v5927_v5  ;;  %5866 = vmatprep.subr.bf16.mxu0 %v5865_v6  ;;  %v4630_v5 = vld [vmem:[%s10107_s4 + $0xac0] sm:$0xff] }
 0x489   : > { %5930 = vmatprep.subr.bf16.mxu1 %v5929_v11  ;;  %v4634_v6 = vld [vmem:[%s10107_s4 + $0xae0] sm:$0xff]  ;;  %v4639_v11 = vld [vmem:[%s10107_s4 + $0xb08] sm:$0xff] }
 0x48a   : > { %v5887_v16 = vpack.c.bf16 %v4634_v6, %v4630_v5 }
 0x48b   : > { %5868 = vmatpush1.bf16.msra.mxu0 %v5867_v18  ;;  %v5889_v18 = vpack.c.bf16 %v4643_v12, %v4639_v11  ;;  %v3712_v11 = vld [vmem:[%s10108_s5] sm:$0x3] }
 0x48c   : > { %5932 = vmatpush1.bf16.msra.mxu1 %v5931_v19  ;;  %5870 = vmatprep.subr.bf16.mxu0 %v5869_v20  ;;  %v4638_v19 = vld [vmem:[%s10107_s4 + $0xb00] sm:$0xff]  ;;  %v3721_v21 = vrot.slane %v3712_v11, %v3720_v13 }
 0x48d   : > { %5934 = vmatprep.subr.bf16.mxu1 %v5933_v61  ;;  %v4642_v20 = vld [vmem:[%s10107_s4 + $0xb20] sm:$0xff]  ;;  %v4647_v61 = vld [vmem:[%s10107_s4 + $0xb48] sm:$0xff] }
 0x48e   : > { %v5891_v28 = vpack.c.bf16 %v4642_v20, %v4638_v19 }
 0x48f   : > { %5872 = vmatpush1.bf16.msra.mxu0 %v5871_v30  ;;  %v5893_v30 = vpack.c.bf16 %v4651_v25, %v4647_v61 }
 0x490   : > { %5936 = vmatpush1.bf16.msra.mxu1 %v5935_v31  ;;  %5874 = vmatprep.subr.bf16.mxu0 %v5873_v32  ;;  %v4646_v31 = vld [vmem:[%s10107_s4 + $0xb40] sm:$0xff] }
 0x491   : > { %5938 = vmatprep.subr.bf16.mxu1 %v5937_v36  ;;  %v4650_v32 = vld [vmem:[%s10107_s4 + $0xb60] sm:$0xff]  ;;  %v4655_v36 = vld [vmem:[%s10107_s4 + $0xb88] sm:$0xff] }
 0x492   : > { %v5895_v40 = vpack.c.bf16 %v4650_v32, %v4646_v31 }
 0x493   : > { %5876 = vmatpush1.bf16.msra.mxu0 %v5875_v42  ;;  %v5897_v42 = vpack.c.bf16 %v4659_v37, %v4655_v36 }
 0x494   : > { %5940 = vmatpush1.bf16.msra.mxu1 %v5939_v43  ;;  %5878 = vmatprep.subr.bf16.mxu0 %v5877_v44  ;;  %v4654_v43 = vld [vmem:[%s10107_s4 + $0xb80] sm:$0xff] }
 0x495   : > { %5942 = vmatprep.subr.bf16.mxu1 %v5941_v48  ;;  %v4658_v44 = vld [vmem:[%s10107_s4 + $0xba0] sm:$0xff]  ;;  %v4663_v48 = vld [vmem:[%s10107_s4 + $0xbc8] sm:$0xff] }
 0x496   : > { %v5899_v14 = vpack.c.bf16 %v4658_v44, %v4654_v43 }
 0x497   : > { %5880 = vmatpush1.bf16.msra.mxu0 %v5879_v53  ;;  %v5901_v53 = vpack.c.bf16 %v4667_v49, %v4663_v48 }
 0x498   : > { %5944 = vmatpush1.bf16.msra.mxu1 %v5943_v24  ;;  %5882 = vmatprep.subr.bf16.mxu0 %v5881_v55  ;;  %v4662_v24 = vld [vmem:[%s10107_s4 + $0xbc0] sm:$0xff] }
 0x499   : > { %5946 = vmatprep.subr.bf16.mxu1 %v5945_v60  ;;  %v4666_v55 = vld [vmem:[%s10107_s4 + $0xbe0] sm:$0xff] }
 0x49a   : > { %v5903_v60 = vpack.c.bf16 %v4666_v55, %v4662_v24 }
 0x49b   : > { %5884 = vmatpush1.bf16.msra.mxu0 %v5883_v3 }
 0x49c   : > { %5948 = vmatpush1.bf16.msra.mxu1 %v5947_v7  ;;  %5886 = vmatprep.subr.bf16.mxu0 %v5885_v4 }
 0x49d   : > { %5950 = vmatprep.subr.bf16.mxu1 %v5949_v9 }
 0x49f   : > { %5888 = vmatpush1.bf16.msra.mxu0 %v5887_v16 }
 0x4a0   : > { %5952 = vmatpush1.bf16.msra.mxu1 %v5951_v17  ;;  %5890 = vmatprep.subr.bf16.mxu0 %v5889_v18  ;;  %v3717_v18 = vrot.slane %v3712_v11, %v3716_v8 }
 0x4a1   : > { %5954 = vmatprep.subr.bf16.mxu1 %v5953_v22 }
 0x4a3   : > { %5892 = vmatpush1.bf16.msra.mxu0 %v5891_v28 }
 0x4a4   : > { %5956 = vmatpush1.bf16.msra.mxu1 %v5955_v29  ;;  %5894 = vmatprep.subr.bf16.mxu0 %v5893_v30 }
 0x4a5   : > { %5958 = vmatprep.subr.bf16.mxu1 %v5957_v34 }
 0x4a7   : > { %5896 = vmatpush1.bf16.msra.mxu0 %v5895_v40 }
 0x4a8   : > { %5960 = vmatpush1.bf16.msra.mxu1 %v5959_v41  ;;  %5898 = vmatprep.subr.bf16.mxu0 %v5897_v42 }
 0x4a9   : > { %5962 = vmatprep.subr.bf16.mxu1 %v5961_v46 }
 0x4ab   : > { %5900 = vmatpush1.bf16.msra.mxu0 %v5899_v14 }
 0x4ac   : > { %5964 = vmatpush1.bf16.msra.mxu1 %v5963_v52  ;;  %5902 = vmatprep.subr.bf16.mxu0 %v5901_v53 }
 0x4ad   : > { %5966 = vmatprep.subr.bf16.mxu1 %v5965_v56 }
 0x4af   : > { %5904 = vmatpush1.bf16.msra.mxu0 %v5903_v60 }
 0x4b0   : > { %5968 = vmatpush1.bf16.msra.mxu1 %v5967_v62 }
 0x4b2   : > { %3609 = vmatmul.mubr.f32.vlgmr.msra.gmra.mrb[8].mxu0 %v3540_v63 }
 0x4b3   : > { %3680 = vmatmul.mubr.f32.vlgmr.msra.gmra.mrb[8].mxu1 %v3540_v63 }
 0x585   : > { %v3610_v0 = vpop.f32.mrb[8].mxu0 }
 0x586   : > { %vm3690_vm5 = vcmp.ge.f32.partialorder %v3610_v0, 0.0  ;;  %v3694_v1 = vmul.f32 0.2, %v3610_v0  ;;  %v3681_v2 = vpop.f32.mrb[8].mxu1  ;;  %v3612_v3 = vpop.f32.mrb[9].mxu0 }
 0x587   : > { %vm3692_vm6 = vcmp.ge.f32.partialorder %v3681_v2, 0.0  ;;  %v3696_v7 = vmul.f32 0.2, %v3681_v2  ;;  %vm3691_vm7 = vcmp.ge.f32.partialorder %v3612_v3, 0.0  ;;  %v3695_v4 = vmul.f32 0.2, %v3612_v3 }
 0x588   : > { %v3698_v5 = vsel %vm3690_vm5, %v3610_v0, %v3694_v1  ;;  %v3683_v6 = vpop.f32.mrb[9].mxu1 }
 0x589   : > { %v3700_v9 = vsel %vm3692_vm6, %v3681_v2, %v3696_v7  ;;  %v3699_v10 = vsel %vm3691_vm7, %v3612_v3, %v3695_v4  ;;  %vm3693_vm8 = vcmp.ge.f32.partialorder %v3683_v6, 0.0  ;;  %v3697_v54 = vmul.f32 0.2, %v3683_v6 }
 0x58a   : > { %v3702_v12 = vmax.f32 %v3698_v5, %v3700_v9 }
 0x58b   : > { %v3701_v15 = vsel %vm3693_vm8, %v3683_v6, %v3697_v54 }
 0x58c   : > { %v3706_v16 = vrot.slane %v3702_v12, 1  ;;  %v3703_v17 = vmax.f32 %v3699_v10, %v3701_v15 }
 0x58e   : > { %v3707_v19 = vrot.slane %v3703_v17, 1  ;;  %v3710_v20 = vmax.f32 %v3702_v12, %v3706_v16 }
 0x590   : > { %v3711_v22 = vmax.f32 %v3703_v17, %v3707_v19  ;;  %v3724_v23 = vmul.f32 %v3717_v18, %v3710_v20 }
 0x592   : > { %v3725_v61 = vmul.f32 %v3721_v21, %v3711_v22  ;;  %v3727_v25 = vsel %vm3726_vm9, %v3724_v23, 0.0 }
 0x594   : > { %v3728_v26 = vsel %vm3726_vm9, %v3725_v61, 0.0 }
 0x595   : > { %v3729_v27 = vadd.f32 %v3728_v26, %v3727_v25 }
 0x597   : > { %3730 = vadd.xlane.f32.xlu0 %v3729_v27 }
 0x624   : > { %v3731_v28 = vpop.xlane.xlu0 %3730 }
 0x625   : > { %v3732_v29 = vsub.f32 0.0, %v3731_v28 }
 0x627   : > { %v3733_v30 = vmul.f32 1.442695, %v3732_v29 }
 0x629   : > { %6022 = vpow2.f32 %v3733_v30 }
 0x633   : > { %v6023_v59 = vpop.eup %6022 }
 0x634   : > { %v3735_v31 = vadd.f32 1.0, %v6023_v59 }
 0x636   : > { %6024 = vrcp.f32 %v3735_v31 }
 0x640   : > { %v6025_v32 = vpop.eup %6024 }
 0x641   : > { %3739 = vst.msk [vmem:[%s247_s8] sm:$0x1] %vm3738_vm10, %v6025_v32 }
 0x642 PF: > { %s16_s21 = sadd.s32 1, %s6032_s21  }
 0x643   : > { %p13_p4 = scmp.ge.s32.totalorder %s16_s21, 4  }
 0x645   :  { %15 = sbr.rel (!%p13_p4) target bundleno = 1 (0x1), region = 96 }

</bundles_post_ra>
